<compile_context>
chip_gen: v7x
topology: tpu7x:2x2x1
jax: 0.10.0
libtpu: 0.0.40
codegen_flags: <defaults>
</compile_context>

<pallas_src>
import jax
import jax.numpy as jnp
from jax.experimental import pallas as pl
from jax.experimental.pallas import tpu as pltpu


# ----------------------------------------------------------------------------
# Tile selection (per TPU generation)
# ----------------------------------------------------------------------------
def _device_tile_target():
    """(target_rows, min_grid_steps) tuned per TPU generation."""
    try:
        kind = jax.devices()[0].device_kind.lower()
    except Exception:
        kind = ""
    if "v5" in kind:        # v5e: 4x128^2 MXU, single TensorCore
        return 128, 1
    if "v7" in kind:        # v7x: 2x256^2 MXU, 2 TensorCores -> want >=2 grid steps
        return 256, 2
    return 256, 1           # v6e / default: 2x256^2 MXU, single TensorCore


def _pick_batch_tile(batch, num_nodes, target_rows, min_grid_steps):
    """Largest batch tile TB dividing B with TB*N <= target MXU rows, keeping
    the sublane dim 8-aligned (unless the tile covers the whole batch) and
    leaving at least `min_grid_steps` grid steps."""
    divisors = [d for d in range(1, batch + 1) if batch % d == 0]

    def legal(d):
        return (d * num_nodes) % 8 == 0 or d == batch

    good = [d for d in divisors
            if legal(d) and d * num_nodes <= target_rows
            and batch // d >= min_grid_steps]
    if good:
        return max(good)
    good = [d for d in divisors if legal(d) and batch // d >= min_grid_steps]
    if good:
        return min(good)
    return batch


# ----------------------------------------------------------------------------
# Fused DCGRU kernel (all L layers, one batch tile per grid step)
# ----------------------------------------------------------------------------
def _make_encoder_kernel(N, F, U, S, KD, L, TB):
    """Kernel operand layouts (C = F + U, K = S*KD + 1, R = TB*N, rows (b, n)):
      x_ref     : (R, F)         padded layer-0 input, f32
      h_ref     : (L, R, U)      incoming hidden state, f32
      sup_ref   : (S, R, R)      block-diagonal supports, bf16
      wcomb_ref : (L, K*C, 3U)   [W_ru_x|W_c_x ; W_ru_h|0] stacked, bf16
      wch_ref   : (L, K*U, U)    candidate h-part weights, bf16
      bru_ref   : (L, 1, 2U)     f32
      bc_ref    : (L, 1, U)      f32
      out_ref   : (L, R, U)      new hidden state per layer, f32
    """
    K = S * KD + 1
    C = F + U
    R = TB * N
    f32 = jnp.float32
    bf16 = jnp.bfloat16

    def kernel(x_ref, h_ref, sup_ref, wcomb_ref, wch_ref, bru_ref, bc_ref,
               out_ref):

        def cheb_terms_bf16(v0):
            """Chebyshev diffusion terms of v0 (R, W) vs. the block-diagonal
            supports.  Returns K bf16 copies (cast once per term, reused both
            as the next matmul operand and as projection rows); the recurrence
            itself stays in f32.  Faithful to torchts' x0 carry-over between
            supports."""
            v0_b = v0.astype(bf16)
            terms = [v0_b]
            x0_f, x0_b = v0, v0_b
            if KD > 0:
                for s in range(S):
                    A = sup_ref[s]                                # (R, R) bf16
                    x1_f = jnp.dot(A, x0_b, preferred_element_type=f32)
                    x1_b = x1_f.astype(bf16)
                    terms.append(x1_b)
                    for _ in range(2, KD + 1):
                        x2_f = 2.0 * jnp.dot(
                            A, x1_b, preferred_element_type=f32) - x0_f
                        x2_b = x2_f.astype(bf16)
                        terms.append(x2_b)
                        x1_f, x0_f = x2_f, x1_f
                        x1_b, x0_b = x2_b, x1_b
            return terms                                          # K x (R, W)

        layer_in = x_ref[...]                                     # (R, F) f32

        for l in range(L):
            h = h_ref[l]                                          # (R, U) f32

            # --- gates + candidate x-part: one diffusion of [x | h] and one
            # wide projection with output columns [r | u | cand_x].  The
            # h-rows of the cand_x weight block are zero, so cand_x is exactly
            # the x contribution of the candidate gconv.
            xh = jnp.concatenate([layer_in, h], axis=1)           # (R, C) f32
            feats_xh = jnp.concatenate(cheb_terms_bf16(xh), axis=1)   # (R, K*C)
            proj = jnp.dot(feats_xh, wcomb_ref[l],
                           preferred_element_type=f32)            # (R, 3U)
            ru = jax.nn.sigmoid(proj[:, :2 * U] + bru_ref[l])     # (R, 2U)
            r = ru[:, :U]
            u = ru[:, U:]

            # --- candidate: only r*h needs a fresh diffusion.
            rh = r * h                                            # (R, U) f32
            feats_rh = jnp.concatenate(cheb_terms_bf16(rh), axis=1)   # (R, K*U)
            cand = proj[:, 2 * U:] + jnp.dot(feats_rh, wch_ref[l],
                                             preferred_element_type=f32)
            c = jnp.tanh(cand + bc_ref[l])                        # (R, U)

            # --- GRU state update (f32) ---
            h_new = u * h + (1.0 - u) * c                         # (R, U)
            out_ref[l, :, :] = h_new

            # Next layer's input (zero-pad feature columns if input_dim > U;
            # padded columns hit zero weight rows).
            if F > U:
                layer_in = jnp.concatenate(
                    [h_new, jnp.zeros((R, F - U), f32)], axis=1)
            else:
                layer_in = h_new

    return kernel


# ----------------------------------------------------------------------------
# Host wrapper (DCGRU.forward / Encoder.forward)
# ----------------------------------------------------------------------------
def dcgru_forward(inputs, hidden_state, layer_params, supports, num_nodes,
                  num_units, batch_tile=None):
    """DCGRU.forward: inputs (B, N*D_in), hidden_state (L, B, N*U)."""
    B = inputs.shape[0]
    L = len(layer_params)
    N = num_nodes
    U = num_units
    D = inputs.shape[1] // N
    S = supports.shape[0]
    K = layer_params[0]["w_ru_x"].shape[0]
    KD = (K - 1) // S if S > 0 else 0
    F = max(D, U)              # padded per-node input width shared by layers
    C = F + U

    # ---- host-side weight stacking / zero padding (done once) ----
    wcomb_stack, wch_stack, bru_stack, bc_stack = [], [], [], []
    for p in layer_params:
        d_l = p["w_ru_x"].shape[1]

        def pad_x(w):          # (K, d_l, O) -> (K, F, O); padded rows hit zeros
            return jnp.pad(w, ((0, 0), (0, F - d_l), (0, 0)))

        # x-rows carry [W_ru_x | W_c_x]; h-rows carry [W_ru_h | 0].
        w_x = jnp.concatenate([pad_x(p["w_ru_x"]), pad_x(p["w_c_x"])], axis=2)
        w_h = jnp.concatenate(
            [p["w_ru_h"], jnp.zeros((K, U, U), p["w_ru_h"].dtype)], axis=2)
        wcomb = jnp.concatenate([w_x, w_h], axis=1)               # (K, C, 3U)
        wcomb_stack.append(wcomb.reshape(K * C, 3 * U))
        wch_stack.append(p["w_c_h"].reshape(K * U, U))
        bru_stack.append(jnp.reshape(p["b_ru"], (1, 2 * U)))
        bc_stack.append(jnp.reshape(p["b_c"], (1, U)))

    wcomb_all = jnp.stack(wcomb_stack).astype(jnp.bfloat16)       # (L, K*C, 3U)
    wch_all = jnp.stack(wch_stack).astype(jnp.bfloat16)           # (L, K*U, U)
    bru_all = jnp.stack(bru_stack).astype(jnp.float32)            # (L, 1, 2U)
    bc_all = jnp.stack(bc_stack).astype(jnp.float32)              # (L, 1, U)

    # ---- batch tile + block-diagonal supports (rows ordered (batch, node)) ----
    target_rows, min_steps = _device_tile_target()
    TB = batch_tile if batch_tile is not None else _pick_batch_tile(
        B, N, target_rows, min_steps)
    assert B % TB == 0, "batch must be divisible by the batch tile"
    R = TB * N
    eye = jnp.eye(TB, dtype=supports.dtype)
    sup_bd = jnp.einsum("bc,snm->sbncm", eye, supports).reshape(S, R, R)
    sup_bd = sup_bd.astype(jnp.bfloat16)                          # (S, R, R)

    # ---- layout plumbing (plain JAX) ----
    x = inputs.reshape(B, N, D).astype(jnp.float32)
    if F > D:
        x = jnp.pad(x, ((0, 0), (0, 0), (0, F - D)))
    x = x.reshape(B * N, F)
    h = hidden_state.astype(jnp.float32).reshape(L, B * N, U)

    kernel = _make_encoder_kernel(N, F, U, S, KD, L, TB)

    new_h = pl.pallas_call(
        kernel,
        out_shape=jax.ShapeDtypeStruct((L, B * N, U), jnp.float32),
        grid=(B // TB,),
        in_specs=[
            pl.BlockSpec((R, F), lambda b: (b, 0)),                 # x
            pl.BlockSpec((L, R, U), lambda b: (0, b, 0)),           # hidden in
            pl.BlockSpec((S, R, R), lambda b: (0, 0, 0)),           # supports
            pl.BlockSpec((L, K * C, 3 * U), lambda b: (0, 0, 0)),   # W_comb
            pl.BlockSpec((L, K * U, U), lambda b: (0, 0, 0)),       # W_c_h
            pl.BlockSpec((L, 1, 2 * U), lambda b: (0, 0, 0)),       # b_ru
            pl.BlockSpec((L, 1, U), lambda b: (0, 0, 0)),           # b_c
        ],
        out_specs=pl.BlockSpec((L, R, U), lambda b: (0, b, 0)),
        input_output_aliases={1: 0},      # reuse the hidden-state HBM buffer
        compiler_params=pltpu.CompilerParams(
            dimension_semantics=("parallel",)),
    )(x, h, sup_bd, wcomb_all, wch_all, bru_all, bc_all)

    hidden = new_h.reshape(L, B, N * U)
    output = hidden[-1]                   # last layer's new hidden = DCGRU output
    return output, hidden


def encoder_forward(inputs, hidden_state, layer_params, supports, num_nodes,
                    num_units, batch_tile=None):
    # Encoder.forward just delegates to DCGRU (seq_len is stored but unused).
    return dcgru_forward(inputs, hidden_state, layer_params, supports,
                         num_nodes, num_units, batch_tile=batch_tile)


def random_walk_support(adj):
    """calculate_random_walk_matrix(adj).T, computed densely."""
    d = adj.sum(axis=1)
    d_inv = jnp.where(d > 0, 1.0 / d, 0.0)
    rw = d_inv[:, None] * adj             # D^-1 A
    return rw.T


# ----------------------------------------------------------------------------
# Pure-JAX f32 reference (same semantics, incl. the x0 carry-over quirk)
# ----------------------------------------------------------------------------
def _reference_encoder(inputs, hidden_state, layer_params, supports,
                       num_nodes, num_units):
    B = inputs.shape[0]
    L = len(layer_params)
    N = num_nodes
    U = num_units
    D = inputs.shape[1] // N
    S = supports.shape[0]
    K = layer_params[0]["w_ru_x"].shape[0]
    KD = (K - 1) // S if S > 0 else 0

    def gconv(x_nodes, s_nodes, w_x, w_h, b):
        v = jnp.concatenate([x_nodes, s_nodes], axis=2)           # (B, N, C)
        Cv = v.shape[2]
        x0 = v.transpose(1, 2, 0).reshape(N, Cv * B)
        terms = [x0]
        if KD > 0:
            for s in range(S):
                A = supports[s]
                x1 = A @ x0
                terms.append(x1)
                for _ in range(2, KD + 1):
                    x2 = 2.0 * (A @ x1) - x0
                    terms.append(x2)
                    x1, x0 = x2, x1
        t = jnp.stack(terms).reshape(K, N, Cv, B).transpose(3, 1, 2, 0)
        w = jnp.concatenate([w_x, w_h], axis=1)                   # (K, C, O)
        return jnp.einsum("bnck,kco->bno", t, w) + b

    x = inputs.reshape(B, N, D)
    h_all = hidden_state.reshape(L, B, N, U)
    layer_in = x
    new_h = []
    for l in range(L):
        p = layer_params[l]
        h = h_all[l]
        ru = jax.nn.sigmoid(
            gconv(layer_in, h, p["w_ru_x"], p["w_ru_h"], p["b_ru"]))
        r, u = ru[..., :U], ru[..., U:]
        c = jnp.tanh(
            gconv(layer_in, r * h, p["w_c_x"], p["w_c_h"], p["b_c"]))
        h_new = u * h + (1.0 - u) * c
        new_h.append(h_new)
        layer_in = h_new
    hidden = jnp.stack(new_h).reshape(L, B, N * U)
    return hidden[-1], hidden


# ----------------------------------------------------------------------------
if __name__ == "__main__":
    B = 8          # batch
    N = 16         # num_nodes
    D_IN = 2       # input_dim
    U = 32         # num_units (hidden per node)
    L = 2          # num_rnn_layers
    KD = 2         # max_diffusion_step
    SEQ_LEN = 8    # stored by Encoder, unused in forward

    key = jax.random.PRNGKey(0)
    k_adj, k_x, k_h, k_w = jax.random.split(key, 4)

    # Deterministic adjacency; dual random-walk supports ("dual_random_walk").
    adj = jax.random.uniform(k_adj, (N, N), jnp.float32)
    adj = jnp.where(adj > 0.5, adj, 0.0)
    adj = adj.at[jnp.arange(N), jnp.arange(N)].set(1.0)   # nonzero degrees
    supports = jnp.stack([random_walk_support(adj), random_walk_support(adj.T)])
    S = supports.shape[0]
    K = S * KD + 1

    # Deterministic synthetic parameters (biases match LayerParams.get_biases:
    # 1.0 for the r/u gates, 0.0 for the candidate).
    layer_params = []
    wk = k_w
    for l in range(L):
        d_l = D_IN if l == 0 else U
        wk, k1, k2, k3, k4 = jax.random.split(wk, 5)
        layer_params.append(dict(
            w_ru_x=0.1 * jax.random.normal(k1, (K, d_l, 2 * U), jnp.float32),
            w_ru_h=0.1 * jax.random.normal(k2, (K, U, 2 * U), jnp.float32),
            b_ru=jnp.full((1, 2 * U), 1.0, jnp.float32),
            w_c_x=0.1 * jax.random.normal(k3, (K, d_l, U), jnp.float32),
            w_c_h=0.1 * jax.random.normal(k4, (K, U, U), jnp.float32),
            b_c=jnp.zeros((1, U), jnp.float32),
        ))

    inputs = jax.random.normal(k_x, (B, N * D_IN), jnp.float32)        # (B, N*input_dim)
    hidden_state = jax.random.normal(k_h, (L, B, N * U), jnp.float32)  # (L, B, N*num_units)

    # Reference first (the kernel donates the hidden-state buffer).
    ref_out, ref_hidden = _reference_encoder(inputs, hidden_state, layer_params,
                                             supports, N, U)

    output, hidden = encoder_forward(inputs, hidden_state, layer_params,
                                     supports, N, U)
    jax.block_until_ready((output, hidden))

    assert output.shape == (B, N * U)
    assert hidden.shape == (L, B, N * U)
    assert bool(jnp.all(jnp.isfinite(output))) and bool(jnp.all(jnp.isfinite(hidden)))
    err = float(jnp.max(jnp.abs(hidden - ref_hidden)))
    assert err < 0.2, f"kernel/reference mismatch: max|err|={err}"
    print("KERNEL_OK")
</pallas_src>

<mosaic_0001>
module attributes {stable_mosaic.version = 11 : i64} {
  func.func @kernel(%arg0: i32, %arg1: memref<128x32xf32, #tpu.memory_space<vmem>>, %arg2: memref<2x128x32xf32, #tpu.memory_space<vmem>>, %arg3: memref<2x128x128xbf16, #tpu.memory_space<vmem>>, %arg4: memref<2x320x96xbf16, #tpu.memory_space<vmem>>, %arg5: memref<2x160x32xbf16, #tpu.memory_space<vmem>>, %arg6: memref<2x1x64xf32, #tpu.memory_space<vmem>>, %arg7: memref<2x1x32xf32, #tpu.memory_space<vmem>>, %arg8: memref<2x128x32xf32, #tpu.memory_space<vmem>>) attributes {dimension_semantics = [#tpu.dimension_semantics<parallel>], iteration_bounds = array<i64: 1>, scalar_prefetch = 0 : i64, scratch_operands = 0 : i64, tpu.core_type = #tpu.core_type<tc>, window_params = [{transform_indices = @transform_0, window_bounds = array<i64: 128, 32>}, {transform_indices = @transform_1, window_bounds = array<i64: 2, 128, 32>}, {pipeline_mode = #tpu.pipeline_mode<synchronous>, transform_indices = @transform_2, window_bounds = array<i64: 2, 128, 128>}, {pipeline_mode = #tpu.pipeline_mode<synchronous>, transform_indices = @transform_3, window_bounds = array<i64: 2, 320, 96>}, {pipeline_mode = #tpu.pipeline_mode<synchronous>, transform_indices = @transform_4, window_bounds = array<i64: 2, 160, 32>}, {pipeline_mode = #tpu.pipeline_mode<synchronous>, transform_indices = @transform_5, window_bounds = array<i64: 2, 1, 64>}, {pipeline_mode = #tpu.pipeline_mode<synchronous>, transform_indices = @transform_6, window_bounds = array<i64: 2, 1, 32>}, {transform_indices = @transform_7, window_bounds = array<i64: 2, 128, 32>}]} {
    %c0 = arith.constant 0 : index
    %c0_0 = arith.constant 0 : index
    %0 = vector.load %arg1[%c0, %c0_0] : memref<128x32xf32, #tpu.memory_space<vmem>>, vector<128x32xf32>
    %c0_1 = arith.constant 0 : index
    %c0_2 = arith.constant 0 : index
    %c0_3 = arith.constant 0 : index
    %1 = vector.load %arg2[%c0_1, %c0_2, %c0_3] : memref<2x128x32xf32, #tpu.memory_space<vmem>>, vector<1x128x32xf32>
    %2 = vector.shape_cast %1 : vector<1x128x32xf32> to vector<128x32xf32>
    %3 = tpu.concatenate %0, %2 in 1 : vector<128x32xf32>, vector<128x32xf32> -> vector<128x64xf32>
    %4 = arith.truncf %3 : vector<128x64xf32> to vector<128x64xbf16>
    %c0_4 = arith.constant 0 : index
    %c0_5 = arith.constant 0 : index
    %c0_6 = arith.constant 0 : index
    %5 = vector.load %arg3[%c0_4, %c0_5, %c0_6] : memref<2x128x128xbf16, #tpu.memory_space<vmem>>, vector<1x128x128xbf16>
    %6 = vector.shape_cast %5 : vector<1x128x128xbf16> to vector<128x128xbf16>
    %cst = arith.constant dense<0.000000e+00> : vector<128x64xf32>
    %7 = tpu.matmul %6, %4, %cst {dimension_numbers = #tpu.dot_dimension_numbers<[1], [0], [0], [1], [0, 0, 1, 1], [], []>} : vector<128x128xbf16>, vector<128x64xbf16>, vector<128x64xf32> -> vector<128x64xf32>
    %8 = arith.truncf %7 : vector<128x64xf32> to vector<128x64xbf16>
    %cst_7 = arith.constant dense<0.000000e+00> : vector<128x64xf32>
    %9 = tpu.matmul %6, %8, %cst_7 {dimension_numbers = #tpu.dot_dimension_numbers<[1], [0], [0], [1], [0, 0, 1, 1], [], []>} : vector<128x128xbf16>, vector<128x64xbf16>, vector<128x64xf32> -> vector<128x64xf32>
    %cst_8 = arith.constant 2.000000e+00 : f32
    %10 = vector.broadcast %cst_8 : f32 to vector<128x64xf32>
    %11 = arith.mulf %10, %9 : vector<128x64xf32>
    %12 = arith.subf %11, %3 : vector<128x64xf32>
    %13 = arith.truncf %12 : vector<128x64xf32> to vector<128x64xbf16>
    %c1 = arith.constant 1 : index
    %c0_9 = arith.constant 0 : index
    %c0_10 = arith.constant 0 : index
    %14 = vector.load %arg3[%c1, %c0_9, %c0_10] : memref<2x128x128xbf16, #tpu.memory_space<vmem>>, vector<1x128x128xbf16>
    %15 = vector.shape_cast %14 : vector<1x128x128xbf16> to vector<128x128xbf16>
    %cst_11 = arith.constant dense<0.000000e+00> : vector<128x64xf32>
    %16 = tpu.matmul %15, %8, %cst_11 {dimension_numbers = #tpu.dot_dimension_numbers<[1], [0], [0], [1], [0, 0, 1, 1], [], []>} : vector<128x128xbf16>, vector<128x64xbf16>, vector<128x64xf32> -> vector<128x64xf32>
    %17 = arith.truncf %16 : vector<128x64xf32> to vector<128x64xbf16>
    %cst_12 = arith.constant dense<0.000000e+00> : vector<128x64xf32>
    %18 = tpu.matmul %15, %17, %cst_12 {dimension_numbers = #tpu.dot_dimension_numbers<[1], [0], [0], [1], [0, 0, 1, 1], [], []>} : vector<128x128xbf16>, vector<128x64xbf16>, vector<128x64xf32> -> vector<128x64xf32>
    %cst_13 = arith.constant 2.000000e+00 : f32
    %19 = vector.broadcast %cst_13 : f32 to vector<128x64xf32>
    %20 = arith.mulf %19, %18 : vector<128x64xf32>
    %21 = arith.subf %20, %7 : vector<128x64xf32>
    %22 = arith.truncf %21 : vector<128x64xf32> to vector<128x64xbf16>
    %23 = tpu.concatenate %4, %8, %13, %17, %22 in 1 : vector<128x64xbf16>, vector<128x64xbf16>, vector<128x64xbf16>, vector<128x64xbf16>, vector<128x64xbf16> -> vector<128x320xbf16>
    %c0_14 = arith.constant 0 : index
    %c0_15 = arith.constant 0 : index
    %c0_16 = arith.constant 0 : index
    %24 = vector.load %arg4[%c0_14, %c0_15, %c0_16] : memref<2x320x96xbf16, #tpu.memory_space<vmem>>, vector<1x320x96xbf16>
    %25 = vector.shape_cast %24 : vector<1x320x96xbf16> to vector<320x96xbf16>
    %cst_17 = arith.constant dense<0.000000e+00> : vector<128x96xf32>
    %26 = tpu.matmul %23, %25, %cst_17 {dimension_numbers = #tpu.dot_dimension_numbers<[1], [0], [0], [1], [0, 0, 1, 1], [], []>} : vector<128x320xbf16>, vector<320x96xbf16>, vector<128x96xf32> -> vector<128x96xf32>
    %27 = vector.extract_strided_slice %26 {offsets = [0, 0], sizes = [128, 64], strides = [1, 1]} : vector<128x96xf32> to vector<128x64xf32>
    %c0_18 = arith.constant 0 : index
    %c0_19 = arith.constant 0 : index
    %c0_20 = arith.constant 0 : index
    %28 = vector.load %arg6[%c0_18, %c0_19, %c0_20] : memref<2x1x64xf32, #tpu.memory_space<vmem>>, vector<1x1x64xf32>
    %29 = vector.shape_cast %28 : vector<1x1x64xf32> to vector<1x64xf32>
    %30 = vector.broadcast %29 : vector<1x64xf32> to vector<128x64xf32>
    %31 = arith.addf %27, %30 : vector<128x64xf32>
    %32 = arith.negf %31 : vector<128x64xf32>
    %33 = math.exp %32 : vector<128x64xf32>
    %cst_21 = arith.constant 1.000000e+00 : f32
    %34 = vector.broadcast %cst_21 : f32 to vector<128x64xf32>
    %35 = arith.addf %34, %33 : vector<128x64xf32>
    %36 = arith.divf %34, %35 : vector<128x64xf32>
    %37 = vector.extract_strided_slice %36 {offsets = [0, 0], sizes = [128, 32], strides = [1, 1]} : vector<128x64xf32> to vector<128x32xf32>
    %38 = vector.extract_strided_slice %36 {offsets = [0, 32], sizes = [128, 32], strides = [1, 1]} : vector<128x64xf32> to vector<128x32xf32>
    %39 = arith.mulf %37, %2 : vector<128x32xf32>
    %40 = arith.truncf %39 : vector<128x32xf32> to vector<128x32xbf16>
    %c0_22 = arith.constant 0 : index
    %c0_23 = arith.constant 0 : index
    %c0_24 = arith.constant 0 : index
    %41 = vector.load %arg3[%c0_22, %c0_23, %c0_24] : memref<2x128x128xbf16, #tpu.memory_space<vmem>>, vector<1x128x128xbf16>
    %42 = vector.shape_cast %41 : vector<1x128x128xbf16> to vector<128x128xbf16>
    %cst_25 = arith.constant dense<0.000000e+00> : vector<128x32xf32>
    %43 = tpu.matmul %42, %40, %cst_25 {dimension_numbers = #tpu.dot_dimension_numbers<[1], [0], [0], [1], [0, 0, 1, 1], [], []>} : vector<128x128xbf16>, vector<128x32xbf16>, vector<128x32xf32> -> vector<128x32xf32>
    %44 = arith.truncf %43 : vector<128x32xf32> to vector<128x32xbf16>
    %cst_26 = arith.constant dense<0.000000e+00> : vector<128x32xf32>
    %45 = tpu.matmul %42, %44, %cst_26 {dimension_numbers = #tpu.dot_dimension_numbers<[1], [0], [0], [1], [0, 0, 1, 1], [], []>} : vector<128x128xbf16>, vector<128x32xbf16>, vector<128x32xf32> -> vector<128x32xf32>
    %cst_27 = arith.constant 2.000000e+00 : f32
    %46 = vector.broadcast %cst_27 : f32 to vector<128x32xf32>
    %47 = arith.mulf %46, %45 : vector<128x32xf32>
    %48 = arith.subf %47, %39 : vector<128x32xf32>
    %49 = arith.truncf %48 : vector<128x32xf32> to vector<128x32xbf16>
    %c1_28 = arith.constant 1 : index
    %c0_29 = arith.constant 0 : index
    %c0_30 = arith.constant 0 : index
    %50 = vector.load %arg3[%c1_28, %c0_29, %c0_30] : memref<2x128x128xbf16, #tpu.memory_space<vmem>>, vector<1x128x128xbf16>
    %51 = vector.shape_cast %50 : vector<1x128x128xbf16> to vector<128x128xbf16>
    %cst_31 = arith.constant dense<0.000000e+00> : vector<128x32xf32>
    %52 = tpu.matmul %51, %44, %cst_31 {dimension_numbers = #tpu.dot_dimension_numbers<[1], [0], [0], [1], [0, 0, 1, 1], [], []>} : vector<128x128xbf16>, vector<128x32xbf16>, vector<128x32xf32> -> vector<128x32xf32>
    %53 = arith.truncf %52 : vector<128x32xf32> to vector<128x32xbf16>
    %cst_32 = arith.constant dense<0.000000e+00> : vector<128x32xf32>
    %54 = tpu.matmul %51, %53, %cst_32 {dimension_numbers = #tpu.dot_dimension_numbers<[1], [0], [0], [1], [0, 0, 1, 1], [], []>} : vector<128x128xbf16>, vector<128x32xbf16>, vector<128x32xf32> -> vector<128x32xf32>
    %cst_33 = arith.constant 2.000000e+00 : f32
    %55 = vector.broadcast %cst_33 : f32 to vector<128x32xf32>
    %56 = arith.mulf %55, %54 : vector<128x32xf32>
    %57 = arith.subf %56, %43 : vector<128x32xf32>
    %58 = arith.truncf %57 : vector<128x32xf32> to vector<128x32xbf16>
    %59 = tpu.concatenate %40, %44, %49, %53, %58 in 1 : vector<128x32xbf16>, vector<128x32xbf16>, vector<128x32xbf16>, vector<128x32xbf16>, vector<128x32xbf16> -> vector<128x160xbf16>
    %60 = vector.extract_strided_slice %26 {offsets = [0, 64], sizes = [128, 32], strides = [1, 1]} : vector<128x96xf32> to vector<128x32xf32>
    %c0_34 = arith.constant 0 : index
    %c0_35 = arith.constant 0 : index
    %c0_36 = arith.constant 0 : index
    %61 = vector.load %arg5[%c0_34, %c0_35, %c0_36] : memref<2x160x32xbf16, #tpu.memory_space<vmem>>, vector<1x160x32xbf16>
    %62 = vector.shape_cast %61 : vector<1x160x32xbf16> to vector<160x32xbf16>
    %cst_37 = arith.constant dense<0.000000e+00> : vector<128x32xf32>
    %63 = tpu.matmul %59, %62, %cst_37 {dimension_numbers = #tpu.dot_dimension_numbers<[1], [0], [0], [1], [0, 0, 1, 1], [], []>} : vector<128x160xbf16>, vector<160x32xbf16>, vector<128x32xf32> -> vector<128x32xf32>
    %64 = arith.addf %60, %63 : vector<128x32xf32>
    %c0_38 = arith.constant 0 : index
    %c0_39 = arith.constant 0 : index
    %c0_40 = arith.constant 0 : index
    %65 = vector.load %arg7[%c0_38, %c0_39, %c0_40] : memref<2x1x32xf32, #tpu.memory_space<vmem>>, vector<1x1x32xf32>
    %66 = vector.shape_cast %65 : vector<1x1x32xf32> to vector<1x32xf32>
    %67 = vector.broadcast %66 : vector<1x32xf32> to vector<128x32xf32>
    %68 = arith.addf %64, %67 : vector<128x32xf32>
    %69 = math.tanh %68 : vector<128x32xf32>
    %70 = arith.mulf %38, %2 : vector<128x32xf32>
    %cst_41 = arith.constant 1.000000e+00 : f32
    %71 = vector.broadcast %cst_41 : f32 to vector<128x32xf32>
    %72 = arith.subf %71, %38 : vector<128x32xf32>
    %73 = arith.mulf %72, %69 : vector<128x32xf32>
    %74 = arith.addf %70, %73 : vector<128x32xf32>
    %c0_42 = arith.constant 0 : index
    %c0_43 = arith.constant 0 : index
    %c0_44 = arith.constant 0 : index
    %75 = vector.load %arg8[%c0_42, %c0_43, %c0_44] : memref<2x128x32xf32, #tpu.memory_space<vmem>>, vector<1x128x32xf32>
    %76 = vector.shape_cast %75 : vector<1x128x32xf32> to vector<128x32xf32>
    %77 = vector.shape_cast %74 : vector<128x32xf32> to vector<1x128x32xf32>
    tpu.vector_store %arg8[%c0_42, %c0_43, %c0_44], %77 {strides = array<i32>} : memref<2x128x32xf32, #tpu.memory_space<vmem>>, vector<1x128x32xf32>,
    %c1_45 = arith.constant 1 : index
    %c0_46 = arith.constant 0 : index
    %c0_47 = arith.constant 0 : index
    %78 = vector.load %arg2[%c1_45, %c0_46, %c0_47] : memref<2x128x32xf32, #tpu.memory_space<vmem>>, vector<1x128x32xf32>
    %79 = vector.shape_cast %78 : vector<1x128x32xf32> to vector<128x32xf32>
    %80 = tpu.concatenate %74, %79 in 1 : vector<128x32xf32>, vector<128x32xf32> -> vector<128x64xf32>
    %81 = arith.truncf %80 : vector<128x64xf32> to vector<128x64xbf16>
    %c0_48 = arith.constant 0 : index
    %c0_49 = arith.constant 0 : index
    %c0_50 = arith.constant 0 : index
    %82 = vector.load %arg3[%c0_48, %c0_49, %c0_50] : memref<2x128x128xbf16, #tpu.memory_space<vmem>>, vector<1x128x128xbf16>
    %83 = vector.shape_cast %82 : vector<1x128x128xbf16> to vector<128x128xbf16>
    %cst_51 = arith.constant dense<0.000000e+00> : vector<128x64xf32>
    %84 = tpu.matmul %83, %81, %cst_51 {dimension_numbers = #tpu.dot_dimension_numbers<[1], [0], [0], [1], [0, 0, 1, 1], [], []>} : vector<128x128xbf16>, vector<128x64xbf16>, vector<128x64xf32> -> vector<128x64xf32>
    %85 = arith.truncf %84 : vector<128x64xf32> to vector<128x64xbf16>
    %cst_52 = arith.constant dense<0.000000e+00> : vector<128x64xf32>
    %86 = tpu.matmul %83, %85, %cst_52 {dimension_numbers = #tpu.dot_dimension_numbers<[1], [0], [0], [1], [0, 0, 1, 1], [], []>} : vector<128x128xbf16>, vector<128x64xbf16>, vector<128x64xf32> -> vector<128x64xf32>
    %cst_53 = arith.constant 2.000000e+00 : f32
    %87 = vector.broadcast %cst_53 : f32 to vector<128x64xf32>
    %88 = arith.mulf %87, %86 : vector<128x64xf32>
    %89 = arith.subf %88, %80 : vector<128x64xf32>
    %90 = arith.truncf %89 : vector<128x64xf32> to vector<128x64xbf16>
    %c1_54 = arith.constant 1 : index
    %c0_55 = arith.constant 0 : index
    %c0_56 = arith.constant 0 : index
    %91 = vector.load %arg3[%c1_54, %c0_55, %c0_56] : memref<2x128x128xbf16, #tpu.memory_space<vmem>>, vector<1x128x128xbf16>
    %92 = vector.shape_cast %91 : vector<1x128x128xbf16> to vector<128x128xbf16>
    %cst_57 = arith.constant dense<0.000000e+00> : vector<128x64xf32>
    %93 = tpu.matmul %92, %85, %cst_57 {dimension_numbers = #tpu.dot_dimension_numbers<[1], [0], [0], [1], [0, 0, 1, 1], [], []>} : vector<128x128xbf16>, vector<128x64xbf16>, vector<128x64xf32> -> vector<128x64xf32>
    %94 = arith.truncf %93 : vector<128x64xf32> to vector<128x64xbf16>
    %cst_58 = arith.constant dense<0.000000e+00> : vector<128x64xf32>
    %95 = tpu.matmul %92, %94, %cst_58 {dimension_numbers = #tpu.dot_dimension_numbers<[1], [0], [0], [1], [0, 0, 1, 1], [], []>} : vector<128x128xbf16>, vector<128x64xbf16>, vector<128x64xf32> -> vector<128x64xf32>
    %cst_59 = arith.constant 2.000000e+00 : f32
    %96 = vector.broadcast %cst_59 : f32 to vector<128x64xf32>
    %97 = arith.mulf %96, %95 : vector<128x64xf32>
    %98 = arith.subf %97, %84 : vector<128x64xf32>
    %99 = arith.truncf %98 : vector<128x64xf32> to vector<128x64xbf16>
    %100 = tpu.concatenate %81, %85, %90, %94, %99 in 1 : vector<128x64xbf16>, vector<128x64xbf16>, vector<128x64xbf16>, vector<128x64xbf16>, vector<128x64xbf16> -> vector<128x320xbf16>
    %c1_60 = arith.constant 1 : index
    %c0_61 = arith.constant 0 : index
    %c0_62 = arith.constant 0 : index
    %101 = vector.load %arg4[%c1_60, %c0_61, %c0_62] : memref<2x320x96xbf16, #tpu.memory_space<vmem>>, vector<1x320x96xbf16>
    %102 = vector.shape_cast %101 : vector<1x320x96xbf16> to vector<320x96xbf16>
    %cst_63 = arith.constant dense<0.000000e+00> : vector<128x96xf32>
    %103 = tpu.matmul %100, %102, %cst_63 {dimension_numbers = #tpu.dot_dimension_numbers<[1], [0], [0], [1], [0, 0, 1, 1], [], []>} : vector<128x320xbf16>, vector<320x96xbf16>, vector<128x96xf32> -> vector<128x96xf32>
    %104 = vector.extract_strided_slice %103 {offsets = [0, 0], sizes = [128, 64], strides = [1, 1]} : vector<128x96xf32> to vector<128x64xf32>
    %c1_64 = arith.constant 1 : index
    %c0_65 = arith.constant 0 : index
    %c0_66 = arith.constant 0 : index
    %105 = vector.load %arg6[%c1_64, %c0_65, %c0_66] : memref<2x1x64xf32, #tpu.memory_space<vmem>>, vector<1x1x64xf32>
    %106 = vector.shape_cast %105 : vector<1x1x64xf32> to vector<1x64xf32>
    %107 = vector.broadcast %106 : vector<1x64xf32> to vector<128x64xf32>
    %108 = arith.addf %104, %107 : vector<128x64xf32>
    %109 = arith.negf %108 : vector<128x64xf32>
    %110 = math.exp %109 : vector<128x64xf32>
    %cst_67 = arith.constant 1.000000e+00 : f32
    %111 = vector.broadcast %cst_67 : f32 to vector<128x64xf32>
    %112 = arith.addf %111, %110 : vector<128x64xf32>
    %113 = arith.divf %111, %112 : vector<128x64xf32>
    %114 = vector.extract_strided_slice %113 {offsets = [0, 0], sizes = [128, 32], strides = [1, 1]} : vector<128x64xf32> to vector<128x32xf32>
    %115 = vector.extract_strided_slice %113 {offsets = [0, 32], sizes = [128, 32], strides = [1, 1]} : vector<128x64xf32> to vector<128x32xf32>
    %116 = arith.mulf %114, %79 : vector<128x32xf32>
    %117 = arith.truncf %116 : vector<128x32xf32> to vector<128x32xbf16>
    %c0_68 = arith.constant 0 : index
    %c0_69 = arith.constant 0 : index
    %c0_70 = arith.constant 0 : index
    %118 = vector.load %arg3[%c0_68, %c0_69, %c0_70] : memref<2x128x128xbf16, #tpu.memory_space<vmem>>, vector<1x128x128xbf16>
    %119 = vector.shape_cast %118 : vector<1x128x128xbf16> to vector<128x128xbf16>
    %cst_71 = arith.constant dense<0.000000e+00> : vector<128x32xf32>
    %120 = tpu.matmul %119, %117, %cst_71 {dimension_numbers = #tpu.dot_dimension_numbers<[1], [0], [0], [1], [0, 0, 1, 1], [], []>} : vector<128x128xbf16>, vector<128x32xbf16>, vector<128x32xf32> -> vector<128x32xf32>
    %121 = arith.truncf %120 : vector<128x32xf32> to vector<128x32xbf16>
    %cst_72 = arith.constant dense<0.000000e+00> : vector<128x32xf32>
    %122 = tpu.matmul %119, %121, %cst_72 {dimension_numbers = #tpu.dot_dimension_numbers<[1], [0], [0], [1], [0, 0, 1, 1], [], []>} : vector<128x128xbf16>, vector<128x32xbf16>, vector<128x32xf32> -> vector<128x32xf32>
    %cst_73 = arith.constant 2.000000e+00 : f32
    %123 = vector.broadcast %cst_73 : f32 to vector<128x32xf32>
    %124 = arith.mulf %123, %122 : vector<128x32xf32>
    %125 = arith.subf %124, %116 : vector<128x32xf32>
    %126 = arith.truncf %125 : vector<128x32xf32> to vector<128x32xbf16>
    %c1_74 = arith.constant 1 : index
    %c0_75 = arith.constant 0 : index
    %c0_76 = arith.constant 0 : index
    %127 = vector.load %arg3[%c1_74, %c0_75, %c0_76] : memref<2x128x128xbf16, #tpu.memory_space<vmem>>, vector<1x128x128xbf16>
    %128 = vector.shape_cast %127 : vector<1x128x128xbf16> to vector<128x128xbf16>
    %cst_77 = arith.constant dense<0.000000e+00> : vector<128x32xf32>
    %129 = tpu.matmul %128, %121, %cst_77 {dimension_numbers = #tpu.dot_dimension_numbers<[1], [0], [0], [1], [0, 0, 1, 1], [], []>} : vector<128x128xbf16>, vector<128x32xbf16>, vector<128x32xf32> -> vector<128x32xf32>
    %130 = arith.truncf %129 : vector<128x32xf32> to vector<128x32xbf16>
    %cst_78 = arith.constant dense<0.000000e+00> : vector<128x32xf32>
    %131 = tpu.matmul %128, %130, %cst_78 {dimension_numbers = #tpu.dot_dimension_numbers<[1], [0], [0], [1], [0, 0, 1, 1], [], []>} : vector<128x128xbf16>, vector<128x32xbf16>, vector<128x32xf32> -> vector<128x32xf32>
    %cst_79 = arith.constant 2.000000e+00 : f32
    %132 = vector.broadcast %cst_79 : f32 to vector<128x32xf32>
    %133 = arith.mulf %132, %131 : vector<128x32xf32>
    %134 = arith.subf %133, %120 : vector<128x32xf32>
    %135 = arith.truncf %134 : vector<128x32xf32> to vector<128x32xbf16>
    %136 = tpu.concatenate %117, %121, %126, %130, %135 in 1 : vector<128x32xbf16>, vector<128x32xbf16>, vector<128x32xbf16>, vector<128x32xbf16>, vector<128x32xbf16> -> vector<128x160xbf16>
    %137 = vector.extract_strided_slice %103 {offsets = [0, 64], sizes = [128, 32], strides = [1, 1]} : vector<128x96xf32> to vector<128x32xf32>
    %c1_80 = arith.constant 1 : index
    %c0_81 = arith.constant 0 : index
    %c0_82 = arith.constant 0 : index
    %138 = vector.load %arg5[%c1_80, %c0_81, %c0_82] : memref<2x160x32xbf16, #tpu.memory_space<vmem>>, vector<1x160x32xbf16>
    %139 = vector.shape_cast %138 : vector<1x160x32xbf16> to vector<160x32xbf16>
    %cst_83 = arith.constant dense<0.000000e+00> : vector<128x32xf32>
    %140 = tpu.matmul %136, %139, %cst_83 {dimension_numbers = #tpu.dot_dimension_numbers<[1], [0], [0], [1], [0, 0, 1, 1], [], []>} : vector<128x160xbf16>, vector<160x32xbf16>, vector<128x32xf32> -> vector<128x32xf32>
    %141 = arith.addf %137, %140 : vector<128x32xf32>
    %c1_84 = arith.constant 1 : index
    %c0_85 = arith.constant 0 : index
    %c0_86 = arith.constant 0 : index
    %142 = vector.load %arg7[%c1_84, %c0_85, %c0_86] : memref<2x1x32xf32, #tpu.memory_space<vmem>>, vector<1x1x32xf32>
    %143 = vector.shape_cast %142 : vector<1x1x32xf32> to vector<1x32xf32>
    %144 = vector.broadcast %143 : vector<1x32xf32> to vector<128x32xf32>
    %145 = arith.addf %141, %144 : vector<128x32xf32>
    %146 = math.tanh %145 : vector<128x32xf32>
    %147 = arith.mulf %115, %79 : vector<128x32xf32>
    %cst_87 = arith.constant 1.000000e+00 : f32
    %148 = vector.broadcast %cst_87 : f32 to vector<128x32xf32>
    %149 = arith.subf %148, %115 : vector<128x32xf32>
    %150 = arith.mulf %149, %146 : vector<128x32xf32>
    %151 = arith.addf %147, %150 : vector<128x32xf32>
    %c1_88 = arith.constant 1 : index
    %c0_89 = arith.constant 0 : index
    %c0_90 = arith.constant 0 : index
    %152 = vector.load %arg8[%c1_88, %c0_89, %c0_90] : memref<2x128x32xf32, #tpu.memory_space<vmem>>, vector<1x128x32xf32>
    %153 = vector.shape_cast %152 : vector<1x128x32xf32> to vector<128x32xf32>
    %154 = vector.shape_cast %151 : vector<128x32xf32> to vector<1x128x32xf32>
    tpu.vector_store %arg8[%c1_88, %c0_89, %c0_90], %154 {strides = array<i32>} : memref<2x128x32xf32, #tpu.memory_space<vmem>>, vector<1x128x32xf32>,
    return
  }
  func.func @transform_0(%arg0: i32) -> (i32, i32) {
    %c0_i32 = arith.constant 0 : i32
    %c0_i32_0 = arith.constant 0 : i32
    return %arg0, %c0_i32 : i32, i32
  }
  func.func @transform_1(%arg0: i32) -> (i32, i32, i32) {
    %c0_i32 = arith.constant 0 : i32
    %c0_i32_0 = arith.constant 0 : i32
    %c0_i32_1 = arith.constant 0 : i32
    return %c0_i32, %arg0, %c0_i32_0 : i32, i32, i32
  }
  func.func @transform_2(%arg0: i32) -> (i32, i32, i32) {
    %c0_i32 = arith.constant 0 : i32
    %c0_i32_0 = arith.constant 0 : i32
    %c0_i32_1 = arith.constant 0 : i32
    %c0_i32_2 = arith.constant 0 : i32
    return %c0_i32, %c0_i32_0, %c0_i32_1 : i32, i32, i32
  }
  func.func @transform_3(%arg0: i32) -> (i32, i32, i32) {
    %c0_i32 = arith.constant 0 : i32
    %c0_i32_0 = arith.constant 0 : i32
    %c0_i32_1 = arith.constant 0 : i32
    %c0_i32_2 = arith.constant 0 : i32
    return %c0_i32, %c0_i32_0, %c0_i32_1 : i32, i32, i32
  }
  func.func @transform_4(%arg0: i32) -> (i32, i32, i32) {
    %c0_i32 = arith.constant 0 : i32
    %c0_i32_0 = arith.constant 0 : i32
    %c0_i32_1 = arith.constant 0 : i32
    %c0_i32_2 = arith.constant 0 : i32
    return %c0_i32, %c0_i32_0, %c0_i32_1 : i32, i32, i32
  }
  func.func @transform_5(%arg0: i32) -> (i32, i32, i32) {
    %c0_i32 = arith.constant 0 : i32
    %c0_i32_0 = arith.constant 0 : i32
    %c0_i32_1 = arith.constant 0 : i32
    %c0_i32_2 = arith.constant 0 : i32
    return %c0_i32, %c0_i32_0, %c0_i32_1 : i32, i32, i32
  }
  func.func @transform_6(%arg0: i32) -> (i32, i32, i32) {
    %c0_i32 = arith.constant 0 : i32
    %c0_i32_0 = arith.constant 0 : i32
    %c0_i32_1 = arith.constant 0 : i32
    %c0_i32_2 = arith.constant 0 : i32
    return %c0_i32, %c0_i32_0, %c0_i32_1 : i32, i32, i32
  }
  func.func @transform_7(%arg0: i32) -> (i32, i32, i32) {
    %c0_i32 = arith.constant 0 : i32
    %c0_i32_0 = arith.constant 0 : i32
    %c0_i32_1 = arith.constant 0 : i32
    return %c0_i32, %arg0, %c0_i32_0 : i32, i32, i32
  }
}

</mosaic_0001>

<bundles_post_ra>
// kernel: tpu_custom_call.1
= control target key start
LH: loop header
LB: loop body
LE: loop exit
PB: predicated region body
PF: predicated region fallthrough
CT: control target
= control target key end

     0   :  { %s6660_s28 = smov 32   ;;  %vm123_vm0 = vcmask 261120   ;;  %s6661_s17 = smov 64   ;;  %vm809_vm1 = vcmask 523264   ;;  %vm1991_vm2 = vcmask 785408   ;;  %s9439_s1 = inlined_call_operand.vmem [shape: f32[2,128,32], index: 1, kind: input, shape index: {}, may-alias: {1,7}]   ;;  %s9440_s2 = inlined_call_operand.vmem [shape: bf16[2,128,128], index: 2, kind: input, shape index: {}]   ;;  %s9441_s0 = inlined_call_operand.vmem [shape: f32[128,32], index: 0, kind: input, shape index: {}]   ;;  %s9442_s3 = inlined_call_operand.vmem [shape: bf16[2,320,96], index: 3, kind: input, shape index: {}]   ;;  %s9443_s5 = inlined_call_operand.vmem [shape: f32[2,1,64], index: 5, kind: input, shape index: {}]   ;;  %s9444_s4 = inlined_call_operand.vmem [shape: bf16[2,160,32], index: 4, kind: input, shape index: {}]   ;;  %s9445_s6 = inlined_call_operand.vmem [shape: f32[2,1,32], index: 6, kind: input, shape index: {}]   ;;  %s9446_s7 = inlined_call_operand.vmem [shape: f32[2,128,32], index: 7, kind: output, shape index: {}, may-alias: {1,7}]  }
   0x1   :  { %v45_v0 = vld [vmem:[%s9439_s1 + $0x10] sm:$0xff]  ;;  %v43_v1 = vld [vmem:[%s9439_s1] sm:$0xff]  ;;  %v46_v2 = vld [vmem:[%s9439_s1 + $0x18] sm:$0xff]  ;;  %s6662_s27 = smov 96  }
   0x2   :  { %79 = vrot.lane.b32.xlu1 %v45_v0, %s6660_s28  ;;  %75 = vrot.lane.b32.xlu0 %v43_v1, %s6660_s28  ;;  %v44_v3 = vld [vmem:[%s9439_s1 + $0x8] sm:$0xff]  ;;  %v47_v5 = vld [vmem:[%s9439_s1 + $0x20] sm:$0xff] }
   0x3   :  { %v48_v4 = vld [vmem:[%s9439_s1 + $0x28] sm:$0xff]  ;;  %v50_v6 = vld [vmem:[%s9439_s1 + $0x38] sm:$0xff]  ;;  %v49_v7 = vld [vmem:[%s9439_s1 + $0x30] sm:$0xff] }
   0x4   :  { %v52_v8 = vld [vmem:[%s9439_s1 + $0x48] sm:$0xff]  ;;  %v51_v9 = vld [vmem:[%s9439_s1 + $0x40] sm:$0xff]  ;;  %v54_v10 = vld [vmem:[%s9439_s1 + $0x58] sm:$0xff] }
   0x5   :  { %v53_v11 = vld [vmem:[%s9439_s1 + $0x50] sm:$0xff]  ;;  %v56_v12 = vld [vmem:[%s9439_s1 + $0x68] sm:$0xff]  ;;  %v55_v13 = vld [vmem:[%s9439_s1 + $0x60] sm:$0xff] }
   0x6   :  { %81 = vrot.lane.b32.xlu1 %v46_v2, %s6660_s28  ;;  %77 = vrot.lane.b32.xlu0 %v44_v3, %s6660_s28  ;;  %v58_v14 = vld [vmem:[%s9439_s1 + $0x78] sm:$0xff]  ;;  %v6764_v15 = vld [vmem:[%s9440_s2] sm:$0xff]  }
   0x7   :  { %v57_v16 = vld [vmem:[%s9439_s1 + $0x70] sm:$0xff]  ;;  %5765 = vmatprep.mubr.bf16.mxu1 %v6764_v15  ;;  %v27_v20 = vld [vmem:[%s9441_s0] sm:$0xff]  ;;  %v30_v21 = vld [vmem:[%s9441_s0 + $0x18] sm:$0xff] }
   0x8   :  { %v29_v19 = vld [vmem:[%s9441_s0 + $0x10] sm:$0xff]  ;;  %v28_v22 = vld [vmem:[%s9441_s0 + $0x8] sm:$0xff]  ;;  %v31_v31 = vld [vmem:[%s9441_s0 + $0x20] sm:$0xff] }
   0x9   :  { %v32_v30 = vld [vmem:[%s9441_s0 + $0x28] sm:$0xff]  ;;  %v34_v37 = vld [vmem:[%s9441_s0 + $0x38] sm:$0xff]  ;;  %v33_v38 = vld [vmem:[%s9441_s0 + $0x30] sm:$0xff] }
   0xa   :  { %85 = vrot.lane.b32.xlu1 %v48_v4, %s6660_s28  ;;  %83 = vrot.lane.b32.xlu0 %v47_v5, %s6660_s28  ;;  %v36_v44 = vld [vmem:[%s9441_s0 + $0x48] sm:$0xff]  ;;  %v35_v45 = vld [vmem:[%s9441_s0 + $0x40] sm:$0xff] }
   0xb   :  { %v38_v51 = vld [vmem:[%s9441_s0 + $0x58] sm:$0xff]  ;;  %v37_v52 = vld [vmem:[%s9441_s0 + $0x50] sm:$0xff]  ;;  %v40_v58 = vld [vmem:[%s9441_s0 + $0x68] sm:$0xff] }
   0xc   :  { %v39_v59 = vld [vmem:[%s9441_s0 + $0x60] sm:$0xff]  ;;  %v42_v1 = vld [vmem:[%s9441_s0 + $0x78] sm:$0xff]  ;;  %v41_v2 = vld [vmem:[%s9441_s0 + $0x70] sm:$0xff] }
   0xe   :  { %89 = vrot.lane.b32.xlu1 %v50_v6, %s6660_s28  ;;  %87 = vrot.lane.b32.xlu0 %v49_v7, %s6660_s28 }
  0x12   :  { %93 = vrot.lane.b32.xlu1 %v52_v8, %s6660_s28  ;;  %91 = vrot.lane.b32.xlu0 %v51_v9, %s6660_s28  ;;  %v6968_v9 = vld [vmem:[%s9440_s2 + $0x8] sm:$0xff]  }
  0x16   :  { %97 = vrot.lane.b32.xlu1 %v54_v10, %s6660_s28  ;;  %95 = vrot.lane.b32.xlu0 %v53_v11, %s6660_s28  ;;  %v6974_v10 = vld [vmem:[%s9440_s2 + $0x10] sm:$0xff]   ;;  %v6981_v11 = vld [vmem:[%s9440_s2 + $0x18] sm:$0xff]  }
  0x1a   :  { %101 = vrot.lane.b32.xlu1 %v56_v12, %s6660_s28  ;;  %99 = vrot.lane.b32.xlu0 %v55_v13, %s6660_s28  ;;  %v6986_v12 = vld [vmem:[%s9440_s2 + $0x20] sm:$0xff]   ;;  %v6993_v13 = vld [vmem:[%s9440_s2 + $0x28] sm:$0xff]  }
  0x1e   :  { %105 = vrot.lane.b32.xlu1 %v58_v14, %s6660_s28  ;;  %103 = vrot.lane.b32.xlu0 %v57_v16, %s6660_s28  ;;  %v6998_v14 = vld [vmem:[%s9440_s2 + $0x30] sm:$0xff]   ;;  %v7005_v16 = vld [vmem:[%s9440_s2 + $0x38] sm:$0xff]  }
  0x74   :  { %v6774_v17 = vpop.permute.xlu1 %79  ;;  %v6776_v18 = vpop.permute.xlu0 %75 }
  0x75   :  { %9598 = vst [vmem:[#allocation2_spill] sm:$0xff] %v6774_v17  ;;  %9599 = vst [vmem:[#allocation3_spill] sm:$0xff] %v6776_v18  ;;  %v6796_v25 = vsel %vm123_vm0, %v29_v19, %v6774_v17  ;;  %v6800_v26 = vsel %vm123_vm0, %v27_v20, %v6776_v18  ;;  %v7012_v19 = vld [vmem:[%s9440_s2 + $0x40] sm:$0xff]  }
  0x76   :  { %5829 = vmatprep.mubr.bf16.mxu0 %v7012_v19 }
  0x78   :  { %v6790_v23 = vpop.permute.xlu1 %81  ;;  %v6792_v24 = vpop.permute.xlu0 %77 }
  0x79   :  { %9600 = vst [vmem:[#allocation4_spill] sm:$0xff] %v6790_v23  ;;  %9601 = vst [vmem:[#allocation5_spill] sm:$0xff] %v6792_v24  ;;  %v6804_v27 = vsel %vm123_vm0, %v30_v21, %v6790_v23  ;;  %v6808_v28 = vsel %vm123_vm0, %v28_v22, %v6792_v24 }
  0x7a   :  { %v6812_v29 = vpack.c.bf16 %v6808_v28, %v6800_v26  ;;  %v6823_v32 = vpack.c.bf16 %v6804_v27, %v6796_v25 }
  0x7c   :  { %5749 = vmatprep.subr.bf16.mxu1 %v6812_v29  ;;  %v6825_v33 = vpop.permute.xlu1 %85  ;;  %v6827_v34 = vpop.permute.xlu0 %83 }
  0x7d   :  { %9602 = vst [vmem:[#allocation6_spill] sm:$0xff] %v6825_v33  ;;  %9603 = vst [vmem:[#allocation7_spill] sm:$0xff] %v6827_v34  ;;  %5750 = vmatpush3.bf16.msra.mxu1 %v6812_v29  ;;  %v6832_v35 = vsel %vm123_vm0, %v32_v30, %v6825_v33  ;;  %v6836_v36 = vsel %vm123_vm0, %v31_v31, %v6827_v34 }
  0x7e   :  { %5751 = vmatprep.subr.bf16.mxu1 %v6823_v32  ;;  %v6847_v39 = vpack.c.bf16 %v6832_v35, %v6836_v36 }
  0x80   :  { %v6849_v40 = vpop.permute.xlu1 %89  ;;  %v6851_v41 = vpop.permute.xlu0 %87 }
  0x81   :  { %9604 = vst [vmem:[#allocation8_spill] sm:$0xff] %v6849_v40  ;;  %9605 = vst [vmem:[#allocation9_spill] sm:$0xff] %v6851_v41  ;;  %5752 = vmatpush3.bf16.msra.mxu1 %v6823_v32  ;;  %v6856_v42 = vsel %vm123_vm0, %v34_v37, %v6849_v40  ;;  %v6860_v43 = vsel %vm123_vm0, %v33_v38, %v6851_v41 }
  0x82   :  { %5753 = vmatprep.subr.bf16.mxu1 %v6847_v39  ;;  %v6871_v46 = vpack.c.bf16 %v6856_v42, %v6860_v43 }
  0x84   :  { %v6873_v47 = vpop.permute.xlu1 %93  ;;  %v6875_v48 = vpop.permute.xlu0 %91 }
  0x85   :  { %9606 = vst [vmem:[#allocation10_spill] sm:$0xff] %v6873_v47  ;;  %9607 = vst [vmem:[#allocation11_spill] sm:$0xff] %v6875_v48  ;;  %5754 = vmatpush3.bf16.msra.mxu1 %v6847_v39  ;;  %v6880_v49 = vsel %vm123_vm0, %v36_v44, %v6873_v47  ;;  %v6884_v50 = vsel %vm123_vm0, %v35_v45, %v6875_v48 }
  0x86   :  { %5755 = vmatprep.subr.bf16.mxu1 %v6871_v46  ;;  %v6895_v53 = vpack.c.bf16 %v6880_v49, %v6884_v50 }
  0x88   :  { %v6897_v54 = vpop.permute.xlu1 %97  ;;  %v6899_v55 = vpop.permute.xlu0 %95 }
  0x89   :  { %9608 = vst [vmem:[#allocation12_spill] sm:$0xff] %v6897_v54  ;;  %9609 = vst [vmem:[#allocation13_spill] sm:$0xff] %v6899_v55  ;;  %5756 = vmatpush3.bf16.msra.mxu1 %v6871_v46  ;;  %v6904_v56 = vsel %vm123_vm0, %v38_v51, %v6897_v54  ;;  %v6908_v57 = vsel %vm123_vm0, %v37_v52, %v6899_v55  ;;  %v6334_v54 = vld [vmem:[%s9442_s3 + $0x10] sm:$0xff]  }
  0x8a   :  { %5757 = vmatprep.subr.bf16.mxu1 %v6895_v53  ;;  %v6919_v60 = vpack.c.bf16 %v6904_v56, %v6908_v57  ;;  %v6342_v55 = vld [vmem:[%s9442_s3 + $0x30] sm:$0xff]  }
  0x8c   :  { %v6921_v61 = vpop.permute.xlu1 %101  ;;  %v6923_v62 = vpop.permute.xlu0 %99 }
  0x8d   :  { %9610 = vst [vmem:[#allocation14_spill] sm:$0xff] %v6921_v61  ;;  %9611 = vst [vmem:[#allocation15_spill] sm:$0xff] %v6923_v62  ;;  %5758 = vmatpush3.bf16.msra.mxu1 %v6895_v53  ;;  %v6928_v63 = vsel %vm123_vm0, %v40_v58, %v6921_v61  ;;  %v6932_v0 = vsel %vm123_vm0, %v39_v59, %v6923_v62 }
  0x8e   :  { %5759 = vmatprep.subr.bf16.mxu1 %v6919_v60  ;;  %v6943_v3 = vpack.c.bf16 %v6928_v63, %v6932_v0 }
  0x90   :  { %v6945_v4 = vpop.permute.xlu1 %105  ;;  %v6947_v5 = vpop.permute.xlu0 %103 }
  0x91   :  { %9612 = vst [vmem:[#allocation16_spill] sm:$0xff] %v6945_v4  ;;  %9613 = vst [vmem:[#allocation17_spill] sm:$0xff] %v6947_v5  ;;  %5760 = vmatpush3.bf16.msra.mxu1 %v6919_v60  ;;  %v6952_v6 = vsel %vm123_vm0, %v42_v1, %v6945_v4  ;;  %v6956_v7 = vsel %vm123_vm0, %v41_v2, %v6947_v5 }
  0x92   :  { %5761 = vmatprep.subr.bf16.mxu1 %v6943_v3  ;;  %v6961_v8 = vpack.c.bf16 %v6952_v6, %v6956_v7 }
  0x95   :  { %5762 = vmatpush3.bf16.msra.mxu1 %v6943_v3 }
  0x96   :  { %5763 = vmatprep.subr.bf16.mxu1 %v6961_v8 }
  0x99   :  { %5764 = vmatpush3.bf16.msra.mxu1 %v6961_v8 }
  0x9c   :  { %5766 = vmatmul.mubr.bf16.vlgmr.msra.gmra.mrb[0].mxu1 %v6968_v9 }
  0x9d   :  { %5769 = vmatprep.mubr.bf16.mxu1 %v6974_v10 }
  0xa4   :  { %5770 = vmatmul.mubr.bf16.gmra.mrb[4].mxu1 %v6981_v11 }
  0xa5   :  { %5773 = vmatprep.mubr.bf16.mxu1 %v6986_v12 }
  0xac   :  { %5774 = vmatmul.mubr.bf16.gmra.mrb[8].mxu1 %v6993_v13 }
  0xad   :  { %5777 = vmatprep.mubr.bf16.mxu1 %v6998_v14 }
  0xb4   :  { %5778 = vmatmul.mubr.bf16.gmra.mrb[12].mxu1 %v7005_v16 }
  0xb5   :  { %5797 = vmatprep.mubr.bf16.mxu1 %v6764_v15 }
 0x16f   :  { %v7015_v20 = vpop.f32.mrb[0].mxu1 }
 0x170   :  { %v7017_v21 = vpop.f32.mrb[1].mxu1 }
 0x171   :  { %v7019_v22 = vpop.f32.mrb[2].mxu1 }
 0x172   :  { %v310_v30 = vpack.c.bf16 %v7019_v22, %v7015_v20  ;;  %v7023_v31 = vpop.f32.mrb[3].mxu1 }
 0x173   :  { %v309_v15 = vpack.c.bf16 %v7023_v31, %v7017_v21 }
 0x175   :  { %769 = vrot.lane.b32.xlu1 %v309_v15, %s6661_s17  ;;  %5781 = vmatprep.subr.bf16.mxu1 %v309_v15 }
 0x176   :  { %5813 = vmatprep.subr.bf16.mxu0 %v309_v15  ;;  %5782 = vmatpush3.bf16.msra.mxu1 %v309_v15 }
 0x177   :  { %5814 = vmatpush3.bf16.msra.mxu0 %v309_v15  ;;  %v7028_v37 = vpop.f32.mrb[4].mxu1  ;;  %5783 = vmatprep.subr.bf16.mxu1 %v310_v30 }
 0x178   :  { %5815 = vmatprep.subr.bf16.mxu0 %v310_v30  ;;  %v7030_v38 = vpop.f32.mrb[5].mxu1 }
 0x179   :  { %771 = vrot.lane.b32.xlu1 %v310_v30, %s6661_s17  ;;  %v7033_v44 = vpop.f32.mrb[6].mxu1 }
 0x17a   :  { %v312_v45 = vpack.c.bf16 %v7033_v44, %v7028_v37  ;;  %v7037_v51 = vpop.f32.mrb[7].mxu1  ;;  %5784 = vmatpush3.bf16.msra.mxu1 %v310_v30 }
 0x17b   :  { %v311_v52 = vpack.c.bf16 %v7037_v51, %v7030_v38  ;;  %5816 = vmatpush3.bf16.msra.mxu0 %v310_v30 }
 0x17d   :  { %773 = vrot.lane.b32.xlu1 %v311_v52, %s6661_s17  ;;  %5785 = vmatprep.subr.bf16.mxu1 %v311_v52 }
 0x17e   :  { %5817 = vmatprep.subr.bf16.mxu0 %v311_v52  ;;  %5786 = vmatpush3.bf16.msra.mxu1 %v311_v52 }
 0x17f   :  { %5818 = vmatpush3.bf16.msra.mxu0 %v311_v52  ;;  %v7042_v58 = vpop.f32.mrb[8].mxu1  ;;  %5787 = vmatprep.subr.bf16.mxu1 %v312_v45 }
 0x180   :  { %5819 = vmatprep.subr.bf16.mxu0 %v312_v45  ;;  %v7044_v59 = vpop.f32.mrb[9].mxu1 }
 0x181   :  { %775 = vrot.lane.b32.xlu1 %v312_v45, %s6661_s17  ;;  %v7047_v1 = vpop.f32.mrb[10].mxu1 }
 0x182   :  { %v314_v2 = vpack.c.bf16 %v7047_v1, %v7042_v58  ;;  %v7051_v30 = vpop.f32.mrb[11].mxu1  ;;  %5788 = vmatpush3.bf16.msra.mxu1 %v312_v45 }
 0x183   :  { %v313_v15 = vpack.c.bf16 %v7051_v30, %v7044_v59  ;;  %5820 = vmatpush3.bf16.msra.mxu0 %v312_v45 }
 0x185   :  { %777 = vrot.lane.b32.xlu1 %v313_v15, %s6661_s17  ;;  %5789 = vmatprep.subr.bf16.mxu1 %v313_v15 }
 0x186   :  { %5821 = vmatprep.subr.bf16.mxu0 %v313_v15  ;;  %5790 = vmatpush3.bf16.msra.mxu1 %v313_v15 }
 0x187   :  { %5822 = vmatpush3.bf16.msra.mxu0 %v313_v15  ;;  %v7056_v52 = vpop.f32.mrb[12].mxu1  ;;  %5791 = vmatprep.subr.bf16.mxu1 %v314_v2  ;;  %v7074_v15 = vld [vmem:[%s9440_s2 + $0x48] sm:$0xff]  }
 0x188   :  { %5823 = vmatprep.subr.bf16.mxu0 %v314_v2  ;;  %v7058_v4 = vpop.f32.mrb[13].mxu1 }
 0x189   :  { %779 = vrot.lane.b32.xlu1 %v314_v2, %s6661_s17  ;;  %v7061_v5 = vpop.f32.mrb[14].mxu1 }
 0x18a   :  { %v316_v61 = vpack.c.bf16 %v7061_v5, %v7056_v52  ;;  %v7065_v45 = vpop.f32.mrb[15].mxu1  ;;  %5792 = vmatpush3.bf16.msra.mxu1 %v314_v2 }
 0x18b   :  { %9614 = vst [vmem:[#allocation18_spill] sm:$0xff] %v7065_v45  ;;  %v315_v62 = vpack.c.bf16 %v7065_v45, %v7058_v4  ;;  %5824 = vmatpush3.bf16.msra.mxu0 %v314_v2  ;;  %v7079_v2 = vld [vmem:[%s9440_s2 + $0x50] sm:$0xff]  }
 0x18d   :  { %781 = vrot.lane.b32.xlu1 %v315_v62, %s6661_s17  ;;  %5793 = vmatprep.subr.bf16.mxu1 %v315_v62 }
 0x18e   :  { %5825 = vmatprep.subr.bf16.mxu0 %v315_v62  ;;  %5794 = vmatpush3.bf16.msra.mxu1 %v315_v62 }
 0x18f   :  { %5826 = vmatpush3.bf16.msra.mxu0 %v315_v62  ;;  %5795 = vmatprep.subr.bf16.mxu1 %v316_v61  ;;  %v7088_v62 = vld [vmem:[%s9440_s2 + $0x58] sm:$0xff]  }
 0x190   :  { %5827 = vmatprep.subr.bf16.mxu0 %v316_v61 }
 0x191   :  { %783 = vrot.lane.b32.xlu1 %v316_v61, %s6661_s17 }
 0x192   :  { %5796 = vmatpush3.bf16.msra.mxu1 %v316_v61 }
 0x193   :  { %5828 = vmatpush3.bf16.msra.mxu0 %v316_v61  ;;  %v7093_v61 = vld [vmem:[%s9440_s2 + $0x60] sm:$0xff]  }
 0x195   :  { %5798 = vmatmul.mubr.bf16.vlgmr.msra.gmra.mrb[16].mxu1 %v6968_v9  ;;  %v7102_v9 = vld [vmem:[%s9440_s2 + $0x68] sm:$0xff]  }
 0x196   :  { %5830 = vmatmul.mubr.bf16.vlgmr.msra.gmra.mrb[0].mxu0 %v7074_v15  ;;  %5801 = vmatprep.mubr.bf16.mxu1 %v6974_v10  ;;  %v7107_v10 = vld [vmem:[%s9440_s2 + $0x70] sm:$0xff]  }
 0x197   :  { %5833 = vmatprep.mubr.bf16.mxu0 %v7079_v2 }
 0x19d   :  { %5802 = vmatmul.mubr.bf16.gmra.mrb[20].mxu1 %v6981_v11  ;;  %v7116_v11 = vld [vmem:[%s9440_s2 + $0x78] sm:$0xff]  }
 0x19e   :  { %5834 = vmatmul.mubr.bf16.gmra.mrb[4].mxu0 %v7088_v62  ;;  %5805 = vmatprep.mubr.bf16.mxu1 %v6986_v12  ;;  %v6329_v12 = vld [vmem:[%s9442_s3 + $0x40] sm:$0xff]  }
 0x19f   :  { %5837 = vmatprep.mubr.bf16.mxu0 %v7093_v61  ;;  %5405 = vmatprep.subr.bf16.mxu0 %v6329_v12  ;;  %v6335_v12 = vld [vmem:[%s9442_s3 + $0x58] sm:$0xff]  }
 0x1a5   :  { %5806 = vmatmul.mubr.bf16.gmra.mrb[24].mxu1 %v6993_v13  ;;  %v6330_v13 = vld [vmem:[%s9442_s3] sm:$0xff]  }
 0x1a6   :  { %5838 = vmatmul.mubr.bf16.gmra.mrb[8].mxu0 %v7102_v9  ;;  %5809 = vmatprep.mubr.bf16.mxu1 %v6998_v14  ;;  %v6331_v14 = vld [vmem:[%s9442_s3 + $0x48] sm:$0xff]  }
 0x1a7   :  { %5841 = vmatprep.mubr.bf16.mxu0 %v7107_v10  ;;  %5406 = vmatpush3.bf16.msra.mxu0 %v6330_v13  ;;  %v6336_v13 = vld [vmem:[%s9442_s3 + $0x18] sm:$0xff]  }
 0x1a8   :  { %5407 = vmatprep.subr.bf16.mxu0 %v6331_v14  ;;  %v6337_v14 = vld [vmem:[%s9442_s3 + $0x60] sm:$0xff]  }
 0x1ad   :  { %5810 = vmatmul.mubr.bf16.gmra.mrb[28].mxu1 %v7005_v16  ;;  %v6332_v16 = vld [vmem:[%s9442_s3 + $0x8] sm:$0xff]  }
 0x1ae   :  { %5842 = vmatmul.mubr.bf16.gmra.mrb[12].mxu0 %v7116_v11  ;;  %5861 = vmatprep.mubr.bf16.mxu1 %v7012_v19  ;;  %v6333_v19 = vld [vmem:[%s9442_s3 + $0x50] sm:$0xff]  }
 0x1af   :  { %5408 = vmatpush3.bf16.msra.mxu0 %v6332_v16  ;;  %v6338_v16 = vld [vmem:[%s9442_s3 + $0x20] sm:$0xff]  }
 0x1b0   :  { %5409 = vmatprep.subr.bf16.mxu0 %v6333_v19  ;;  %v6339_v19 = vld [vmem:[%s9442_s3 + $0x68] sm:$0xff]  }
 0x1b3   :  { %5410 = vmatpush3.bf16.msra.mxu0 %v6334_v54  ;;  %v6340_v54 = vld [vmem:[%s9442_s3 + $0x28] sm:$0xff]  }
 0x1b4   :  { %5411 = vmatprep.subr.bf16.mxu0 %v6335_v12  ;;  %v6341_v12 = vld [vmem:[%s9442_s3 + $0x70] sm:$0xff]  }
 0x1b7   :  { %5412 = vmatpush3.bf16.msra.mxu0 %v6336_v13  ;;  %v6343_v13 = vld [vmem:[%s9442_s3 + $0x78] sm:$0xff]  }
 0x1b8   :  { %5413 = vmatprep.subr.bf16.mxu0 %v6337_v14  ;;  %v6344_v14 = vld [vmem:[%s9442_s3 + $0x38] sm:$0xff]  }
 0x1bb   :  { %5414 = vmatpush3.bf16.msra.mxu0 %v6338_v16 }
 0x1bc   :  { %5415 = vmatprep.subr.bf16.mxu0 %v6339_v19 }
 0x1bf   :  { %5416 = vmatpush3.bf16.msra.mxu0 %v6340_v54 }
 0x1c0   :  { %5417 = vmatprep.subr.bf16.mxu0 %v6341_v12 }
 0x1c3   :  { %5418 = vmatpush3.bf16.msra.mxu0 %v6342_v55 }
 0x1c4   :  { %5419 = vmatprep.subr.bf16.mxu0 %v6343_v13 }
 0x1c7   :  { %5420 = vmatpush3.bf16.msra.mxu0 %v6344_v14 }
 0x268   :  { %v5799_v47 = vpop.f32.mrb[16].mxu1 }
 0x269   :  { %v416_v16 = vmul.f32 2.0, %v5799_v47  ;;  %v5831_v19 = vpop.f32.mrb[0].mxu0  ;;  %v351_v48 = vpop.f32.mrb[17].mxu1 }
 0x26a   :  { %v414_v40 = vmul.f32 2.0, %v351_v48  ;;  %v553_v41 = vpop.f32.mrb[1].mxu0  ;;  %v5800_v33 = vpop.f32.mrb[18].mxu1 }
 0x26b   :  { %v417_v34 = vmul.f32 2.0, %v5800_v33  ;;  %v5832_v23 = vpop.f32.mrb[2].mxu0  ;;  %v354_v17 = vpop.f32.mrb[19].mxu1  ;;  %v432_v18 = vsub.f32 %v416_v16, %v6796_v25 }
 0x26c   :  { %v617_v24 = vpack.c.bf16 %v5832_v23, %v5831_v19  ;;  %v415_v54 = vmul.f32 2.0, %v354_v17  ;;  %v556_v12 = vpop.f32.mrb[3].mxu0  ;;  %v430_v13 = vsub.f32 %v414_v40, %v6800_v26 }
 0x26d   :  { %v433_v45 = vsub.f32 %v417_v34, %v6804_v27  ;;  %v616_v55 = vpack.c.bf16 %v556_v12, %v553_v41 }
 0x26e   :  { %v431_v47 = vsub.f32 %v415_v54, %v6808_v28 }
 0x26f   :  { %v7173_v14 = vpack.c.bf16 %v433_v45, %v432_v18  ;;  %793 = vrot.lane.b32.xlu0 %v616_v55, %s6661_s17  ;;  %5845 = vmatprep.subr.bf16.mxu1 %v616_v55 }
 0x270   :  { %v7176_v33 = vpack.c.bf16 %v431_v47, %v430_v13  ;;  %5846 = vmatpush3.bf16.msra.mxu1 %v616_v55  ;;  %v5803_v23 = vpop.f32.mrb[20].mxu1 }
 0x271   :  { %v420_v17 = vmul.f32 2.0, %v5803_v23  ;;  %v5835_v48 = vpop.f32.mrb[4].mxu0  ;;  %5847 = vmatprep.subr.bf16.mxu1 %v617_v24  ;;  %v367_v25 = vpop.f32.mrb[21].mxu1 }
 0x272   :  { %v418_v16 = vmul.f32 2.0, %v367_v25  ;;  %v569_v27 = vpop.f32.mrb[5].mxu0  ;;  %v5804_v34 = vpop.f32.mrb[22].mxu1 }
 0x273   :  { %795 = vrot.lane.b32.xlu0 %v617_v24, %s6661_s17  ;;  %v421_v26 = vmul.f32 2.0, %v5804_v34  ;;  %v5836_v28 = vpop.f32.mrb[6].mxu0  ;;  %v370_v18 = vpop.f32.mrb[23].mxu1  ;;  %v436_v19 = vsub.f32 %v420_v17, %v6860_v43 }
 0x274   :  { %v619_v40 = vpack.c.bf16 %v5836_v28, %v5835_v48  ;;  %v419_v41 = vmul.f32 2.0, %v370_v18  ;;  %v572_v45 = vpop.f32.mrb[7].mxu0  ;;  %5848 = vmatpush3.bf16.msra.mxu1 %v617_v24  ;;  %v434_v55 = vsub.f32 %v418_v16, %v6836_v36 }
 0x275   :  { %v437_v54 = vsub.f32 %v421_v26, %v6856_v42  ;;  %v618_v12 = vpack.c.bf16 %v572_v45, %v569_v27 }
 0x276   :  { %v435_v13 = vsub.f32 %v419_v41, %v6832_v35 }
 0x277   :  { %v7183_v47 = vpack.c.bf16 %v437_v54, %v436_v19  ;;  %797 = vrot.lane.b32.xlu0 %v618_v12, %s6661_s17  ;;  %5849 = vmatprep.subr.bf16.mxu1 %v618_v12 }
 0x278   :  { %v7186_v23 = vpack.c.bf16 %v435_v13, %v434_v55  ;;  %5850 = vmatpush3.bf16.msra.mxu1 %v618_v12  ;;  %v5807_v48 = vpop.f32.mrb[24].mxu1 }
 0x279   :  { %v424_v25 = vmul.f32 2.0, %v5807_v48  ;;  %v5839_v24 = vpop.f32.mrb[8].mxu0  ;;  %5851 = vmatprep.subr.bf16.mxu1 %v619_v40  ;;  %v383_v43 = vpop.f32.mrb[25].mxu1 }
 0x27a   :  { %v422_v17 = vmul.f32 2.0, %v383_v43  ;;  %v585_v42 = vpop.f32.mrb[9].mxu0  ;;  %v5808_v27 = vpop.f32.mrb[26].mxu1 }
 0x27b   :  { %799 = vrot.lane.b32.xlu0 %v619_v40, %s6661_s17  ;;  %v425_v36 = vmul.f32 2.0, %v5808_v27  ;;  %v5840_v35 = vpop.f32.mrb[10].mxu0  ;;  %v386_v16 = vpop.f32.mrb[27].mxu1  ;;  %v440_v18 = vsub.f32 %v424_v25, %v6908_v57 }
 0x27c   :  { %v621_v34 = vpack.c.bf16 %v5840_v35, %v5839_v24  ;;  %v423_v26 = vmul.f32 2.0, %v386_v16  ;;  %v588_v28 = vpop.f32.mrb[11].mxu0  ;;  %5852 = vmatpush3.bf16.msra.mxu1 %v619_v40  ;;  %v438_v19 = vsub.f32 %v422_v17, %v6884_v50 }
 0x27d   :  { %v441_v41 = vsub.f32 %v425_v36, %v6904_v56  ;;  %v620_v45 = vpack.c.bf16 %v588_v28, %v585_v42 }
 0x27e   :  { %v439_v54 = vsub.f32 %v423_v26, %v6880_v49 }
 0x27f   :  { %v7193_v12 = vpack.c.bf16 %v441_v41, %v440_v18  ;;  %801 = vrot.lane.b32.xlu0 %v620_v45, %s6661_s17  ;;  %5853 = vmatprep.subr.bf16.mxu1 %v620_v45 }
 0x280   :  { %v7196_v55 = vpack.c.bf16 %v439_v54, %v438_v19  ;;  %5854 = vmatpush3.bf16.msra.mxu1 %v620_v45  ;;  %v5811_v13 = vpop.f32.mrb[28].mxu1 }
 0x281   :  { %v428_v48 = vmul.f32 2.0, %v5811_v13  ;;  %v5843_v40 = vpop.f32.mrb[12].mxu0  ;;  %5855 = vmatprep.subr.bf16.mxu1 %v621_v34  ;;  %v399_v57 = vpop.f32.mrb[29].mxu1 }
 0x282   :  { %v426_v25 = vmul.f32 2.0, %v399_v57  ;;  %v601_v56 = vpop.f32.mrb[13].mxu0  ;;  %v5812_v24 = vpop.f32.mrb[30].mxu1 }
 0x283   :  { %803 = vrot.lane.b32.xlu0 %v621_v34, %s6661_s17  ;;  %v429_v50 = vmul.f32 2.0, %v5812_v24  ;;  %v5844_v49 = vpop.f32.mrb[14].mxu0  ;;  %v402_v43 = vpop.f32.mrb[31].mxu1  ;;  %v444_v36 = vsub.f32 %v428_v48, %v6956_v7 }
 0x284   :  { %v623_v17 = vpack.c.bf16 %v5844_v49, %v5843_v40  ;;  %v427_v42 = vmul.f32 2.0, %v402_v43  ;;  %v604_v27 = vpop.f32.mrb[15].mxu0  ;;  %5856 = vmatpush3.bf16.msra.mxu1 %v621_v34  ;;  %v442_v26 = vsub.f32 %v426_v25, %v6932_v0  ;;  %v6346_v0 = vld [vmem:[%s9442_s3 + $0x88] sm:$0xff]  }
 0x285   :  { %v445_v35 = vsub.f32 %v429_v50, %v6952_v6  ;;  %v622_v16 = vpack.c.bf16 %v604_v27, %v601_v56  ;;  %v770_v6 = vpop.permute.xlu1 %769 }
 0x286   :  { %v443_v28 = vsub.f32 %v427_v42, %v6928_v63  ;;  %v6345_v63 = vld [vmem:[%s9442_s3 + $0x80] sm:$0xff]  }
 0x287   :  { %v7203_v18 = vpack.c.bf16 %v445_v35, %v444_v36  ;;  %805 = vrot.lane.b32.xlu0 %v622_v16, %s6661_s17  ;;  %5857 = vmatprep.subr.bf16.mxu1 %v622_v16 }
 0x288   :  { %v7206_v41 = vpack.c.bf16 %v443_v28, %v442_v26  ;;  %5858 = vmatpush3.bf16.msra.mxu1 %v622_v16 }
 0x289   :  { %5859 = vmatprep.subr.bf16.mxu1 %v623_v17 }
 0x28b   :  { %807 = vrot.lane.b32.xlu0 %v623_v17, %s6661_s17 }
 0x28c   :  { %5860 = vmatpush3.bf16.msra.mxu1 %v623_v17 }
 0x28d   :  { %5877 = vmatprep.subr.bf16.mxu1 %v6345_v63 }
 0x28f   :  { %5862 = vmatmul.mubr.bf16.vlgmr.msra.gmra.mrb[32].mxu1 %v7074_v15 }
 0x290   :  { %5865 = vmatprep.mubr.bf16.mxu1 %v7079_v2  ;;  %5878 = vmatpush3.bf16.msra.mxu1 %v6345_v63  ;;  %v812_v2 = vsel %vm809_vm1, %v6812_v29, %v770_v6 }
 0x291   :  { %5879 = vmatprep.subr.bf16.mxu1 %v6346_v0 }
 0x294   :  { %5880 = vmatpush3.bf16.msra.mxu1 %v6346_v0 }
 0x297   :  { %5866 = vmatmul.mubr.bf16.gmra.mrb[36].mxu1 %v7088_v62  ;;  %v6347_v62 = vld [vmem:[%s9442_s3 + $0x90] sm:$0xff]  }
 0x298   :  { %5869 = vmatprep.mubr.bf16.mxu1 %v7093_v61  ;;  %5881 = vmatprep.subr.bf16.mxu1 %v6347_v62 }
 0x299   :  { %5882 = vmatpush3.bf16.msra.mxu1 %v6347_v62 }
 0x29f   :  { %5870 = vmatmul.mubr.bf16.gmra.mrb[40].mxu1 %v7102_v9 }
 0x2a0   :  { %5873 = vmatprep.mubr.bf16.mxu1 %v7107_v10  ;;  %v6348_v10 = vld [vmem:[%s9442_s3 + $0x98] sm:$0xff]  }
 0x2a1   :  { %5883 = vmatprep.subr.bf16.mxu1 %v6348_v10 }
 0x2a2   :  { %5884 = vmatpush3.bf16.msra.mxu1 %v6348_v10 }
 0x2a7   :  { %5874 = vmatmul.mubr.bf16.gmra.mrb[44].mxu1 %v7116_v11  ;;  %v772_v11 = vpop.permute.xlu1 %771 }
 0x2a8   :  { %v816_v29 = vsel %vm809_vm1, %v6823_v32, %v772_v11 }
 0x2ab   :  { %v774_v45 = vpop.permute.xlu1 %773 }
 0x2ac   :  { %v820_v19 = vsel %vm809_vm1, %v6847_v39, %v774_v45 }
 0x2af   :  { %v776_v13 = vpop.permute.xlu1 %775 }
 0x2b0   :  { %v824_v32 = vsel %vm809_vm1, %v6871_v46, %v776_v13 }
 0x2b3   :  { %v778_v40 = vpop.permute.xlu1 %777 }
 0x2b4   :  { %v828_v39 = vsel %vm809_vm1, %v6895_v53, %v778_v40 }
 0x2b7   :  { %v780_v25 = vpop.permute.xlu1 %779 }
 0x2b8   :  { %v832_v46 = vsel %vm809_vm1, %v6919_v60, %v780_v25  ;;  %v7263_v60 = vld [vmem:[%s9440_s2] sm:$0xff]  }
 0x2bb   :  { %v782_v24 = vpop.permute.xlu1 %781 }
 0x2bc   :  { %v836_v53 = vsel %vm809_vm1, %v6943_v3, %v782_v24 }
 0x2bf   :  { %v784_v49 = vpop.permute.xlu1 %783 }
 0x2c0   :  { %v840_v43 = vsel %vm809_vm1, %v6961_v8, %v784_v49 }
 0x2e1   :  { %v794_v7 = vpop.permute.xlu0 %793 }
 0x2e2   :  { %v844_v15 = vsel %vm809_vm1, %v7176_v33, %v794_v7 }
 0x2e3   :  { %1090 = vmatprep.mubr.bf16.mxu0 %v844_v15 }
 0x2e4   :  { %1091 = vmatmul.mubr.bf16.vlgmr.msra.gmra.mrb[16].mxu0 %v812_v2 }
 0x2e5   :  { %v796_v61 = vpop.permute.xlu0 %795 }
 0x2e6   :  { %v848_v9 = vsel %vm809_vm1, %v7173_v14, %v796_v61 }
 0x2e7   :  { %1098 = vmatprep.mubr.bf16.mxu0 %v848_v9 }
 0x2e9   :  { %v798_v33 = vpop.permute.xlu0 %797 }
 0x2ea   :  { %v852_v34 = vsel %vm809_vm1, %v7186_v23, %v798_v33 }
 0x2ec   :  { %1099 = vmatmul.mubr.bf16.gmra.mrb[20].mxu0 %v816_v29 }
 0x2ed   :  { %1106 = vmatprep.mubr.bf16.mxu0 %v852_v34  ;;  %v800_v14 = vpop.permute.xlu0 %799 }
 0x2ee   :  { %v856_v54 = vsel %vm809_vm1, %v7183_v47, %v800_v14 }
 0x2f1   :  { %v802_v48 = vpop.permute.xlu0 %801 }
 0x2f2   :  { %v860_v23 = vsel %vm809_vm1, %v7196_v55, %v802_v48 }
 0x2f4   :  { %1107 = vmatmul.mubr.bf16.gmra.mrb[24].mxu0 %v820_v19 }
 0x2f5   :  { %1114 = vmatprep.mubr.bf16.mxu0 %v856_v54  ;;  %v804_v57 = vpop.permute.xlu0 %803 }
 0x2f6   :  { %v864_v47 = vsel %vm809_vm1, %v7193_v12, %v804_v57 }
 0x2f9   :  { %v806_v56 = vpop.permute.xlu0 %805 }
 0x2fa   :  { %v868_v55 = vsel %vm809_vm1, %v7206_v41, %v806_v56 }
 0x2fc   :  { %1115 = vmatmul.mubr.bf16.gmra.mrb[28].mxu0 %v824_v32 }
 0x2fd   :  { %1122 = vmatprep.mubr.bf16.mxu0 %v860_v23  ;;  %v808_v50 = vpop.permute.xlu0 %807 }
 0x2fe   :  { %v872_v12 = vsel %vm809_vm1, %v7203_v18, %v808_v50 }
 0x304   :  { %1123 = vmatmul.mubr.bf16.gmra.mrb[32].mxu0 %v828_v39 }
 0x305   :  { %1130 = vmatprep.mubr.bf16.mxu0 %v864_v47 }
 0x30c   :  { %1131 = vmatmul.mubr.bf16.gmra.mrb[36].mxu0 %v832_v46 }
 0x30d   :  { %1138 = vmatprep.mubr.bf16.mxu0 %v868_v55  ;;  %v9615_v55 = vld [vmem:[#allocation18_spill] sm:$0xff] }
 0x314   :  { %1139 = vmatmul.mubr.bf16.gmra.mrb[40].mxu0 %v836_v53 }
 0x315   :  { %1146 = vmatprep.mubr.bf16.mxu0 %v872_v12 }
 0x31c   :  { %1147 = vmatmul.mubr.bf16.gmra.mrb[44].mxu0 %v840_v43 }
 0x31d   :  { %5949 = vmatprep.mubr.bf16.mxu0 %v7263_v60 }
 0x362   :  { %v5863_v17 = vpop.f32.mrb[32].mxu1 }
 0x363   :  { %v723_v42 = vmul.f32 2.0, %v5863_v17  ;;  %v658_v3 = vpop.f32.mrb[33].mxu1 }
 0x364   :  { %v721_v27 = vmul.f32 2.0, %v658_v3  ;;  %v5864_v36 = vpop.f32.mrb[34].mxu1 }
 0x365   :  { %v739_v35 = vsub.f32 %v723_v42, %v7015_v20  ;;  %v724_v16 = vmul.f32 2.0, %v5864_v36  ;;  %v661_v26 = vpop.f32.mrb[35].mxu1 }
 0x366   :  { %v737_v28 = vsub.f32 %v721_v27, %v7017_v21  ;;  %v722_v8 = vmul.f32 2.0, %v661_v26 }
 0x367   :  { %v740_v18 = vsub.f32 %v724_v16, %v7019_v22 }
 0x368   :  { %v738_v41 = vsub.f32 %v722_v8, %v7023_v31 }
 0x369   :  { %v754_v63 = vpack.c.bf16 %v740_v18, %v739_v35 }
 0x36a   :  { %v753_v0 = vpack.c.bf16 %v738_v41, %v737_v28  ;;  %v5867_v6 = vpop.f32.mrb[36].mxu1 }
 0x36b   :  { %v727_v7 = vmul.f32 2.0, %v5867_v6  ;;  %v674_v15 = vpop.f32.mrb[37].mxu1 }
 0x36c   :  { %v725_v2 = vmul.f32 2.0, %v674_v15  ;;  %v5868_v62 = vpop.f32.mrb[38].mxu1  ;;  %5885 = vmatprep.mubr.msk.bf16.mxu1 %vm809_vm1, %v753_v0 }
 0x36d   :  { %v743_v20 = vsub.f32 %v727_v7, %v7028_v37  ;;  %v728_v61 = vmul.f32 2.0, %v5868_v62  ;;  %v677_v9 = vpop.f32.mrb[39].mxu1  ;;  %5886 = vmatmul.mubr.msk.bf16.vlgmr.msra.gmra.mrb[48].mxu1 %vm809_vm1, %v754_v63 }
 0x36e   :  { %v741_v21 = vsub.f32 %v725_v2, %v7030_v38  ;;  %v726_v22 = vmul.f32 2.0, %v677_v9 }
 0x36f   :  { %v744_v31 = vsub.f32 %v728_v61, %v7033_v44 }
 0x370   :  { %v742_v10 = vsub.f32 %v726_v22, %v7037_v51 }
 0x371   :  { %v756_v11 = vpack.c.bf16 %v744_v31, %v743_v20 }
 0x372   :  { %v755_v33 = vpack.c.bf16 %v742_v10, %v741_v21  ;;  %v5871_v29 = vpop.f32.mrb[40].mxu1 }
 0x373   :  { %v731_v34 = vmul.f32 2.0, %v5871_v29  ;;  %v690_v45 = vpop.f32.mrb[41].mxu1 }
 0x374   :  { %v729_v14 = vmul.f32 2.0, %v690_v45  ;;  %v5872_v19 = vpop.f32.mrb[42].mxu1  ;;  %5889 = vmatprep.mubr.msk.bf16.mxu1 %vm809_vm1, %v755_v33 }
 0x375   :  { %v747_v37 = vsub.f32 %v731_v34, %v7042_v58  ;;  %v732_v54 = vmul.f32 2.0, %v5872_v19  ;;  %v693_v13 = vpop.f32.mrb[43].mxu1  ;;  %5890 = vmatmul.mubr.msk.bf16.gmra.mrb[52].mxu1 %vm809_vm1, %v756_v11 }
 0x376   :  { %v745_v38 = vsub.f32 %v729_v14, %v7044_v59  ;;  %v730_v44 = vmul.f32 2.0, %v693_v13 }
 0x377   :  { %v748_v51 = vsub.f32 %v732_v54, %v7047_v1 }
 0x378   :  { %v746_v48 = vsub.f32 %v730_v44, %v7051_v30 }
 0x379   :  { %v758_v32 = vpack.c.bf16 %v748_v51, %v747_v37 }
 0x37a   :  { %v757_v23 = vpack.c.bf16 %v746_v48, %v745_v38  ;;  %v5875_v40 = vpop.f32.mrb[44].mxu1 }
 0x37b   :  { %v735_v57 = vmul.f32 2.0, %v5875_v40  ;;  %v706_v39 = vpop.f32.mrb[45].mxu1  ;;  %v7308_v40 = vld [vmem:[%s9443_s5] ss:$0 sm:$0xff] }
 0x37c   :  { %v733_v47 = vmul.f32 2.0, %v706_v39  ;;  %v5876_v25 = vpop.f32.mrb[46].mxu1  ;;  %5893 = vmatprep.mubr.msk.bf16.mxu1 %vm809_vm1, %v757_v23 }
 0x37d   :  { %v751_v58 = vsub.f32 %v735_v57, %v7056_v52  ;;  %v736_v56 = vmul.f32 2.0, %v5876_v25  ;;  %v709_v46 = vpop.f32.mrb[47].mxu1  ;;  %5894 = vmatmul.mubr.msk.bf16.gmra.mrb[56].mxu1 %vm809_vm1, %v758_v32 }
 0x37e   :  { %v749_v59 = vsub.f32 %v733_v47, %v7058_v4  ;;  %v734_v1 = vmul.f32 2.0, %v709_v46 }
 0x37f   :  { %v752_v30 = vsub.f32 %v736_v56, %v7061_v5 }
 0x380   :  { %v750_v24 = vsub.f32 %v734_v1, %v9615_v55 }
 0x381   :  { %v760_v50 = vpack.c.bf16 %v752_v30, %v751_v58 }
 0x382   :  { %v759_v53 = vpack.c.bf16 %v750_v24, %v749_v59 }
 0x384   :  { %5897 = vmatprep.mubr.msk.bf16.mxu1 %vm809_vm1, %v759_v53 }
 0x385   :  { %5898 = vmatmul.mubr.msk.bf16.gmra.mrb[60].mxu1 %vm809_vm1, %v760_v50 }
 0x386   :  { %5917 = vmatprep.mubr.bf16.mxu1 %v7263_v60 }
 0x3b7   :  { %v5421_v52 = vpop.f32.mrb[16].mxu0 }
 0x3b8   :  { %v5422_v12 = vpop.f32.mrb[17].mxu0 }
 0x3b9   :  { %v5423_v49 = vadd.f32 %v5422_v12, %v5421_v52  ;;  %v5424_v43 = vpop.f32.mrb[18].mxu0 }
 0x3ba   :  { %v5425_v17 = vpop.f32.mrb[19].mxu0 }
 0x3bb   :  { %v5426_v42 = vadd.f32 %v5425_v17, %v5424_v43 }
 0x3bf   :  { %v5427_v4 = vpop.f32.mrb[20].mxu0 }
 0x3c0   :  { %v5428_v3 = vpop.f32.mrb[21].mxu0 }
 0x3c1   :  { %v5429_v27 = vadd.f32 %v5428_v3, %v5427_v4  ;;  %v5430_v5 = vpop.f32.mrb[22].mxu0 }
 0x3c2   :  { %v5431_v36 = vpop.f32.mrb[23].mxu0 }
 0x3c3   :  { %v5432_v35 = vadd.f32 %v5431_v36, %v5430_v5 }
 0x3c7   :  { %v5433_v16 = vpop.f32.mrb[24].mxu0 }
 0x3c8   :  { %v5434_v26 = vpop.f32.mrb[25].mxu0 }
 0x3c9   :  { %v5435_v28 = vadd.f32 %v5434_v26, %v5433_v16  ;;  %v5436_v8 = vpop.f32.mrb[26].mxu0 }
 0x3ca   :  { %v5437_v18 = vpop.f32.mrb[27].mxu0 }
 0x3cb   :  { %v5438_v41 = vadd.f32 %v5437_v18, %v5436_v8 }
 0x3cf   :  { %v5439_v63 = vpop.f32.mrb[28].mxu0 }
 0x3d0   :  { %v5440_v60 = vpop.f32.mrb[29].mxu0 }
 0x3d1   :  { %v5441_v0 = vadd.f32 %v5440_v60, %v5439_v63  ;;  %v5442_v6 = vpop.f32.mrb[30].mxu0 }
 0x3d2   :  { %v5443_v7 = vpop.f32.mrb[31].mxu0 }
 0x3d3   :  { %v5444_v15 = vadd.f32 %v5443_v7, %v5442_v6 }
 0x3d7   :  { %v5445_v2 = vpop.f32.mrb[32].mxu0 }
 0x3d8   :  { %v5446_v62 = vpop.f32.mrb[33].mxu0 }
 0x3d9   :  { %v7291_v20 = vadd.f32 %v5446_v62, %v5445_v2  ;;  %v5448_v61 = vpop.f32.mrb[34].mxu0 }
 0x3da   :  { %v5449_v9 = vpop.f32.mrb[35].mxu0 }
 0x3db   :  { %v7293_v21 = vadd.f32 %v5449_v9, %v5448_v61 }
 0x3df   :  { %v5451_v22 = vpop.f32.mrb[36].mxu0 }
 0x3e0   :  { %v5452_v31 = vpop.f32.mrb[37].mxu0 }
 0x3e1   :  { %v5453_v10 = vadd.f32 %v5452_v31, %v5451_v22  ;;  %v5454_v11 = vpop.f32.mrb[38].mxu0 }
 0x3e2   :  { %v5455_v33 = vpop.f32.mrb[39].mxu0 }
 0x3e3   :  { %v7295_v29 = vadd.f32 %v5455_v33, %v5454_v11 }
 0x3e7   :  { %v5457_v34 = vpop.f32.mrb[40].mxu0 }
 0x3e8   :  { %v5458_v45 = vpop.f32.mrb[41].mxu0 }
 0x3e9   :  { %v7297_v14 = vadd.f32 %v5458_v45, %v5457_v34  ;;  %v5460_v19 = vpop.f32.mrb[42].mxu0 }
 0x3ea   :  { %v5461_v37 = vpop.f32.mrb[43].mxu0 }
 0x3eb   :  { %v7299_v54 = vadd.f32 %v5461_v37, %v5460_v19 }
 0x3ef   :  { %v5463_v13 = vpop.f32.mrb[44].mxu0 }
 0x3f0   :  { %v5464_v38 = vpop.f32.mrb[45].mxu0 }
 0x3f1   :  { %v7301_v44 = vadd.f32 %v5464_v38, %v5463_v13  ;;  %v5466_v51 = vpop.f32.mrb[46].mxu0 }
 0x3f2   :  { %v5467_v48 = vpop.f32.mrb[47].mxu0 }
 0x3f3   :  { %v7303_v32 = vadd.f32 %v5467_v48, %v5466_v51 }
 0x440   :  { %v5887_v23 = vpop.f32.mrb[48].mxu1 }
 0x441   :  { %v7310_v57 = vadd.f32 %v5887_v23, %v5429_v27  ;;  %v1189_v39 = vpop.f32.mrb[49].mxu1 }
 0x442   :  { %v7312_v47 = vadd.f32 %v5423_v49, %v1189_v39  ;;  %v5888_v25 = vpop.f32.mrb[50].mxu1 }
 0x443   :  { %9616 = vst [vmem:[#allocation18_spill] sm:$0xff] %v7310_v57  ;;  %v1261_v58 = vadd.f32 %v7308_v40, %v7310_v57  ;;  %v7316_v56 = vadd.f32 %v5888_v25, %v5432_v35  ;;  %v1192_v46 = vpop.f32.mrb[51].mxu1 }
 0x444   :  { %9617 = vst [vmem:[#allocation19_spill] sm:$0xff] %v7312_v47  ;;  %v1259_v59 = vadd.f32 %v7308_v40, %v7312_v47  ;;  %v7320_v1 = vadd.f32 %v5426_v42, %v1192_v46 }
 0x445   :  { %9618 = vst [vmem:[#allocation20_spill] sm:$0xff] %v7316_v56  ;;  %v5118_v30 = vmul.f32 -1.442695, %v1261_v58  ;;  %v1262_v55 = vadd.f32 %v7308_v40, %v7316_v56 }
 0x446   :  { %9619 = vst [vmem:[#allocation21_spill] sm:$0xff] %v7320_v1  ;;  %v5116_v24 = vmul.f32 -1.442695, %v1259_v59  ;;  %v1260_v50 = vadd.f32 %v7308_v40, %v7320_v1 }
 0x447   :  { %6405 = vpow2.f32 %v5118_v30  ;;  %v5119_v53 = vmul.f32 -1.442695, %v1262_v55 }
 0x448   :  { %6407 = vpow2.f32 %v5116_v24  ;;  %v5117_v52 = vmul.f32 -1.442695, %v1260_v50  ;;  %v5891_v12 = vpop.f32.mrb[52].mxu1 }
 0x449   :  { %6409 = vpow2.f32 %v5119_v53  ;;  %v7326_v49 = vadd.f32 %v5891_v12, %v5441_v0  ;;  %v1205_v43 = vpop.f32.mrb[53].mxu1 }
 0x44a   :  { %6411 = vpow2.f32 %v5117_v52  ;;  %v7328_v17 = vadd.f32 %v5435_v28, %v1205_v43  ;;  %v5892_v42 = vpop.f32.mrb[54].mxu1 }
 0x44b   :  { %9620 = vst [vmem:[#allocation22_spill] sm:$0xff] %v7326_v49  ;;  %v1265_v4 = vadd.f32 %v7308_v40, %v7326_v49  ;;  %v7332_v3 = vadd.f32 %v5892_v42, %v5444_v15  ;;  %v1208_v27 = vpop.f32.mrb[55].mxu1 }
 0x44c   :  { %9621 = vst [vmem:[#allocation23_spill] sm:$0xff] %v7328_v17  ;;  %v1263_v5 = vadd.f32 %v7308_v40, %v7328_v17  ;;  %v7336_v36 = vadd.f32 %v5438_v41, %v1208_v27 }
 0x44d   :  { %9622 = vst [vmem:[#allocation24_spill] sm:$0xff] %v7332_v3  ;;  %v5122_v35 = vmul.f32 -1.442695, %v1265_v4  ;;  %v1266_v16 = vadd.f32 %v7308_v40, %v7332_v3  ;;  %v7707_v3 = vld [vmem:[%s9440_s2 + $0x50] sm:$0xff]  }
 0x44e   :  { %9623 = vst [vmem:[#allocation25_spill] sm:$0xff] %v7336_v36  ;;  %v5120_v26 = vmul.f32 -1.442695, %v1263_v5  ;;  %v1264_v28 = vadd.f32 %v7308_v40, %v7336_v36 }
 0x44f   :  { %6413 = vpow2.f32 %v5122_v35  ;;  %v5123_v8 = vmul.f32 -1.442695, %v1266_v16 }
 0x450   :  { %6415 = vpow2.f32 %v5120_v26  ;;  %v5121_v18 = vmul.f32 -1.442695, %v1264_v28  ;;  %v5895_v63 = vpop.f32.mrb[56].mxu1 }
 0x451   :  { %v6406_v60 = vpop.eup %6405  ;;  %6417 = vpow2.f32 %v5123_v8  ;;  %v7342_v0 = vadd.f32 %v5895_v63, %v5453_v10  ;;  %v1221_v6 = vpop.f32.mrb[57].mxu1  ;;  %v6598_v8 = vld [vmem:[%s9439_s1] sm:$0xff] }
 0x452   :  { %v6408_v41 = vpop.eup %6407  ;;  %v1325_v7 = vadd.f32 1.0, %v6406_v60  ;;  %6419 = vpow2.f32 %v5121_v18  ;;  %v7345_v15 = vadd.f32 %v7291_v20, %v1221_v6  ;;  %v5896_v2 = vpop.f32.mrb[58].mxu1  ;;  %v6600_v60 = vld [vmem:[%s9439_s1 + $0x18] sm:$0xff] }
 0x453   :  { %9624 = vst [vmem:[#allocation26_spill] sm:$0xff] %v7342_v0  ;;  %v6410_v62 = vpop.eup %6409  ;;  %v1323_v61 = vadd.f32 1.0, %v6408_v41  ;;  %v1269_v9 = vadd.f32 %v7308_v40, %v7342_v0  ;;  %v7350_v22 = vadd.f32 %v5896_v2, %v7295_v29  ;;  %v1224_v31 = vpop.f32.mrb[59].mxu1 }
 0x454   :  { %9625 = vst [vmem:[#allocation27_spill] sm:$0xff] %v7345_v15  ;;  %v6412_v11 = vpop.eup %6411  ;;  %6421 = vrcp.f32 %v1325_v7  ;;  %v1326_v10 = vadd.f32 1.0, %v6410_v62  ;;  %v1267_v33 = vadd.f32 %v7308_v40, %v7345_v15  ;;  %v7355_v34 = vadd.f32 %v7293_v21, %v1224_v31  ;;  %v7700_v15 = vld [vmem:[%s9440_s2 + $0x48] sm:$0xff]  }
 0x455   :  { %9626 = vst [vmem:[#allocation28_spill] sm:$0xff] %v7350_v22  ;;  %6423 = vrcp.f32 %v1323_v61  ;;  %v1324_v20 = vadd.f32 1.0, %v6412_v11  ;;  %v5126_v45 = vmul.f32 -1.442695, %v1269_v9  ;;  %v1270_v19 = vadd.f32 %v7308_v40, %v7350_v22  ;;  %v6601_v9 = vld [vmem:[%s9439_s1 + $0x10] sm:$0xff] }
 0x456   :  { %9627 = vst [vmem:[#allocation29_spill] sm:$0xff] %v7355_v34  ;;  %6425 = vrcp.f32 %v1326_v10  ;;  %v5124_v37 = vmul.f32 -1.442695, %v1267_v33  ;;  %v1268_v29 = vadd.f32 %v7308_v40, %v7355_v34 }
 0x457   :  { %6427 = vrcp.f32 %v1324_v20  ;;  %v5127_v13 = vmul.f32 -1.442695, %v1270_v19 }
 0x458   :  { %6429 = vpow2.f32 %v5126_v45  ;;  %v5125_v38 = vmul.f32 -1.442695, %v1268_v29  ;;  %v5899_v51 = vpop.f32.mrb[60].mxu1 }
 0x459   :  { %v6414_v48 = vpop.eup %6413  ;;  %6431 = vpow2.f32 %v5124_v37  ;;  %v7362_v21 = vadd.f32 %v5899_v51, %v7301_v44  ;;  %v1237_v23 = vpop.f32.mrb[61].mxu1 }
 0x45a   :  { %v6416_v39 = vpop.eup %6415  ;;  %v1329_v25 = vadd.f32 1.0, %v6414_v48  ;;  %6433 = vpow2.f32 %v5127_v13  ;;  %v7365_v58 = vadd.f32 %v7297_v14, %v1237_v23  ;;  %v5900_v46 = vpop.f32.mrb[62].mxu1  ;;  %v6603_v48 = vld [vmem:[%s9439_s1 + $0x28] sm:$0xff] }
 0x45b   :  { %9628 = vst [vmem:[#allocation30_spill] sm:$0xff] %v7362_v21  ;;  %v6418_v59 = vpop.eup %6417  ;;  %v1327_v30 = vadd.f32 1.0, %v6416_v39  ;;  %6435 = vpow2.f32 %v5125_v38  ;;  %v1273_v55 = vadd.f32 %v7308_v40, %v7362_v21  ;;  %v7370_v24 = vadd.f32 %v5900_v46, %v7303_v32  ;;  %v1240_v50 = vpop.f32.mrb[63].mxu1  ;;  %v6602_v38 = vld [vmem:[%s9439_s1 + $0x20] sm:$0xff]  ;;  %v6604_v39 = vld [vmem:[%s9439_s1 + $0x38] sm:$0xff] }
 0x45c   :  { %9629 = vst [vmem:[#allocation31_spill] sm:$0xff] %v7365_v58  ;;  %v6420_v44 = vpop.eup %6419  ;;  %6437 = vrcp.f32 %v1329_v25  ;;  %v1330_v53 = vadd.f32 1.0, %v6418_v59  ;;  %v1271_v52 = vadd.f32 %v7308_v40, %v7365_v58  ;;  %v7375_v14 = vadd.f32 %v7299_v54, %v1240_v50 }
 0x45d   :  { %9630 = vst [vmem:[#allocation32_spill] sm:$0xff] %v7370_v24  ;;  %6439 = vrcp.f32 %v1327_v30  ;;  %v1328_v12 = vadd.f32 1.0, %v6420_v44  ;;  %v5130_v43 = vmul.f32 -1.442695, %v1273_v55  ;;  %v1274_v42 = vadd.f32 %v7308_v40, %v7370_v24  ;;  %v6605_v44 = vld [vmem:[%s9439_s1 + $0x30] sm:$0xff] }
 0x45e   :  { %9631 = vst [vmem:[#allocation33_spill] sm:$0xff] %v7375_v14  ;;  %v7379_v4 = vpop.eup %6421  ;;  %6441 = vrcp.f32 %v1330_v53  ;;  %v5128_v32 = vmul.f32 -1.442695, %v1271_v52  ;;  %v1272_v27 = vadd.f32 %v7308_v40, %v7375_v14  ;;  %v6599_v40 = vld [vmem:[%s9439_s1 + $0x8] sm:$0xff] }
 0x45f   :  { %9632 = vst [vmem:[#allocation34_spill] sm:$0xff] %v7379_v4  ;;  %v7383_v5 = vpop.eup %6423  ;;  %6443 = vrcp.f32 %v1328_v12  ;;  %v5131_v35 = vmul.f32 -1.442695, %v1274_v42  ;;  %v7415_v31 = vmul.f32 %v6601_v9, %v7379_v4 }
 0x460   :  { %9633 = vst [vmem:[#allocation35_spill] sm:$0xff] %v7383_v5  ;;  %v7385_v16 = vpop.eup %6425  ;;  %6445 = vpow2.f32 %v5130_v43  ;;  %v5129_v54 = vmul.f32 -1.442695, %v1272_v27  ;;  %v7393_v18 = vmul.f32 %v6598_v8, %v7383_v5 }
 0x461   :  { %9634 = vst [vmem:[#allocation36_spill] sm:$0xff] %v7385_v16  ;;  %v7387_v26 = vpop.eup %6427  ;;  %6447 = vpow2.f32 %v5128_v32  ;;  %v7405_v6 = vmul.f32 %v6600_v60, %v7385_v16 }
 0x462   :  { %9635 = vst [vmem:[#allocation37_spill] sm:$0xff] %v7387_v26  ;;  %v6430_v28 = vpop.eup %6429  ;;  %6449 = vpow2.f32 %v5131_v35  ;;  %v7399_v63 = vmul.f32 %v6599_v40, %v7387_v26  ;;  %v6607_v40 = vld [vmem:[%s9439_s1 + $0x48] sm:$0xff] }
 0x463   :  { %v6432_v41 = vpop.eup %6431  ;;  %v1333_v7 = vadd.f32 1.0, %v6430_v28  ;;  %6451 = vpow2.f32 %v5129_v54  ;;  %v7422_v45 = vpack.c.bf16 %v7405_v6, %v7415_v31  ;;  %v6606_v28 = vld [vmem:[%s9439_s1 + $0x40] sm:$0xff] }
 0x464   :  { %v6434_v2 = vpop.eup %6433  ;;  %v1331_v62 = vadd.f32 1.0, %v6432_v41  ;;  %v7409_v61 = vpack.c.bf16 %v7399_v63, %v7393_v18  ;;  %v6608_v41 = vld [vmem:[%s9439_s1 + $0x58] sm:$0xff] }
 0x465   :  { %v6436_v11 = vpop.eup %6435  ;;  %6453 = vrcp.f32 %v1333_v7  ;;  %v1334_v10 = vadd.f32 1.0, %v6434_v2 }
 0x466   :  { %v7417_v33 = vpop.eup %6437  ;;  %6455 = vrcp.f32 %v1331_v62  ;;  %v1332_v20 = vadd.f32 1.0, %v6436_v11  ;;  %5901 = vmatprep.subr.bf16.mxu1 %v7409_v61  ;;  %v6609_v62 = vld [vmem:[%s9439_s1 + $0x50] sm:$0xff] }
 0x467   :  { %9636 = vst [vmem:[#allocation38_spill] sm:$0xff] %v7417_v33  ;;  %v7424_v19 = vpop.eup %6439  ;;  %6457 = vrcp.f32 %v1334_v10  ;;  %5902 = vmatpush3.bf16.msra.mxu1 %v7409_v61  ;;  %v7459_v53 = vmul.f32 %v6605_v44, %v7417_v33 }
 0x468   :  { %9637 = vst [vmem:[#allocation39_spill] sm:$0xff] %v7424_v19  ;;  %v7427_v37 = vpop.eup %6441  ;;  %6459 = vrcp.f32 %v1332_v20  ;;  %5903 = vmatprep.subr.bf16.mxu1 %v7422_v45  ;;  %v7436_v51 = vmul.f32 %v6602_v38, %v7424_v19 }
 0x469   :  { %9638 = vst [vmem:[#allocation40_spill] sm:$0xff] %v7427_v37  ;;  %v7430_v29 = vpop.eup %6443  ;;  %v7448_v25 = vmul.f32 %v6604_v39, %v7427_v37 }
 0x46a   :  { %9639 = vst [vmem:[#allocation41_spill] sm:$0xff] %v7430_v29  ;;  %v6446_v13 = vpop.eup %6445  ;;  %v7442_v23 = vmul.f32 %v6603_v48, %v7430_v29  ;;  %v6610_v48 = vld [vmem:[%s9439_s1 + $0x60] sm:$0xff] }
 0x46b   :  { %v6448_v46 = vpop.eup %6447  ;;  %v1337_v59 = vadd.f32 1.0, %v6446_v13  ;;  %5904 = vmatpush3.bf16.msra.mxu1 %v7422_v45  ;;  %v7464_v42 = vpack.c.bf16 %v7448_v25, %v7459_v53 }
 0x46c   :  { %v6450_v30 = vpop.eup %6449  ;;  %v1335_v55 = vadd.f32 1.0, %v6448_v46  ;;  %v7453_v50 = vpack.c.bf16 %v7442_v23, %v7436_v51  ;;  %v6611_v46 = vld [vmem:[%s9439_s1 + $0x68] sm:$0xff] }
 0x46d   :  { %v6452_v52 = vpop.eup %6451  ;;  %6461 = vrcp.f32 %v1337_v59  ;;  %v1338_v12 = vadd.f32 1.0, %v6450_v30  ;;  %9640 = vst [vmem:[#allocation42_spill] sm:$0xff] %v7464_v42  ;;  %v6612_v30 = vld [vmem:[%s9439_s1 + $0x78] sm:$0xff] }
 0x46e   :  { %6463 = vrcp.f32 %v1335_v55  ;;  %v1336_v43 = vadd.f32 1.0, %v6452_v52  ;;  %5905 = vmatprep.subr.bf16.mxu1 %v7453_v50  ;;  %v6613_v52 = vld [vmem:[%s9439_s1 + $0x70] sm:$0xff] }
 0x46f   :  { %v7466_v32 = vpop.eup %6453  ;;  %6465 = vrcp.f32 %v1338_v12  ;;  %5906 = vmatpush3.bf16.msra.mxu1 %v7453_v50 }
 0x470   :  { %9641 = vst [vmem:[#allocation43_spill] sm:$0xff] %v7466_v32  ;;  %v7469_v27 = vpop.eup %6455  ;;  %6467 = vrcp.f32 %v1336_v43  ;;  %5907 = vmatprep.subr.bf16.mxu1 %v7464_v42  ;;  %v7503_v9 = vmul.f32 %v6609_v62, %v7466_v32  ;;  %v7578_v62 = vld [vmem:[%s9440_s2 + $0x20] sm:$0xff]  }
 0x471   :  { %9642 = vst [vmem:[#allocation44_spill] sm:$0xff] %v7469_v27  ;;  %v7472_v35 = vpop.eup %6457  ;;  %v7481_v8 = vmul.f32 %v6606_v28, %v7469_v27  ;;  %v7560_v28 = vld [vmem:[%s9440_s2 + $0x8] sm:$0xff]  }
 0x472   :  { %9643 = vst [vmem:[#allocation45_spill] sm:$0xff] %v7472_v35  ;;  %v7474_v54 = vpop.eup %6459  ;;  %v7493_v7 = vmul.f32 %v6608_v41, %v7472_v35  ;;  %v7572_v41 = vld [vmem:[%s9440_s2 + $0x18] sm:$0xff]  }
 0x473   :  { %9644 = vst [vmem:[#allocation46_spill] sm:$0xff] %v7474_v54  ;;  %5908 = vmatpush3.bf16.msra.mxu1 %v7464_v42  ;;  %v7487_v60 = vmul.f32 %v6607_v40, %v7474_v54  ;;  %v7566_v40 = vld [vmem:[%s9440_s2 + $0x10] sm:$0xff]  }
 0x474   :  { %v7510_v10 = vpack.c.bf16 %v7493_v7, %v7503_v9 }
 0x475   :  { %v7497_v2 = vpack.c.bf16 %v7487_v60, %v7481_v8 }
 0x476   :  { %9647 = vst [vmem:[#allocation49_spill] sm:$0xff] %v7510_v10 }
 0x477   :  { %9645 = vst [vmem:[#allocation47_spill] sm:$0xff] %v7497_v2  ;;  %v7505_v11 = vpop.eup %6461  ;;  %5909 = vmatprep.subr.bf16.mxu1 %v7497_v2 }
 0x478   :  { %9646 = vst [vmem:[#allocation48_spill] sm:$0xff] %v7505_v11  ;;  %v7512_v20 = vpop.eup %6463  ;;  %5910 = vmatpush3.bf16.msra.mxu1 %v7497_v2  ;;  %v7547_v12 = vmul.f32 %v6613_v52, %v7505_v11  ;;  %v7602_v52 = vld [vmem:[%s9440_s2 + $0x40] sm:$0xff]  }
 0x479   :  { %9648 = vst [vmem:[#allocation50_spill] sm:$0xff] %v7512_v20  ;;  %v7515_v13 = vpop.eup %6465  ;;  %5911 = vmatprep.subr.bf16.mxu1 %v7510_v10  ;;  %v7524_v39 = vmul.f32 %v6610_v48, %v7512_v20  ;;  %v7584_v48 = vld [vmem:[%s9440_s2 + $0x28] sm:$0xff]  }
 0x47a   :  { %9649 = vst [vmem:[#allocation51_spill] sm:$0xff] %v7515_v13  ;;  %v7518_v38 = vpop.eup %6467  ;;  %v7536_v55 = vmul.f32 %v6612_v30, %v7515_v13  ;;  %v7596_v30 = vld [vmem:[%s9440_s2 + $0x38] sm:$0xff]  }
 0x47b   :  { %9650 = vst [vmem:[#allocation52_spill] sm:$0xff] %v7518_v38  ;;  %v7530_v59 = vmul.f32 %v6611_v46, %v7518_v38  ;;  %v7590_v46 = vld [vmem:[%s9440_s2 + $0x30] sm:$0xff]  }
 0x47c   :  { %5912 = vmatpush3.bf16.msra.mxu1 %v7510_v10  ;;  %v7552_v43 = vpack.c.bf16 %v7536_v55, %v7547_v12 }
 0x47d   :  { %v7541_v44 = vpack.c.bf16 %v7530_v59, %v7524_v39 }
 0x47e   :  { %9652 = vst [vmem:[#allocation54_spill] sm:$0xff] %v7552_v43 }
 0x47f   :  { %9651 = vst [vmem:[#allocation53_spill] sm:$0xff] %v7541_v44  ;;  %5913 = vmatprep.subr.bf16.mxu1 %v7541_v44 }
 0x480   :  { %5914 = vmatpush3.bf16.msra.mxu1 %v7541_v44 }
 0x481   :  { %5915 = vmatprep.subr.bf16.mxu1 %v7552_v43 }
 0x484   :  { %5916 = vmatpush3.bf16.msra.mxu1 %v7552_v43 }
 0x487   :  { %5918 = vmatmul.mubr.bf16.vlgmr.msra.gmra.mrb[64].mxu1 %v7560_v28 }
 0x488   :  { %5921 = vmatprep.mubr.bf16.mxu1 %v7566_v40 }
 0x48f   :  { %5922 = vmatmul.mubr.bf16.gmra.mrb[68].mxu1 %v7572_v41 }
 0x490   :  { %5925 = vmatprep.mubr.bf16.mxu1 %v7578_v62 }
 0x497   :  { %5926 = vmatmul.mubr.bf16.gmra.mrb[72].mxu1 %v7584_v48 }
 0x498   :  { %5929 = vmatprep.mubr.bf16.mxu1 %v7590_v46 }
 0x49f   :  { %5930 = vmatmul.mubr.bf16.gmra.mrb[76].mxu1 %v7596_v30 }
 0x4a0   :  { %5981 = vmatprep.mubr.bf16.mxu1 %v7602_v52 }
 0x55a   :  { %v7605_v13 = vpop.f32.mrb[64].mxu1 }
 0x55b   :  { %v7607_v11 = vpop.f32.mrb[65].mxu1 }
 0x55c   :  { %v7609_v38 = vpop.f32.mrb[66].mxu1 }
 0x55d   :  { %v7613_v20 = vpack.c.bf16 %v7609_v38, %v7605_v13  ;;  %v7615_v35 = vpop.f32.mrb[67].mxu1 }
 0x55e   :  { %v1492_v32 = vpack.c.bf16 %v7615_v35, %v7607_v11 }
 0x560   :  { %1887 = vrot.lane.b32.xlu0 %v1492_v32, %s6660_s28  ;;  %5933 = vmatprep.subr.bf16.mxu0 %v1492_v32 }
 0x561   :  { %5965 = vmatprep.subr.bf16.mxu1 %v1492_v32  ;;  %5934 = vmatpush3.bf16.msra.mxu0 %v1492_v32 }
 0x562   :  { %5966 = vmatpush3.bf16.msra.mxu1 %v1492_v32  ;;  %v7620_v54 = vpop.f32.mrb[68].mxu1  ;;  %5935 = vmatprep.subr.bf16.mxu0 %v7613_v20 }
 0x563   :  { %5967 = vmatprep.subr.bf16.mxu1 %v7613_v20  ;;  %v7624_v27 = vpop.f32.mrb[69].mxu1 }
 0x564   :  { %v7626_v37 = vpop.f32.mrb[70].mxu1 }
 0x565   :  { %v7630_v33 = vpack.c.bf16 %v7626_v37, %v7620_v54  ;;  %v7632_v29 = vpop.f32.mrb[71].mxu1  ;;  %5936 = vmatpush3.bf16.msra.mxu0 %v7613_v20 }
 0x566   :  { %v7637_v32 = vpack.c.bf16 %v7632_v29, %v7624_v27  ;;  %5968 = vmatpush3.bf16.msra.mxu1 %v7613_v20 }
 0x568   :  { %5937 = vmatprep.subr.bf16.mxu0 %v7637_v32  ;;  %5969 = vmatprep.subr.bf16.mxu1 %v7637_v32 }
 0x569   :  { %5938 = vmatpush3.bf16.msra.mxu0 %v7637_v32 }
 0x56a   :  { %5970 = vmatpush3.bf16.msra.mxu1 %v7637_v32  ;;  %v7644_v19 = vpop.f32.mrb[72].mxu1  ;;  %5939 = vmatprep.subr.bf16.mxu0 %v7630_v33 }
 0x56b   :  { %5971 = vmatprep.subr.bf16.mxu1 %v7630_v33  ;;  %v7648_v16 = vpop.f32.mrb[73].mxu1 }
 0x56c   :  { %v7650_v4 = vpop.f32.mrb[74].mxu1 }
 0x56d   :  { %v7654_v26 = vpack.c.bf16 %v7650_v4, %v7644_v19  ;;  %v7656_v5 = vpop.f32.mrb[75].mxu1  ;;  %5940 = vmatpush3.bf16.msra.mxu0 %v7630_v33 }
 0x56e   :  { %v7661_v24 = vpack.c.bf16 %v7656_v5, %v7648_v16  ;;  %5972 = vmatpush3.bf16.msra.mxu1 %v7630_v33 }
 0x570   :  { %5941 = vmatprep.subr.bf16.mxu0 %v7661_v24  ;;  %5973 = vmatprep.subr.bf16.mxu1 %v7661_v24 }
 0x571   :  { %5942 = vmatpush3.bf16.msra.mxu0 %v7661_v24 }
 0x572   :  { %5974 = vmatpush3.bf16.msra.mxu1 %v7661_v24  ;;  %v7668_v21 = vpop.f32.mrb[76].mxu1  ;;  %5943 = vmatprep.subr.bf16.mxu0 %v7654_v26 }
 0x573   :  { %5975 = vmatprep.subr.bf16.mxu1 %v7654_v26  ;;  %v7672_v14 = vpop.f32.mrb[77].mxu1 }
 0x574   :  { %9653 = vst [vmem:[#allocation55_spill] sm:$0xff] %v7672_v14  ;;  %v7674_v58 = vpop.f32.mrb[78].mxu1 }
 0x575   :  { %9654 = vst [vmem:[#allocation56_spill] sm:$0xff] %v7674_v58  ;;  %v7678_v22 = vpack.c.bf16 %v7674_v58, %v7668_v21  ;;  %v7680_v0 = vpop.f32.mrb[79].mxu1  ;;  %5944 = vmatpush3.bf16.msra.mxu0 %v7654_v26 }
 0x576   :  { %9655 = vst [vmem:[#allocation57_spill] sm:$0xff] %v7680_v0  ;;  %v7685_v34 = vpack.c.bf16 %v7680_v0, %v7672_v14  ;;  %5976 = vmatpush3.bf16.msra.mxu1 %v7654_v26 }
 0x578   :  { %5945 = vmatprep.subr.bf16.mxu0 %v7685_v34  ;;  %5977 = vmatprep.subr.bf16.mxu1 %v7685_v34 }
 0x579   :  { %5946 = vmatpush3.bf16.msra.mxu0 %v7685_v34 }
 0x57a   :  { %5978 = vmatpush3.bf16.msra.mxu1 %v7685_v34  ;;  %5947 = vmatprep.subr.bf16.mxu0 %v7678_v22 }
 0x57b   :  { %5979 = vmatprep.subr.bf16.mxu1 %v7678_v22 }
 0x57d   :  { %5948 = vmatpush3.bf16.msra.mxu0 %v7678_v22 }
 0x57e   :  { %5980 = vmatpush3.bf16.msra.mxu1 %v7678_v22 }
 0x580   :  { %5950 = vmatmul.mubr.bf16.vlgmr.msra.gmra.mrb[48].mxu0 %v7560_v28  ;;  %v7714_v28 = vld [vmem:[%s9440_s2 + $0x58] sm:$0xff]  }
 0x581   :  { %5982 = vmatmul.mubr.bf16.vlgmr.msra.gmra.mrb[80].mxu1 %v7700_v15  ;;  %5953 = vmatprep.mubr.bf16.mxu0 %v7566_v40  ;;  %v7721_v40 = vld [vmem:[%s9440_s2 + $0x60] sm:$0xff]  }
 0x582   :  { %5985 = vmatprep.mubr.bf16.mxu1 %v7707_v3 }
 0x588   :  { %5954 = vmatmul.mubr.bf16.gmra.mrb[52].mxu0 %v7572_v41  ;;  %v7728_v41 = vld [vmem:[%s9440_s2 + $0x68] sm:$0xff]  }
 0x589   :  { %5986 = vmatmul.mubr.bf16.gmra.mrb[84].mxu1 %v7714_v28  ;;  %5957 = vmatprep.mubr.bf16.mxu0 %v7578_v62  ;;  %v7735_v62 = vld [vmem:[%s9440_s2 + $0x70] sm:$0xff]  }
 0x58a   :  { %5989 = vmatprep.mubr.bf16.mxu1 %v7721_v40 }
 0x590   :  { %5958 = vmatmul.mubr.bf16.gmra.mrb[56].mxu0 %v7584_v48  ;;  %v7742_v48 = vld [vmem:[%s9440_s2 + $0x78] sm:$0xff]  }
 0x591   :  { %5990 = vmatmul.mubr.bf16.gmra.mrb[88].mxu1 %v7728_v41  ;;  %5961 = vmatprep.mubr.bf16.mxu0 %v7590_v46 }
 0x592   :  { %5993 = vmatprep.mubr.bf16.mxu1 %v7735_v62 }
 0x598   :  { %5962 = vmatmul.mubr.bf16.gmra.mrb[60].mxu0 %v7596_v30 }
 0x599   :  { %5994 = vmatmul.mubr.bf16.gmra.mrb[92].mxu1 %v7742_v48  ;;  %6013 = vmatprep.mubr.bf16.mxu0 %v7602_v52 }
 0x653   :  { %v5951_v49 = vpop.f32.mrb[48].mxu0 }
 0x654   :  { %v1599_v46 = vmul.f32 2.0, %v5951_v49  ;;  %v5983_v36 = vpop.f32.mrb[80].mxu1  ;;  %v1534_v17 = vpop.f32.mrb[49].mxu0 }
 0x655   :  { %v1597_v56 = vmul.f32 2.0, %v1534_v17  ;;  %v1671_v57 = vpop.f32.mrb[81].mxu1  ;;  %v5952_v1 = vpop.f32.mrb[50].mxu0 }
 0x656   :  { %v1600_v47 = vmul.f32 2.0, %v5952_v1  ;;  %v5984_v43 = vpop.f32.mrb[82].mxu1  ;;  %v1537_v44 = vpop.f32.mrb[51].mxu0  ;;  %v1615_v0 = vsub.f32 %v1599_v46, %v7415_v31 }
 0x657   :  { %v1735_v30 = vpack.c.bf16 %v5984_v43, %v5983_v36  ;;  %v1598_v10 = vmul.f32 2.0, %v1537_v44  ;;  %v1674_v2 = vpop.f32.mrb[83].mxu1  ;;  %v1613_v52 = vsub.f32 %v1597_v56, %v7393_v18 }
 0x658   :  { %v1616_v42 = vsub.f32 %v1600_v47, %v7405_v6  ;;  %v1734_v58 = vpack.c.bf16 %v1674_v2, %v1671_v57 }
 0x659   :  { %v1614_v49 = vsub.f32 %v1598_v10, %v7399_v63 }
 0x65a   :  { %1935 = vrot.lane.b32.xlu0 %v1734_v58, %s6662_s27  ;;  %5997 = vmatprep.subr.bf16.mxu0 %v1734_v58  ;;  %v1630_v17 = vpack.c.bf16 %v1616_v42, %v1615_v0 }
 0x65b   :  { %5998 = vmatpush3.bf16.msra.mxu0 %v1734_v58  ;;  %v5955_v1 = vpop.f32.mrb[52].mxu0  ;;  %v1629_v14 = vpack.c.bf16 %v1614_v49, %v1613_v52 }
 0x65c   :  { %v1603_v36 = vmul.f32 2.0, %v5955_v1  ;;  %v5987_v44 = vpop.f32.mrb[84].mxu1  ;;  %5999 = vmatprep.subr.bf16.mxu0 %v1735_v30  ;;  %v1550_v43 = vpop.f32.mrb[53].mxu0 }
 0x65d   :  { %v1601_v31 = vmul.f32 2.0, %v1550_v43  ;;  %v1687_v46 = vpop.f32.mrb[85].mxu1  ;;  %1911 = vrot.lane.b32.xlu1 %v1629_v14, %s6661_s17  ;;  %v5956_v57 = vpop.f32.mrb[54].mxu0 }
 0x65e   :  { %v5988_v47 = vpop.f32.mrb[86].mxu1  ;;  %1913 = vrot.lane.b32.xlu0 %v1630_v17, %s6661_s17  ;;  %v1604_v56 = vmul.f32 2.0, %v5956_v57  ;;  %v1553_v18 = vpop.f32.mrb[55].mxu0  ;;  %v1619_v6 = vsub.f32 %v1603_v36, %v7459_v53 }
 0x65f   :  { %v7753_v63 = vpack.c.bf16 %v5988_v47, %v5987_v44  ;;  %v1602_v0 = vmul.f32 2.0, %v1553_v18  ;;  %v1690_v58 = vpop.f32.mrb[87].mxu1  ;;  %6000 = vmatpush3.bf16.msra.mxu0 %v1735_v30  ;;  %v1617_v10 = vsub.f32 %v1601_v31, %v7436_v51 }
 0x660   :  { %v1620_v42 = vsub.f32 %v1604_v56, %v7448_v25  ;;  %v1736_v2 = vpack.c.bf16 %v1690_v58, %v1687_v46 }
 0x661   :  { %v1618_v14 = vsub.f32 %v1602_v0, %v7442_v23  ;;  %1889 = vrot.lane.b32.xlu1 %v7613_v20, %s6660_s28 }
 0x662   :  { %6001 = vmatprep.subr.bf16.mxu0 %v1736_v2  ;;  %1891 = vrot.lane.b32.xlu0 %v7637_v32, %s6660_s28  ;;  %v1632_v52 = vpack.c.bf16 %v1620_v42, %v1619_v6 }
 0x663   :  { %6002 = vmatpush3.bf16.msra.mxu0 %v1736_v2  ;;  %v5959_v49 = vpop.f32.mrb[56].mxu0  ;;  %v1631_v17 = vpack.c.bf16 %v1618_v14, %v1617_v10 }
 0x664   :  { %v1607_v1 = vmul.f32 2.0, %v5959_v49  ;;  %v5991_v53 = vpop.f32.mrb[88].mxu1  ;;  %6003 = vmatprep.subr.bf16.mxu0 %v7753_v63  ;;  %v1566_v25 = vpop.f32.mrb[57].mxu0 }
 0x665   :  { %v1605_v36 = vmul.f32 2.0, %v1566_v25  ;;  %v1703_v51 = vpop.f32.mrb[89].mxu1  ;;  %1937 = vrot.lane.b32.xlu1 %v1735_v30, %s6662_s27  ;;  %v5960_v23 = vpop.f32.mrb[58].mxu0 }
 0x666   :  { %v5992_v44 = vpop.f32.mrb[90].mxu1  ;;  %1939 = vrot.lane.b32.xlu0 %v1736_v2, %s6662_s27  ;;  %v1608_v20 = vmul.f32 2.0, %v5960_v23  ;;  %v1569_v43 = vpop.f32.mrb[59].mxu0  ;;  %v1623_v57 = vsub.f32 %v1607_v1, %v7503_v9 }
 0x667   :  { %v1739_v32 = vpack.c.bf16 %v5992_v44, %v5991_v53  ;;  %v1606_v31 = vmul.f32 2.0, %v1569_v43  ;;  %v1706_v46 = vpop.f32.mrb[91].mxu1  ;;  %6004 = vmatpush3.bf16.msra.mxu0 %v7753_v63  ;;  %v1621_v18 = vsub.f32 %v1605_v36, %v7481_v8 }
 0x668   :  { %v1624_v47 = vsub.f32 %v1608_v20, %v7493_v7  ;;  %v1738_v56 = vpack.c.bf16 %v1706_v46, %v1703_v51 }
 0x669   :  { %v1622_v30 = vsub.f32 %v1606_v31, %v7487_v60  ;;  %1915 = vrot.lane.b32.xlu1 %v1631_v17, %s6661_s17 }
 0x66a   :  { %6005 = vmatprep.subr.bf16.mxu0 %v1738_v56  ;;  %1917 = vrot.lane.b32.xlu0 %v1632_v52, %s6661_s17  ;;  %v1634_v0 = vpack.c.bf16 %v1624_v47, %v1623_v57 }
 0x66b   :  { %6006 = vmatpush3.bf16.msra.mxu0 %v1738_v56  ;;  %v5963_v58 = vpop.f32.mrb[60].mxu0  ;;  %v1633_v6 = vpack.c.bf16 %v1622_v30, %v1621_v18 }
 0x66c   :  { %v1611_v42 = vmul.f32 2.0, %v5963_v58  ;;  %v5995_v2 = vpop.f32.mrb[92].mxu1  ;;  %6007 = vmatprep.subr.bf16.mxu0 %v1739_v32  ;;  %v1582_v9 = vpop.f32.mrb[61].mxu0 }
 0x66d   :  { %v1609_v10 = vmul.f32 2.0, %v1582_v9  ;;  %v1719_v7 = vpop.f32.mrb[93].mxu1  ;;  %1893 = vrot.lane.b32.xlu1 %v7630_v33, %s6660_s28  ;;  %v5964_v8 = vpop.f32.mrb[62].mxu0 }
 0x66e   :  { %v5996_v60 = vpop.f32.mrb[94].mxu1  ;;  %1895 = vrot.lane.b32.xlu0 %v7661_v24, %s6660_s28  ;;  %v1612_v14 = vmul.f32 2.0, %v5964_v8  ;;  %v1585_v52 = vpop.f32.mrb[63].mxu0  ;;  %v1627_v53 = vsub.f32 %v1611_v42, %v7547_v12  ;;  %v6356_v12 = vld [vmem:[%s9444_s4 + $0x38] sm:$0xff]  }
 0x66f   :  { %v1741_v49 = vpack.c.bf16 %v5996_v60, %v5995_v2  ;;  %v1610_v17 = vmul.f32 2.0, %v1585_v52  ;;  %v1722_v1 = vpop.f32.mrb[95].mxu1  ;;  %6008 = vmatpush3.bf16.msra.mxu0 %v1739_v32  ;;  %v1625_v51 = vsub.f32 %v1609_v10, %v7524_v39  ;;  %v9520_v39 = vmov 0  }
 0x670   :  { %v1628_v25 = vsub.f32 %v1612_v14, %v7536_v55  ;;  %v1740_v36 = vpack.c.bf16 %v1722_v1, %v1719_v7  ;;  %2120 = vmatprep.subr.bf16.mxu1 %v9520_v39  ;;  %v6355_v55 = vld [vmem:[%s9444_s4 + $0x30] sm:$0xff]  }
 0x671   :  { %v1626_v33 = vsub.f32 %v1610_v17, %v7530_v59  ;;  %1941 = vrot.lane.b32.xlu1 %v7753_v63, %s6662_s27  ;;  %v6349_v59 = vld [vmem:[%s9444_s4] sm:$0xff]  }
 0x672   :  { %6009 = vmatprep.subr.bf16.mxu0 %v1740_v36  ;;  %1943 = vrot.lane.b32.xlu0 %v1738_v56, %s6662_s27  ;;  %v1636_v24 = vpack.c.bf16 %v1628_v25, %v1627_v53 }
 0x673   :  { %6010 = vmatpush3.bf16.msra.mxu0 %v1740_v36  ;;  %v1635_v23 = vpack.c.bf16 %v1626_v33, %v1625_v51  ;;  %2121 = vmatpush1.bf16.msra.mxu1 %v6349_v59 }
 0x674   :  { %6011 = vmatprep.subr.bf16.mxu0 %v1741_v49  ;;  %2122 = vmatprep.subr.bf16.mxu1 %v9520_v39 }
 0x675   :  { %1919 = vrot.lane.b32.xlu1 %v1633_v6, %s6661_s17 }
 0x676   :  { %1921 = vrot.lane.b32.xlu0 %v1634_v0, %s6661_s17 }
 0x677   :  { %6012 = vmatpush3.bf16.msra.mxu0 %v1741_v49 }
 0x679   :  { %1897 = vrot.lane.b32.xlu1 %v7654_v26, %s6660_s28  ;;  %v6353_v26 = vld [vmem:[%s9444_s4 + $0x20] sm:$0xff]  }
 0x67a   :  { %6014 = vmatmul.mubr.bf16.vlgmr.msra.gmra.mrb[64].mxu0 %v7700_v15  ;;  %1899 = vrot.lane.b32.xlu0 %v7685_v34, %s6660_s28  ;;  %v6350_v15 = vld [vmem:[%s9444_s4 + $0x8] sm:$0xff]   ;;  %v6352_v34 = vld [vmem:[%s9444_s4 + $0x18] sm:$0xff]  }
 0x67b   :  { %6017 = vmatprep.mubr.bf16.mxu0 %v7707_v3  ;;  %v6351_v3 = vld [vmem:[%s9444_s4 + $0x10] sm:$0xff]   ;;  %2123 = vmatpush1.bf16.msra.mxu1 %v6350_v15 }
 0x67c   :  { %2124 = vmatprep.subr.bf16.mxu1 %v9520_v39 }
 0x67d   :  { %1945 = vrot.lane.b32.xlu1 %v1739_v32, %s6662_s27 }
 0x67e   :  { %1947 = vrot.lane.b32.xlu0 %v1740_v36, %s6662_s27 }
 0x67f   :  { %2125 = vmatpush1.bf16.msra.mxu1 %v6351_v3 }
 0x680   :  { %2126 = vmatprep.subr.bf16.mxu1 %v9520_v39 }
 0x681   :  { %1923 = vrot.lane.b32.xlu1 %v1635_v23, %s6661_s17 }
 0x682   :  { %6018 = vmatmul.mubr.bf16.gmra.mrb[68].mxu0 %v7714_v28  ;;  %1925 = vrot.lane.b32.xlu0 %v1636_v24, %s6661_s17  ;;  %v6357_v28 = vld [vmem:[%s9444_s4 + $0x40] sm:$0xff]  }
 0x683   :  { %6021 = vmatprep.mubr.bf16.mxu0 %v7721_v40  ;;  %2127 = vmatpush1.bf16.msra.mxu1 %v6352_v34  ;;  %v6358_v40 = vld [vmem:[%s9444_s4 + $0x48] sm:$0xff]  }
 0x684   :  { %2128 = vmatprep.subr.bf16.mxu1 %v9520_v39 }
 0x685   :  { %1901 = vrot.lane.b32.xlu1 %v7678_v22, %s6660_s28  ;;  %v6354_v22 = vld [vmem:[%s9444_s4 + $0x28] sm:$0xff]  }
 0x687   :  { %2129 = vmatpush1.bf16.msra.mxu1 %v6353_v26 }
 0x688   :  { %2130 = vmatprep.subr.bf16.mxu1 %v9520_v39 }
 0x689   :  { %1949 = vrot.lane.b32.xlu1 %v1741_v49, %s6662_s27 }
 0x68a   :  { %6022 = vmatmul.mubr.bf16.gmra.mrb[72].mxu0 %v7728_v41  ;;  %v5150_v41 = vld [vmem:[%s9445_s6] ss:$0 sm:$0xff] }
 0x68b   :  { %6025 = vmatprep.mubr.bf16.mxu0 %v7735_v62  ;;  %2131 = vmatpush1.bf16.msra.mxu1 %v6354_v22 }
 0x68c   :  { %2132 = vmatprep.subr.bf16.mxu1 %v9520_v39  ;;  %2303 = vrot.lane.b32.xlu0 %v5150_v41, %s6661_s17 }
 0x68f   :  { %2133 = vmatpush1.bf16.msra.mxu1 %v6355_v55 }
 0x690   :  { %2134 = vmatprep.subr.bf16.mxu1 %v9520_v39 }
 0x692   :  { %6026 = vmatmul.mubr.bf16.gmra.mrb[76].mxu0 %v7742_v48  ;;  %v1888_v48 = vpop.permute.xlu0 %1887 }
 0x693   :  { %2135 = vmatpush1.bf16.msra.mxu1 %v6356_v12  ;;  %v1953_v58 = vsel %vm123_vm0, %v7409_v61, %v1888_v48 }
 0x694   :  { %2136 = vmatprep.subr.bf16.mxu1 %v9520_v39 }
 0x697   :  { %2137 = vmatpush1.bf16.msra.mxu1 %v6357_v28 }
 0x698   :  { %2138 = vmatprep.subr.bf16.mxu1 %v9520_v39 }
 0x69b   :  { %2139 = vmatpush1.bf16.msra.mxu1 %v6358_v40 }
 0x6cc   :  { %v1936_v43 = vpop.permute.xlu0 %1935 }
 0x6cf   :  { %v1912_v62 = vpop.permute.xlu1 %1911 }
 0x6d0   :  { %v1976_v42 = vsel %vm809_vm1, %v1953_v58, %v1912_v62  ;;  %v1914_v9 = vpop.permute.xlu0 %1913 }
 0x6d3   :  { %v1890_v46 = vpop.permute.xlu1 %1889 }
 0x6d4   :  { %v1892_v53 = vpop.permute.xlu0 %1891  ;;  %v1956_v25 = vsel %vm123_vm0, %v7422_v45, %v1890_v46 }
 0x6d5   :  { %v1978_v15 = vsel %vm809_vm1, %v1956_v25, %v1914_v9  ;;  %v1959_v40 = vsel %vm123_vm0, %v7453_v50, %v1892_v53  ;;  %v9656_v50 = vld [vmem:[#allocation55_spill] sm:$0xff] }
 0x6d8   :  { %v1940_v45 = vpop.permute.xlu0 %1939 }
 0x74d   :  { %v6015_v63 = vpop.f32.mrb[64].mxu0 }
 0x74e   :  { %v1841_v44 = vmul.f32 2.0, %v6015_v63  ;;  %v1776_v20 = vpop.f32.mrb[65].mxu0 }
 0x74f   :  { %v1839_v32 = vmul.f32 2.0, %v1776_v20  ;;  %v6016_v31 = vpop.f32.mrb[66].mxu0 }
 0x750   :  { %v1857_v57 = vsub.f32 %v1841_v44, %v7605_v13  ;;  %v1842_v47 = vmul.f32 2.0, %v6016_v31  ;;  %v1779_v56 = vpop.f32.mrb[67].mxu0  ;;  %v1938_v13 = vpop.permute.xlu1 %1937 }
 0x751   :  { %v1855_v18 = vsub.f32 %v1839_v32, %v7607_v11  ;;  %v1840_v30 = vmul.f32 2.0, %v1779_v56  ;;  %v1993_v11 = vsel %vm1991_vm2, %v1976_v42, %v1936_v43  ;;  %v1996_v34 = vsel %vm1991_vm2, %v1978_v15, %v1938_v13  ;;  %v1918_v43 = vpop.permute.xlu0 %1917  ;;  %v9663_v15 = vld [vmem:[#allocation54_spill] sm:$0xff] }
 0x752   :  { %v1858_v0 = vsub.f32 %v1842_v47, %v7609_v38 }
 0x753   :  { %v1856_v6 = vsub.f32 %v1840_v30, %v7615_v35 }
 0x754   :  { %v1872_v2 = vpack.c.bf16 %v1858_v0, %v1857_v57  ;;  %v1916_v51 = vpop.permute.xlu1 %1915  ;;  %v9658_v0 = vld [vmem:[#allocation42_spill] sm:$0xff] }
 0x755   :  { %v1871_v10 = vpack.c.bf16 %v1856_v6, %v1855_v18  ;;  %v6019_v7 = vpop.f32.mrb[68].mxu0  ;;  %v1980_v62 = vsel %vm809_vm1, %v1959_v40, %v1916_v51  ;;  %v9657_v18 = vld [vmem:[#allocation56_spill] sm:$0xff]  ;;  %v9659_v6 = vld [vmem:[#allocation57_spill] sm:$0xff] }
 0x756   :  { %v1845_v8 = vmul.f32 2.0, %v6019_v7  ;;  %v1792_v60 = vpop.f32.mrb[69].mxu0  ;;  %v1999_v31 = vsel %vm1991_vm2, %v1980_v62, %v1940_v45  ;;  %v9662_v51 = vld [vmem:[#allocation53_spill] sm:$0xff] }
 0x757   :  { %v1843_v14 = vmul.f32 2.0, %v1792_v60  ;;  %v6020_v52 = vpop.f32.mrb[70].mxu0  ;;  %5142 = vmatprep.mubr.msk.bf16.mxu1 %vm123_vm0, %v1871_v10  ;;  %v1896_v10 = vpop.permute.xlu0 %1895 }
 0x758   :  { %v1861_v61 = vsub.f32 %v1845_v8, %v7620_v54  ;;  %v1846_v38 = vmul.f32 2.0, %v6020_v52  ;;  %v1795_v35 = vpop.f32.mrb[71].mxu0  ;;  %2153 = vmatmul.mubr.bf16.vlgmr.msra.gmra.mrb[96].mxu1 %v1993_v11  ;;  %v1894_v12 = vpop.permute.xlu1 %1893  ;;  %v9660_v8 = vld [vmem:[#allocation47_spill] sm:$0xff] }
 0x759   :  { %v1859_v49 = vsub.f32 %v1843_v14, %v7624_v27  ;;  %v1844_v17 = vmul.f32 2.0, %v1795_v35  ;;  %5143 = vmatprep.mubr.msk.bf16.mxu1 %vm123_vm0, %v1872_v2  ;;  %v1962_v58 = vsel %vm123_vm0, %v9658_v0, %v1894_v12  ;;  %v1965_v60 = vsel %vm123_vm0, %v9660_v8, %v1896_v10 }
 0x75a   :  { %v1862_v1 = vsub.f32 %v1846_v38, %v7626_v37 }
 0x75b   :  { %v1860_v36 = vsub.f32 %v1844_v17, %v7632_v29  ;;  %v1944_v11 = vpop.permute.xlu0 %1943 }
 0x75c   :  { %v1874_v33 = vpack.c.bf16 %v1862_v1, %v1861_v61  ;;  %v1942_v46 = vpop.permute.xlu1 %1941 }
 0x75d   :  { %v1873_v24 = vpack.c.bf16 %v1860_v36, %v1859_v49  ;;  %v6023_v54 = vpop.f32.mrb[72].mxu0  ;;  %v9661_v49 = vld [vmem:[#allocation49_spill] sm:$0xff] }
 0x75e   :  { %v1849_v23 = vmul.f32 2.0, %v6023_v54  ;;  %v1808_v59 = vpop.f32.mrb[73].mxu0 }
 0x75f   :  { %v1847_v27 = vmul.f32 2.0, %v1808_v59  ;;  %v6024_v3 = vpop.f32.mrb[74].mxu0  ;;  %v1922_v38 = vpop.permute.xlu0 %1921 }
 0x760   :  { %v1865_v37 = vsub.f32 %v1849_v23, %v7644_v19  ;;  %v1850_v26 = vmul.f32 2.0, %v6024_v3  ;;  %v1811_v22 = vpop.f32.mrb[75].mxu0  ;;  %2161 = vmatmul.mubr.bf16.gmra.mrb[100].mxu1 %v1996_v34  ;;  %v1920_v7 = vpop.permute.xlu1 %1919 }
 0x761   :  { %v1863_v29 = vsub.f32 %v1847_v27, %v7648_v16  ;;  %v1848_v55 = vmul.f32 2.0, %v1811_v22  ;;  %5144 = vmatprep.mubr.msk.bf16.mxu1 %vm123_vm0, %v1873_v24  ;;  %v1984_v14 = vsel %vm809_vm1, %v1965_v60, %v1920_v7  ;;  %v9664_v7 = vld [vmem:[#allocation19_spill] sm:$0xff]  ;;  %v9665_v60 = vld [vmem:[#allocation21_spill] sm:$0xff] }
 0x762   :  { %v1866_v28 = vsub.f32 %v1850_v26, %v7650_v4  ;;  %v2005_v61 = vsel %vm1991_vm2, %v1984_v14, %v1944_v11 }
 0x763   :  { %v1864_v41 = vsub.f32 %v1848_v55, %v7656_v5  ;;  %v1900_v25 = vpop.permute.xlu0 %1899 }
 0x764   :  { %v1876_v19 = vpack.c.bf16 %v1866_v28, %v1865_v37  ;;  %v1898_v52 = vpop.permute.xlu1 %1897 }
 0x765   :  { %v1875_v48 = vpack.c.bf16 %v1864_v41, %v1863_v29  ;;  %v6027_v63 = vpop.f32.mrb[76].mxu0  ;;  %v1968_v17 = vsel %vm123_vm0, %v9661_v49, %v1898_v52 }
 0x766   :  { %v1853_v44 = vmul.f32 2.0, %v6027_v63  ;;  %v1824_v20 = vpop.f32.mrb[77].mxu0  ;;  %v1986_v1 = vsel %vm809_vm1, %v1968_v17, %v1922_v38  ;;  %v9667_v17 = vld [vmem:[#allocation20_spill] sm:$0xff] }
 0x767   :  { %v1851_v16 = vmul.f32 2.0, %v1824_v20  ;;  %v6028_v32 = vpop.f32.mrb[78].mxu0  ;;  %v1948_v54 = vpop.permute.xlu0 %1947 }
 0x768   :  { %v1869_v4 = vsub.f32 %v1853_v44, %v7668_v21  ;;  %v1854_v57 = vmul.f32 2.0, %v6028_v32  ;;  %v1827_v47 = vpop.f32.mrb[79].mxu0  ;;  %2169 = vmatmul.mubr.bf16.gmra.mrb[104].mxu1 %v1999_v31  ;;  %v1982_v21 = vsel %vm809_vm1, %v1962_v58, %v1918_v43  ;;  %v1946_v35 = vpop.permute.xlu1 %1945 }
 0x769   :  { %v1867_v5 = vsub.f32 %v1851_v16, %v9656_v50  ;;  %v1852_v56 = vmul.f32 2.0, %v1827_v47  ;;  %5145 = vmatprep.mubr.msk.bf16.mxu1 %vm123_vm0, %v1874_v33  ;;  %v2002_v13 = vsel %vm1991_vm2, %v1982_v21, %v1942_v46  ;;  %v2008_v53 = vsel %vm1991_vm2, %v1986_v1, %v1946_v35 }
 0x76a   :  { %v1870_v30 = vsub.f32 %v1854_v57, %v9657_v18  ;;  %v1971_v33 = vsel %vm123_vm0, %v9662_v51, %v1900_v25 }
 0x76b   :  { %v1868_v42 = vsub.f32 %v1852_v56, %v9659_v6  ;;  %v1926_v34 = vpop.permute.xlu0 %1925 }
 0x76c   :  { %v1878_v2 = vpack.c.bf16 %v1870_v30, %v1869_v4  ;;  %v1924_v36 = vpop.permute.xlu1 %1923 }
 0x76d   :  { %v1877_v9 = vpack.c.bf16 %v1868_v42, %v1867_v5  ;;  %v1988_v24 = vsel %vm809_vm1, %v1971_v33, %v1924_v36  ;;  %v9668_v33 = vld [vmem:[#allocation23_spill] sm:$0xff] }
 0x76e   :  { %v2011_v59 = vsel %vm1991_vm2, %v1988_v24, %v1948_v54 }
 0x770   :  { %2177 = vmatmul.mubr.bf16.gmra.mrb[108].mxu1 %v2002_v13  ;;  %v1902_v23 = vpop.permute.xlu1 %1901 }
 0x771   :  { %5146 = vmatprep.mubr.msk.bf16.mxu1 %vm123_vm0, %v1875_v48  ;;  %v1974_v27 = vsel %vm123_vm0, %v9663_v15, %v1902_v23 }
 0x772   :  { %v1990_v37 = vsel %vm809_vm1, %v1974_v27, %v1926_v34 }
 0x774   :  { %v1950_v3 = vpop.permute.xlu1 %1949 }
 0x775   :  { %v2014_v26 = vsel %vm1991_vm2, %v1990_v37, %v1950_v3 }
 0x778   :  { %2185 = vmatmul.mubr.bf16.gmra.mrb[112].mxu1 %v2005_v61  ;;  %v9666_v61 = vld [vmem:[#allocation18_spill] sm:$0xff] }
 0x779   :  { %5147 = vmatprep.mubr.msk.bf16.mxu1 %vm123_vm0, %v1876_v19 }
 0x780   :  { %2193 = vmatmul.mubr.bf16.gmra.mrb[116].mxu1 %v2008_v53 }
 0x781   :  { %5148 = vmatprep.mubr.msk.bf16.mxu1 %vm123_vm0, %v1877_v9  ;;  %v7920_v9 = vpop.permute.xlu0 %2303 }
 0x788   :  { %2201 = vmatmul.mubr.bf16.gmra.mrb[120].mxu1 %v2011_v59  ;;  %v9669_v59 = vld [vmem:[#allocation25_spill] sm:$0xff] }
 0x789   :  { %5149 = vmatprep.mubr.msk.bf16.mxu1 %vm123_vm0, %v1878_v2 }
 0x790   :  { %2209 = vmatmul.mubr.bf16.gmra.mrb[124].mxu1 %v2014_v26  ;;  %v9670_v26 = vld [vmem:[#allocation22_spill] sm:$0xff] }
 0x82b   :  { %v2154_v22 = vpop.f32.mrb[96].mxu1 }
 0x82c   :  { %2233 = vrot.lane.b32.xlu0 %v2154_v22, %s6661_s17  ;;  %v2156_v45 = vpop.f32.mrb[97].mxu1 }
 0x82d   :  { %v2157_v29 = vpop.f32.mrb[98].mxu1 }
 0x82e   :  { %v2159_v55 = vpop.f32.mrb[99].mxu1  ;;  %2235 = vrot.lane.b32.xlu1 %v2157_v29, %s6661_s17 }
 0x82f   :  { %v9671_v55 = vld [vmem:[#allocation24_spill] sm:$0xff] }
 0x833   :  { %v2162_v12 = vpop.f32.mrb[100].mxu1 }
 0x834   :  { %v2164_v28 = vpop.f32.mrb[101].mxu1  ;;  %2237 = vrot.lane.b32.xlu1 %v2162_v12, %s6661_s17 }
 0x835   :  { %v2165_v40 = vpop.f32.mrb[102].mxu1 }
 0x836   :  { %2239 = vrot.lane.b32.xlu0 %v2165_v40, %s6661_s17  ;;  %v2167_v41 = vpop.f32.mrb[103].mxu1 }
 0x83b   :  { %v2170_v62 = vpop.f32.mrb[104].mxu1 }
 0x83c   :  { %v2172_v19 = vpop.f32.mrb[105].mxu1  ;;  %2241 = vrot.lane.b32.xlu1 %v2170_v62, %s6661_s17 }
 0x83d   :  { %v2173_v48 = vpop.f32.mrb[106].mxu1  ;;  %v9672_v19 = vld [vmem:[#allocation27_spill] sm:$0xff] }
 0x83e   :  { %2243 = vrot.lane.b32.xlu0 %v2173_v48, %s6661_s17  ;;  %v2175_v63 = vpop.f32.mrb[107].mxu1 }
 0x843   :  { %v2178_v44 = vpop.f32.mrb[108].mxu1 }
 0x844   :  { %v2180_v20 = vpop.f32.mrb[109].mxu1  ;;  %2245 = vrot.lane.b32.xlu1 %v2178_v44, %s6661_s17 }
 0x845   :  { %v2181_v43 = vpop.f32.mrb[110].mxu1  ;;  %v9673_v20 = vld [vmem:[#allocation29_spill] sm:$0xff] }
 0x846   :  { %2247 = vrot.lane.b32.xlu0 %v2181_v43, %s6661_s17  ;;  %v2183_v16 = vpop.f32.mrb[111].mxu1 }
 0x84b   :  { %v2186_v32 = vpop.f32.mrb[112].mxu1 }
 0x84c   :  { %v2188_v31 = vpop.f32.mrb[113].mxu1  ;;  %2249 = vrot.lane.b32.xlu1 %v2186_v32, %s6661_s17 }
 0x84d   :  { %v2189_v46 = vpop.f32.mrb[114].mxu1 }
 0x84e   :  { %2251 = vrot.lane.b32.xlu0 %v2189_v46, %s6661_s17  ;;  %v2191_v4 = vpop.f32.mrb[115].mxu1 }
 0x84f   :  { %v9674_v4 = vld [vmem:[#allocation26_spill] sm:$0xff] }
 0x853   :  { %v2194_v57 = vpop.f32.mrb[116].mxu1 }
 0x854   :  { %v2196_v47 = vpop.f32.mrb[117].mxu1  ;;  %2253 = vrot.lane.b32.xlu1 %v2194_v57, %s6661_s17 }
 0x855   :  { %v2197_v50 = vpop.f32.mrb[118].mxu1 }
 0x856   :  { %2255 = vrot.lane.b32.xlu0 %v2197_v50, %s6661_s17  ;;  %v2199_v5 = vpop.f32.mrb[119].mxu1 }
 0x857   :  { %v9675_v5 = vld [vmem:[#allocation28_spill] sm:$0xff] }
 0x85b   :  { %v2202_v56 = vpop.f32.mrb[120].mxu1 }
 0x85c   :  { %2257 = vrot.lane.b32.xlu1 %v2202_v56, %s6661_s17  ;;  %v2204_v18 = vpop.f32.mrb[121].mxu1 }
 0x85d   :  { %v2205_v30 = vpop.f32.mrb[122].mxu1 }
 0x85e   :  { %2259 = vrot.lane.b32.xlu0 %v2205_v30, %s6661_s17  ;;  %v2207_v0 = vpop.f32.mrb[123].mxu1 }
 0x863   :  { %v2210_v58 = vpop.f32.mrb[124].mxu1 }
 0x864   :  { %2261 = vrot.lane.b32.xlu1 %v2210_v58, %s6661_s17  ;;  %v2212_v6 = vpop.f32.mrb[125].mxu1 }
 0x865   :  { %v2213_v42 = vpop.f32.mrb[126].mxu1  ;;  %v9676_v6 = vld [vmem:[#allocation31_spill] sm:$0xff] }
 0x866   :  { %2263 = vrot.lane.b32.xlu0 %v2213_v42, %s6661_s17  ;;  %v2215_v2 = vpop.f32.mrb[127].mxu1 }
 0x89e   :  { %v2234_v10 = vpop.permute.xlu0 %2233 }
 0x89f   :  { %v2281_v21 = vadd.f32 %v2234_v10, %v9664_v7  ;;  %v9677_v7 = vld [vmem:[#allocation33_spill] sm:$0xff] }
 0x8a0   :  { %v2236_v13 = vpop.permute.xlu1 %2235 }
 0x8a1   :  { %v2306_v8 = vadd.f32 %v7920_v9, %v2281_v21  ;;  %v2282_v11 = vadd.f32 %v2236_v13, %v9665_v60 }
 0x8a3   :  { %6469 = vtanh.f32 %v2306_v8  ;;  %v2307_v14 = vadd.f32 %v7920_v9, %v2282_v11 }
 0x8a5   :  { %6471 = vtanh.f32 %v2307_v14  ;;  %v9678_v14 = vld [vmem:[#allocation30_spill] sm:$0xff] }
 0x8a6   :  { %v2238_v52 = vpop.permute.xlu1 %2237 }
 0x8a7   :  { %v2283_v38 = vadd.f32 %v2238_v52, %v9666_v61 }
 0x8a8   :  { %v2240_v35 = vpop.permute.xlu0 %2239 }
 0x8a9   :  { %v2308_v49 = vadd.f32 %v7920_v9, %v2283_v38  ;;  %v2284_v1 = vadd.f32 %v2240_v35, %v9667_v17  ;;  %v9679_v35 = vld [vmem:[#allocation32_spill] sm:$0xff] }
 0x8ab   :  { %6473 = vtanh.f32 %v2308_v49  ;;  %v2309_v53 = vadd.f32 %v7920_v9, %v2284_v1 }
 0x8ad   :  { %v6470_v25 = vpop.eup %6469  ;;  %6475 = vtanh.f32 %v2309_v53 }
 0x8ae   :  { %2386 = vrot.lane.b32.xlu1 %v6470_v25, %s6662_s27  ;;  %v2242_v36 = vpop.permute.xlu1 %2241 }
 0x8af   :  { %v6472_v51 = vpop.eup %6471  ;;  %v2285_v24 = vadd.f32 %v2242_v36, %v9668_v33  ;;  %v5153_v33 = vld [vmem:[%s9439_s1 + $0x90] sm:$0xff] }
 0x8b0   :  { %v2244_v54 = vpop.permute.xlu0 %2243  ;;  %2388 = vrot.lane.b32.xlu0 %v6472_v51, %s6662_s27  ;;  %v5151_v51 = vld [vmem:[%s9439_s1 + $0x80] sm:$0xff] }
 0x8b1   :  { %v2310_v23 = vadd.f32 %v7920_v9, %v2285_v24  ;;  %v2286_v15 = vadd.f32 %v2244_v54, %v9669_v59  ;;  %v5154_v24 = vld [vmem:[%s9439_s1 + $0x98] sm:$0xff]  ;;  %v5155_v54 = vld [vmem:[%s9439_s1 + $0xa0] sm:$0xff]  ;;  %v5157_v59 = vld [vmem:[%s9439_s1 + $0xb0] sm:$0xff] }
 0x8b3   :  { %6477 = vtanh.f32 %v2310_v23  ;;  %v2311_v27 = vadd.f32 %v7920_v9, %v2286_v15  ;;  %v5156_v23 = vld [vmem:[%s9439_s1 + $0xa8] sm:$0xff]  ;;  %v5158_v15 = vld [vmem:[%s9439_s1 + $0xb8] sm:$0xff] }
 0x8b5   :  { %v6474_v3 = vpop.eup %6473  ;;  %6479 = vtanh.f32 %v2311_v27  ;;  %v5159_v27 = vld [vmem:[%s9439_s1 + $0xc0] sm:$0xff] }
 0x8b6   :  { %2390 = vrot.lane.b32.xlu1 %v6474_v3, %s6662_s27  ;;  %v2246_v34 = vpop.permute.xlu1 %2245  ;;  %v5160_v3 = vld [vmem:[%s9439_s1 + $0xc8] sm:$0xff] }
 0x8b7   :  { %v6476_v37 = vpop.eup %6475  ;;  %v2287_v22 = vadd.f32 %v2246_v34, %v9670_v26  ;;  %v5161_v34 = vld [vmem:[%s9439_s1 + $0xd0] sm:$0xff]  ;;  %v5163_v26 = vld [vmem:[%s9439_s1 + $0xe0] sm:$0xff] }
 0x8b8   :  { %v2248_v45 = vpop.permute.xlu0 %2247  ;;  %2392 = vrot.lane.b32.xlu0 %v6476_v37, %s6662_s27  ;;  %v5162_v37 = vld [vmem:[%s9439_s1 + $0xd8] sm:$0xff] }
 0x8b9   :  { %v2312_v29 = vadd.f32 %v7920_v9, %v2287_v22  ;;  %v2288_v12 = vadd.f32 %v2248_v45, %v9671_v55  ;;  %v5164_v22 = vld [vmem:[%s9439_s1 + $0xe8] sm:$0xff] }
 0x8ba   :  { %v9680_v45 = vld [vmem:[#allocation35_spill] sm:$0xff] }
 0x8bb   :  { %6481 = vtanh.f32 %v2312_v29  ;;  %v2313_v28 = vadd.f32 %v7920_v9, %v2288_v12  ;;  %v2354_v29 = vsub.f32 1.0, %v9680_v45  ;;  %v9681_v12 = vld [vmem:[#allocation3_spill] sm:$0xff] }
 0x8bd   :  { %v6478_v40 = vpop.eup %6477  ;;  %6483 = vtanh.f32 %v2313_v28  ;;  %v2338_v28 = vmul.f32 %v9680_v45, %v9681_v12  ;;  %v9699_v12 = vld [vmem:[#allocation10_spill] sm:$0xff] }
 0x8be   :  { %2394 = vrot.lane.b32.xlu1 %v6478_v40, %s6662_s27  ;;  %v2250_v41 = vpop.permute.xlu1 %2249 }
 0x8bf   :  { %v6480_v62 = vpop.eup %6479  ;;  %v2289_v48 = vadd.f32 %v2250_v41, %v9672_v19  ;;  %v9682_v41 = vld [vmem:[#allocation37_spill] sm:$0xff] }
 0x8c0   :  { %v2252_v63 = vpop.permute.xlu0 %2251  ;;  %2396 = vrot.lane.b32.xlu0 %v6480_v62, %s6662_s27  ;;  %v2355_v62 = vsub.f32 1.0, %v9682_v41 }
 0x8c1   :  { %v2314_v44 = vadd.f32 %v7920_v9, %v2289_v48  ;;  %v2290_v43 = vadd.f32 %v2252_v63, %v9673_v20  ;;  %v9683_v63 = vld [vmem:[#allocation5_spill] sm:$0xff] }
 0x8c3   :  { %6485 = vtanh.f32 %v2314_v44  ;;  %v2315_v16 = vadd.f32 %v7920_v9, %v2290_v43  ;;  %v2339_v44 = vmul.f32 %v9682_v41, %v9683_v63  ;;  %v9701_v63 = vld [vmem:[#allocation13_spill] sm:$0xff] }
 0x8c5   :  { %v6482_v32 = vpop.eup %6481  ;;  %6487 = vtanh.f32 %v2315_v16  ;;  %v9684_v16 = vld [vmem:[#allocation34_spill] sm:$0xff] }
 0x8c6   :  { %2398 = vrot.lane.b32.xlu1 %v6482_v32, %s6662_s27  ;;  %v2254_v31 = vpop.permute.xlu1 %2253  ;;  %v2356_v32 = vsub.f32 1.0, %v9684_v16 }
 0x8c7   :  { %v6484_v46 = vpop.eup %6483  ;;  %v2291_v57 = vadd.f32 %v2254_v31, %v9674_v4 }
 0x8c8   :  { %v2256_v47 = vpop.permute.xlu0 %2255  ;;  %2400 = vrot.lane.b32.xlu0 %v6484_v46, %s6662_s27  ;;  %v9685_v46 = vld [vmem:[#allocation2_spill] sm:$0xff] }
 0x8c9   :  { %v2316_v50 = vadd.f32 %v7920_v9, %v2291_v57  ;;  %v2292_v56 = vadd.f32 %v2256_v47, %v9675_v5  ;;  %v2340_v4 = vmul.f32 %v9684_v16, %v9685_v46  ;;  %v9686_v47 = vld [vmem:[#allocation36_spill] sm:$0xff] }
 0x8ca   :  { %v9703_v46 = vld [vmem:[#allocation12_spill] sm:$0xff] }
 0x8cb   :  { %6489 = vtanh.f32 %v2316_v50  ;;  %v2317_v18 = vadd.f32 %v7920_v9, %v2292_v56  ;;  %v2357_v50 = vsub.f32 1.0, %v9686_v47 }
 0x8cd   :  { %v6486_v30 = vpop.eup %6485  ;;  %6491 = vtanh.f32 %v2317_v18  ;;  %v9687_v18 = vld [vmem:[#allocation4_spill] sm:$0xff] }
 0x8ce   :  { %2402 = vrot.lane.b32.xlu1 %v6486_v30, %s6662_s27  ;;  %v2258_v0 = vpop.permute.xlu1 %2257  ;;  %v2341_v30 = vmul.f32 %v9686_v47, %v9687_v18  ;;  %v9705_v18 = vld [vmem:[#allocation15_spill] sm:$0xff] }
 0x8cf   :  { %v6488_v58 = vpop.eup %6487  ;;  %v2293_v42 = vadd.f32 %v2258_v0, %v9676_v6  ;;  %v9688_v6 = vld [vmem:[#allocation39_spill] sm:$0xff] }
 0x8d0   :  { %v2260_v2 = vpop.permute.xlu0 %2259  ;;  %2404 = vrot.lane.b32.xlu0 %v6488_v58, %s6662_s27 }
 0x8d1   :  { %v2318_v10 = vadd.f32 %v7920_v9, %v2293_v42  ;;  %v2294_v21 = vadd.f32 %v2260_v2, %v9677_v7  ;;  %v2358_v42 = vsub.f32 1.0, %v9688_v6 }
 0x8d3   :  { %6493 = vtanh.f32 %v2318_v10  ;;  %v2319_v13 = vadd.f32 %v7920_v9, %v2294_v21  ;;  %v9689_v10 = vld [vmem:[#allocation7_spill] sm:$0xff] }
 0x8d4   :  { %v2342_v7 = vmul.f32 %v9688_v6, %v9689_v10  ;;  %v9707_v10 = vld [vmem:[#allocation14_spill] sm:$0xff] }
 0x8d5   :  { %v6490_v8 = vpop.eup %6489  ;;  %6495 = vtanh.f32 %v2319_v13  ;;  %v9690_v13 = vld [vmem:[#allocation41_spill] sm:$0xff] }
 0x8d6   :  { %2406 = vrot.lane.b32.xlu1 %v6490_v8, %s6662_s27  ;;  %v2262_v60 = vpop.permute.xlu1 %2261  ;;  %v2359_v8 = vsub.f32 1.0, %v9690_v13 }
 0x8d7   :  { %v6492_v11 = vpop.eup %6491  ;;  %v2295_v52 = vadd.f32 %v2262_v60, %v9678_v14  ;;  %v9691_v14 = vld [vmem:[#allocation6_spill] sm:$0xff] }
 0x8d8   :  { %v2264_v61 = vpop.permute.xlu0 %2263  ;;  %2408 = vrot.lane.b32.xlu0 %v6492_v11, %s6662_s27 }
 0x8d9   :  { %v2320_v38 = vadd.f32 %v7920_v9, %v2295_v52  ;;  %v2296_v49 = vadd.f32 %v2264_v61, %v9679_v35  ;;  %v2343_v52 = vmul.f32 %v9690_v13, %v9691_v14  ;;  %v9692_v35 = vld [vmem:[#allocation38_spill] sm:$0xff]  ;;  %v9709_v14 = vld [vmem:[#allocation17_spill] sm:$0xff] }
 0x8db   :  { %6497 = vtanh.f32 %v2320_v38  ;;  %v2321_v17 = vadd.f32 %v7920_v9, %v2296_v49  ;;  %v5152_v9 = vld [vmem:[%s9439_s1 + $0x88] sm:$0xff]  ;;  %v2360_v49 = vsub.f32 1.0, %v9692_v35 }
 0x8dd   :  { %v6494_v1 = vpop.eup %6493  ;;  %6499 = vtanh.f32 %v2321_v17 }
 0x8de   :  { %2410 = vrot.lane.b32.xlu1 %v6494_v1, %s6662_s27  ;;  %v9693_v1 = vld [vmem:[#allocation9_spill] sm:$0xff] }
 0x8df   :  { %v6496_v53 = vpop.eup %6495 }
 0x8e0   :  { %2412 = vrot.lane.b32.xlu0 %v6496_v53, %s6662_s27  ;;  %v2344_v53 = vmul.f32 %v9692_v35, %v9693_v1 }
 0x8e5   :  { %v6498_v25 = vpop.eup %6497 }
 0x8e6   :  { %2414 = vrot.lane.b32.xlu1 %v6498_v25, %s6662_s27 }
 0x8e7   :  { %v6500_v36 = vpop.eup %6499 }
 0x8e8   :  { %2416 = vrot.lane.b32.xlu0 %v6500_v36, %s6662_s27  ;;  %v9694_v36 = vld [vmem:[#allocation40_spill] sm:$0xff] }
 0x8ea   :  { %2579 = vrot.lane.b32.xlu1 %v5151_v51, %s6660_s28  ;;  %v2361_v51 = vsub.f32 1.0, %v9694_v36 }
 0x8ec   :  { %2581 = vrot.lane.b32.xlu0 %v5152_v9, %s6660_s28 }
 0x8ee   :  { %2583 = vrot.lane.b32.xlu1 %v5153_v33, %s6660_s28 }
 0x8f0   :  { %2585 = vrot.lane.b32.xlu0 %v5154_v24, %s6660_s28  ;;  %v9695_v24 = vld [vmem:[#allocation8_spill] sm:$0xff] }
 0x8f2   :  { %2587 = vrot.lane.b32.xlu1 %v5155_v54, %s6660_s28  ;;  %v2345_v54 = vmul.f32 %v9694_v36, %v9695_v24 }
 0x8f4   :  { %2589 = vrot.lane.b32.xlu0 %v5156_v23, %s6660_s28 }
 0x8f6   :  { %2591 = vrot.lane.b32.xlu1 %v5157_v59, %s6660_s28 }
 0x8f8   :  { %2593 = vrot.lane.b32.xlu0 %v5158_v15, %s6660_s28  ;;  %v9696_v15 = vld [vmem:[#allocation44_spill] sm:$0xff] }
 0x8fa   :  { %2595 = vrot.lane.b32.xlu1 %v5159_v27, %s6660_s28  ;;  %v2362_v27 = vsub.f32 1.0, %v9696_v15 }
 0x8fc   :  { %2597 = vrot.lane.b32.xlu0 %v5160_v3, %s6660_s28 }
 0x8fe   :  { %2599 = vrot.lane.b32.xlu1 %v5161_v34, %s6660_s28  ;;  %v9697_v34 = vld [vmem:[#allocation11_spill] sm:$0xff] }
 0x900   :  { %2601 = vrot.lane.b32.xlu0 %v5162_v37, %s6660_s28  ;;  %v2346_v37 = vmul.f32 %v9696_v15, %v9697_v34 }
 0x902   :  { %2603 = vrot.lane.b32.xlu1 %v5163_v26, %s6660_s28 }
 0x904   :  { %2605 = vrot.lane.b32.xlu0 %v5164_v22, %s6660_s28  ;;  %v9698_v22 = vld [vmem:[#allocation46_spill] sm:$0xff] }
 0x905   :  { %v2363_v45 = vsub.f32 1.0, %v9698_v22 }
 0x920   :  { %v2387_v55 = vpop.permute.xlu1 %2386 }
 0x921   :  { %v2434_v40 = vmul.f32 %v2387_v55, %v2354_v29 }
 0x922   :  { %v2389_v19 = vpop.permute.xlu0 %2388 }
 0x923   :  { %v2450_v48 = vadd.f32 %v2434_v40, %v2338_v28  ;;  %v2435_v20 = vmul.f32 %v2389_v19, %v2355_v62  ;;  %v2347_v28 = vmul.f32 %v9698_v22, %v9699_v12  ;;  %v9700_v62 = vld [vmem:[#allocation43_spill] sm:$0xff] }
 0x924   :  { %v2364_v19 = vsub.f32 1.0, %v9700_v62 }
 0x925   :  { %v2451_v43 = vadd.f32 %v2435_v20, %v2339_v44  ;;  %2482 = vrot.lane.b32.xlu1 %v2450_v48, %s6662_s27  ;;  %v2348_v44 = vmul.f32 %v9700_v62, %v9701_v63 }
 0x927   :  { %2484 = vrot.lane.b32.xlu0 %v2451_v43, %s6662_s27  ;;  %v9702_v43 = vld [vmem:[#allocation45_spill] sm:$0xff] }
 0x928   :  { %v2391_v31 = vpop.permute.xlu1 %2390  ;;  %v2365_v16 = vsub.f32 1.0, %v9702_v43 }
 0x929   :  { %v2436_v57 = vmul.f32 %v2391_v31, %v2356_v32 }
 0x92a   :  { %v2393_v5 = vpop.permute.xlu0 %2392 }
 0x92b   :  { %v2452_v56 = vadd.f32 %v2436_v57, %v2340_v4  ;;  %v2437_v0 = vmul.f32 %v2393_v5, %v2357_v50  ;;  %v2349_v4 = vmul.f32 %v9702_v43, %v9703_v46  ;;  %v9704_v50 = vld [vmem:[#allocation50_spill] sm:$0xff] }
 0x92c   :  { %v2366_v5 = vsub.f32 1.0, %v9704_v50 }
 0x92d   :  { %v2453_v58 = vadd.f32 %v2437_v0, %v2341_v30  ;;  %2486 = vrot.lane.b32.xlu1 %v2452_v56, %s6662_s27  ;;  %v2350_v30 = vmul.f32 %v9704_v50, %v9705_v18 }
 0x92f   :  { %2488 = vrot.lane.b32.xlu0 %v2453_v58, %s6662_s27  ;;  %v9706_v58 = vld [vmem:[#allocation52_spill] sm:$0xff] }
 0x930   :  { %v2395_v2 = vpop.permute.xlu1 %2394  ;;  %v2367_v6 = vsub.f32 1.0, %v9706_v58 }
 0x931   :  { %v2438_v21 = vmul.f32 %v2395_v2, %v2358_v42 }
 0x932   :  { %v2397_v60 = vpop.permute.xlu0 %2396 }
 0x933   :  { %v2454_v11 = vadd.f32 %v2438_v21, %v2342_v7  ;;  %v2439_v61 = vmul.f32 %v2397_v60, %v2359_v8  ;;  %v2351_v7 = vmul.f32 %v9706_v58, %v9707_v10  ;;  %v9708_v8 = vld [vmem:[#allocation48_spill] sm:$0xff] }
 0x934   :  { %v2368_v60 = vsub.f32 1.0, %v9708_v8 }
 0x935   :  { %v2455_v38 = vadd.f32 %v2439_v61, %v2343_v52  ;;  %2490 = vrot.lane.b32.xlu1 %v2454_v11, %s6662_s27  ;;  %v2352_v52 = vmul.f32 %v9708_v8, %v9709_v14 }
 0x937   :  { %2492 = vrot.lane.b32.xlu0 %v2455_v38, %s6662_s27  ;;  %v9710_v38 = vld [vmem:[#allocation51_spill] sm:$0xff] }
 0x938   :  { %v2399_v17 = vpop.permute.xlu1 %2398  ;;  %v2369_v35 = vsub.f32 1.0, %v9710_v38 }
 0x939   :  { %v2440_v25 = vmul.f32 %v2399_v17, %v2360_v49  ;;  %v8089_v17 = vld [vmem:[%s9440_s2] sm:$0xff]  }
 0x93a   :  { %v2401_v9 = vpop.permute.xlu0 %2400  ;;  %6045 = vmatprep.mubr.bf16.mxu0 %v8089_v17 }
 0x93b   :  { %v2456_v33 = vadd.f32 %v2440_v25, %v2344_v53  ;;  %v2441_v23 = vmul.f32 %v2401_v9, %v2361_v51  ;;  %v9711_v53 = vld [vmem:[#allocation16_spill] sm:$0xff] }
 0x93c   :  { %v2353_v25 = vmul.f32 %v9710_v38, %v9711_v53  ;;  %v5165_v9 = vld [vmem:[%s9439_s1 + $0xf0] sm:$0xff]  ;;  %v8314_v53 = vld [vmem:[%s9440_s2 + $0x8] sm:$0xff]  }
 0x93d   :  { %v2457_v59 = vadd.f32 %v2441_v23, %v2345_v54  ;;  %2494 = vrot.lane.b32.xlu1 %v2456_v33, %s6662_s27  ;;  %v5166_v33 = vld [vmem:[%s9439_s1 + $0xf8] sm:$0xff] }
 0x93f   :  { %2496 = vrot.lane.b32.xlu0 %v2457_v59, %s6662_s27 }
 0x940   :  { %v2403_v3 = vpop.permute.xlu1 %2402 }
 0x941   :  { %v2442_v26 = vmul.f32 %v2403_v3, %v2362_v27 }
 0x942   :  { %v2405_v29 = vpop.permute.xlu0 %2404 }
 0x943   :  { %v2458_v55 = vadd.f32 %v2442_v26, %v2346_v37  ;;  %v2443_v40 = vmul.f32 %v2405_v29, %v2363_v45 }
 0x945   :  { %v2459_v41 = vadd.f32 %v2443_v40, %v2347_v28  ;;  %2498 = vrot.lane.b32.xlu1 %v2458_v55, %s6662_s27 }
 0x947   :  { %2500 = vrot.lane.b32.xlu0 %v2459_v41, %s6662_s27 }
 0x948   :  { %v2407_v48 = vpop.permute.xlu1 %2406 }
 0x949   :  { %v2444_v20 = vmul.f32 %v2407_v48, %v2364_v19 }
 0x94a   :  { %v2409_v32 = vpop.permute.xlu0 %2408 }
 0x94b   :  { %v2460_v31 = vadd.f32 %v2444_v20, %v2348_v44  ;;  %v2445_v57 = vmul.f32 %v2409_v32, %v2365_v16 }
 0x94d   :  { %v2461_v47 = vadd.f32 %v2445_v57, %v2349_v4  ;;  %2502 = vrot.lane.b32.xlu1 %v2460_v31, %s6662_s27 }
 0x94f   :  { %2504 = vrot.lane.b32.xlu0 %v2461_v47, %s6662_s27 }
 0x950   :  { %v2411_v56 = vpop.permute.xlu1 %2410 }
 0x951   :  { %v2446_v0 = vmul.f32 %v2411_v56, %v2366_v5 }
 0x952   :  { %v2413_v42 = vpop.permute.xlu0 %2412 }
 0x953   :  { %v2462_v2 = vadd.f32 %v2446_v0, %v2350_v30  ;;  %v2447_v21 = vmul.f32 %v2413_v42, %v2367_v6 }
 0x955   :  { %v2463_v13 = vadd.f32 %v2447_v21, %v2351_v7  ;;  %2506 = vrot.lane.b32.xlu1 %v2462_v2, %s6662_s27 }
 0x957   :  { %2508 = vrot.lane.b32.xlu0 %v2463_v13, %s6662_s27 }
 0x958   :  { %v2415_v11 = vpop.permute.xlu1 %2414 }
 0x959   :  { %v2448_v61 = vmul.f32 %v2415_v11, %v2368_v60 }
 0x95a   :  { %v2417_v49 = vpop.permute.xlu0 %2416 }
 0x95b   :  { %v2464_v1 = vadd.f32 %v2448_v61, %v2352_v52  ;;  %v2449_v36 = vmul.f32 %v2417_v49, %v2369_v35 }
 0x95c   :  { %v8104_v24 = vpop.permute.xlu1 %2579 }
 0x95d   :  { %v2465_v51 = vadd.f32 %v2449_v36, %v2353_v25  ;;  %2510 = vrot.lane.b32.xlu1 %v2464_v1, %s6662_s27  ;;  %9712 = vst [vmem:[#allocation55_spill] sm:$0xff] %v8104_v24  ;;  %v8320_v25 = vld [vmem:[%s9440_s2 + $0x10] sm:$0xff]   ;;  %v8327_v36 = vld [vmem:[%s9440_s2 + $0x18] sm:$0xff]  }
 0x95e   :  { %v8106_v54 = vpop.permute.xlu0 %2581 }
 0x95f   :  { %2512 = vrot.lane.b32.xlu0 %v2465_v51, %s6662_s27  ;;  %9713 = vst [vmem:[#allocation56_spill] sm:$0xff] %v8106_v54  ;;  %v8332_v51 = vld [vmem:[%s9440_s2 + $0x20] sm:$0xff]  }
 0x960   :  { %v8108_v23 = vpop.permute.xlu1 %2583 }
 0x961   :  { %2607 = vrot.lane.b32.xlu1 %v5165_v9, %s6660_s28  ;;  %9714 = vst [vmem:[#allocation42_spill] sm:$0xff] %v8108_v23  ;;  %v8339_v9 = vld [vmem:[%s9440_s2 + $0x28] sm:$0xff]  }
 0x962   :  { %v8110_v59 = vpop.permute.xlu0 %2585 }
 0x963   :  { %2609 = vrot.lane.b32.xlu0 %v5166_v33, %s6660_s28  ;;  %9715 = vst [vmem:[#allocation57_spill] sm:$0xff] %v8110_v59  ;;  %v8344_v33 = vld [vmem:[%s9440_s2 + $0x30] sm:$0xff]  }
 0x964   :  { %v8112_v15 = vpop.permute.xlu1 %2587 }
 0x965   :  { %9716 = vst [vmem:[#allocation47_spill] sm:$0xff] %v8112_v15 }
 0x966   :  { %v8114_v27 = vpop.permute.xlu0 %2589 }
 0x967   :  { %9717 = vst [vmem:[#allocation49_spill] sm:$0xff] %v8114_v27 }
 0x968   :  { %v8116_v3 = vpop.permute.xlu1 %2591 }
 0x969   :  { %9718 = vst [vmem:[#allocation53_spill] sm:$0xff] %v8116_v3 }
 0x96a   :  { %v8118_v34 = vpop.permute.xlu0 %2593 }
 0x96b   :  { %9719 = vst [vmem:[#allocation54_spill] sm:$0xff] %v8118_v34 }
 0x96c   :  { %v8120_v37 = vpop.permute.xlu1 %2595 }
 0x96d   :  { %9720 = vst [vmem:[#allocation19_spill] sm:$0xff] %v8120_v37 }
 0x96e   :  { %v8122_v26 = vpop.permute.xlu0 %2597 }
 0x96f   :  { %9721 = vst [vmem:[#allocation21_spill] sm:$0xff] %v8122_v26 }
 0x970   :  { %v8124_v22 = vpop.permute.xlu1 %2599 }
 0x971   :  { %9722 = vst [vmem:[#allocation18_spill] sm:$0xff] %v8124_v22 }
 0x972   :  { %v8126_v45 = vpop.permute.xlu0 %2601 }
 0x973   :  { %9723 = vst [vmem:[#allocation20_spill] sm:$0xff] %v8126_v45 }
 0x974   :  { %v8128_v29 = vpop.permute.xlu1 %2603 }
 0x975   :  { %9724 = vst [vmem:[#allocation23_spill] sm:$0xff] %v8128_v29 }
 0x976   :  { %v8130_v55 = vpop.permute.xlu0 %2605 }
 0x977   :  { %9725 = vst [vmem:[#allocation25_spill] sm:$0xff] %v8130_v55 }
 0x997   :  { %v2483_v12 = vpop.permute.xlu1 %2482 }
 0x998   :  { %2530 = vst.msk [vmem:[%s9446_s7] sm:$0xff] %vm123_vm0, %v2483_v12  ;;  %v8138_v40 = vsel %vm123_vm0, %v2483_v12, %v8104_v24  ;;  %v8351_v12 = vld [vmem:[%s9440_s2 + $0x38] sm:$0xff]  }
 0x999   :  { %v2485_v28 = vpop.permute.xlu0 %2484 }
 0x99a   :  { %2531 = vst.msk [vmem:[%s9446_s7 + $0x8] sm:$0xff] %vm123_vm0, %v2485_v28  ;;  %v8146_v41 = vsel %vm123_vm0, %v2485_v28, %v8106_v54  ;;  %v8358_v28 = vld [vmem:[%s9440_s2 + $0x40] sm:$0xff]  }
 0x99b   :  { %v8150_v62 = vpack.c.bf16 %v8146_v41, %v8138_v40  ;;  %6109 = vmatprep.mubr.bf16.mxu1 %v8358_v28 }
 0x99d   :  { %6029 = vmatprep.subr.bf16.mxu0 %v8150_v62 }
 0x99e   :  { %6030 = vmatpush3.bf16.msra.mxu0 %v8150_v62 }
 0x99f   :  { %v2487_v19 = vpop.permute.xlu1 %2486 }
 0x9a0   :  { %2532 = vst.msk [vmem:[%s9446_s7 + $0x10] sm:$0xff] %vm123_vm0, %v2487_v19  ;;  %v8160_v63 = vsel %vm123_vm0, %v2487_v19, %v8108_v23 }
 0x9a1   :  { %v2489_v48 = vpop.permute.xlu0 %2488 }
 0x9a2   :  { %2533 = vst.msk [vmem:[%s9446_s7 + $0x18] sm:$0xff] %vm123_vm0, %v2489_v48  ;;  %v8168_v44 = vsel %vm123_vm0, %v2489_v48, %v8110_v59 }
 0x9a3   :  { %v8172_v20 = vpack.c.bf16 %v8168_v44, %v8160_v63 }
 0x9a5   :  { %6031 = vmatprep.subr.bf16.mxu0 %v8172_v20 }
 0x9a6   :  { %6032 = vmatpush3.bf16.msra.mxu0 %v8172_v20 }
 0x9a7   :  { %v2491_v43 = vpop.permute.xlu1 %2490 }
 0x9a8   :  { %2534 = vst.msk [vmem:[%s9446_s7 + $0x20] sm:$0xff] %vm123_vm0, %v2491_v43  ;;  %v8182_v32 = vsel %vm123_vm0, %v2491_v43, %v8112_v15 }
 0x9a9   :  { %v2493_v16 = vpop.permute.xlu0 %2492 }
 0x9aa   :  { %2535 = vst.msk [vmem:[%s9446_s7 + $0x28] sm:$0xff] %vm123_vm0, %v2493_v16  ;;  %v8190_v31 = vsel %vm123_vm0, %v2493_v16, %v8114_v27 }
 0x9ab   :  { %v8194_v46 = vpack.c.bf16 %v8190_v31, %v8182_v32 }
 0x9ad   :  { %6033 = vmatprep.subr.bf16.mxu0 %v8194_v46 }
 0x9ae   :  { %6034 = vmatpush3.bf16.msra.mxu0 %v8194_v46 }
 0x9af   :  { %v2495_v4 = vpop.permute.xlu1 %2494 }
 0x9b0   :  { %2536 = vst.msk [vmem:[%s9446_s7 + $0x30] sm:$0xff] %vm123_vm0, %v2495_v4  ;;  %v8204_v47 = vsel %vm123_vm0, %v2495_v4, %v8116_v3 }
 0x9b1   :  { %v2497_v57 = vpop.permute.xlu0 %2496 }
 0x9b2   :  { %2537 = vst.msk [vmem:[%s9446_s7 + $0x38] sm:$0xff] %vm123_vm0, %v2497_v57  ;;  %v8212_v50 = vsel %vm123_vm0, %v2497_v57, %v8118_v34 }
 0x9b3   :  { %v8216_v5 = vpack.c.bf16 %v8212_v50, %v8204_v47 }
 0x9b5   :  { %6035 = vmatprep.subr.bf16.mxu0 %v8216_v5 }
 0x9b6   :  { %6036 = vmatpush3.bf16.msra.mxu0 %v8216_v5 }
 0x9b7   :  { %v2499_v56 = vpop.permute.xlu1 %2498 }
 0x9b8   :  { %2538 = vst.msk [vmem:[%s9446_s7 + $0x40] sm:$0xff] %vm123_vm0, %v2499_v56  ;;  %v8226_v30 = vsel %vm123_vm0, %v2499_v56, %v8120_v37 }
 0x9b9   :  { %v2501_v18 = vpop.permute.xlu0 %2500 }
 0x9ba   :  { %2539 = vst.msk [vmem:[%s9446_s7 + $0x48] sm:$0xff] %vm123_vm0, %v2501_v18  ;;  %v8234_v0 = vsel %vm123_vm0, %v2501_v18, %v8122_v26 }
 0x9bb   :  { %v8238_v58 = vpack.c.bf16 %v8234_v0, %v8226_v30 }
 0x9bd   :  { %6037 = vmatprep.subr.bf16.mxu0 %v8238_v58 }
 0x9be   :  { %6038 = vmatpush3.bf16.msra.mxu0 %v8238_v58 }
 0x9bf   :  { %v2503_v6 = vpop.permute.xlu1 %2502 }
 0x9c0   :  { %2540 = vst.msk [vmem:[%s9446_s7 + $0x50] sm:$0xff] %vm123_vm0, %v2503_v6  ;;  %v8248_v2 = vsel %vm123_vm0, %v2503_v6, %v8124_v22  ;;  %v6380_v22 = vld [vmem:[%s9442_s3 + $0xb0] sm:$0xff]  }
 0x9c1   :  { %v2505_v42 = vpop.permute.xlu0 %2504 }
 0x9c2   :  { %2541 = vst.msk [vmem:[%s9446_s7 + $0x58] sm:$0xff] %vm123_vm0, %v2505_v42  ;;  %v8256_v10 = vsel %vm123_vm0, %v2505_v42, %v8126_v45 }
 0x9c3   :  { %v8260_v7 = vpack.c.bf16 %v8256_v10, %v8248_v2 }
 0x9c5   :  { %6039 = vmatprep.subr.bf16.mxu0 %v8260_v7 }
 0x9c6   :  { %6040 = vmatpush3.bf16.msra.mxu0 %v8260_v7 }
 0x9c7   :  { %v2507_v21 = vpop.permute.xlu1 %2506 }
 0x9c8   :  { %2542 = vst.msk [vmem:[%s9446_s7 + $0x60] sm:$0xff] %vm123_vm0, %v2507_v21  ;;  %v8270_v8 = vsel %vm123_vm0, %v2507_v21, %v8128_v29 }
 0x9c9   :  { %v2509_v13 = vpop.permute.xlu0 %2508 }
 0x9ca   :  { %2543 = vst.msk [vmem:[%s9446_s7 + $0x68] sm:$0xff] %vm123_vm0, %v2509_v13  ;;  %v8278_v60 = vsel %vm123_vm0, %v2509_v13, %v8130_v55 }
 0x9cb   :  { %v8282_v11 = vpack.c.bf16 %v8278_v60, %v8270_v8 }
 0x9cd   :  { %6041 = vmatprep.subr.bf16.mxu0 %v8282_v11 }
 0x9ce   :  { %6042 = vmatpush3.bf16.msra.mxu0 %v8282_v11 }
 0x9cf   :  { %v2511_v14 = vpop.permute.xlu1 %2510 }
 0x9d0   :  { %2544 = vst.msk [vmem:[%s9446_s7 + $0x70] sm:$0xff] %vm123_vm0, %v2511_v14 }
 0x9d1   :  { %v2513_v52 = vpop.permute.xlu0 %2512 }
 0x9d2   :  { %2545 = vst.msk [vmem:[%s9446_s7 + $0x78] sm:$0xff] %vm123_vm0, %v2513_v52 }
 0x9d3   :  { %v8294_v61 = vpop.permute.xlu1 %2607 }
 0x9d4   :  { %9726 = vst [vmem:[#allocation22_spill] sm:$0xff] %v8294_v61  ;;  %v8300_v35 = vsel %vm123_vm0, %v2511_v14, %v8294_v61 }
 0x9d5   :  { %v8296_v38 = vpop.permute.xlu0 %2609 }
 0x9d6   :  { %9727 = vst [vmem:[#allocation24_spill] sm:$0xff] %v8296_v38  ;;  %v8304_v49 = vsel %vm123_vm0, %v2513_v52, %v8296_v38 }
 0x9d7   :  { %v8308_v1 = vpack.c.bf16 %v8304_v49, %v8300_v35 }
 0x9d9   :  { %6043 = vmatprep.subr.bf16.mxu0 %v8308_v1 }
 0x9da   :  { %6044 = vmatpush3.bf16.msra.mxu0 %v8308_v1 }
 0x9dd   :  { %6046 = vmatmul.mubr.bf16.vlgmr.msra.gmra.mrb[80].mxu0 %v8314_v53 }
 0x9de   :  { %6049 = vmatprep.mubr.bf16.mxu0 %v8320_v25 }
 0x9e5   :  { %6050 = vmatmul.mubr.bf16.gmra.mrb[84].mxu0 %v8327_v36 }
 0x9e6   :  { %6053 = vmatprep.mubr.bf16.mxu0 %v8332_v51 }
 0x9ed   :  { %6054 = vmatmul.mubr.bf16.gmra.mrb[88].mxu0 %v8339_v9 }
 0x9ee   :  { %6057 = vmatprep.mubr.bf16.mxu0 %v8344_v33 }
 0x9f5   :  { %6058 = vmatmul.mubr.bf16.gmra.mrb[92].mxu0 %v8351_v12 }
 0x9f6   :  { %6077 = vmatprep.mubr.bf16.mxu0 %v8089_v17 }
 0xab0   :  { %v8361_v19 = vpop.f32.mrb[80].mxu0 }
 0xab1   :  { %v8363_v48 = vpop.f32.mrb[81].mxu0 }
 0xab2   :  { %v8365_v43 = vpop.f32.mrb[82].mxu0 }
 0xab3   :  { %v2813_v16 = vpack.c.bf16 %v8365_v43, %v8361_v19  ;;  %v8369_v4 = vpop.f32.mrb[83].mxu0 }
 0xab4   :  { %v2812_v57 = vpack.c.bf16 %v8369_v4, %v8363_v48 }
 0xab6   :  { %3271 = vrot.lane.b32.xlu0 %v2812_v57, %s6661_s17  ;;  %6061 = vmatprep.subr.bf16.mxu0 %v2812_v57 }
 0xab7   :  { %6093 = vmatprep.subr.bf16.mxu1 %v2812_v57  ;;  %6062 = vmatpush3.bf16.msra.mxu0 %v2812_v57 }
 0xab8   :  { %6094 = vmatpush3.bf16.msra.mxu1 %v2812_v57  ;;  %v8374_v56 = vpop.f32.mrb[84].mxu0  ;;  %6063 = vmatprep.subr.bf16.mxu0 %v2813_v16 }
 0xab9   :  { %6095 = vmatprep.subr.bf16.mxu1 %v2813_v16  ;;  %v8376_v18 = vpop.f32.mrb[85].mxu0 }
 0xaba   :  { %3273 = vrot.lane.b32.xlu0 %v2813_v16, %s6661_s17  ;;  %v8379_v6 = vpop.f32.mrb[86].mxu0 }
 0xabb   :  { %v2815_v42 = vpack.c.bf16 %v8379_v6, %v8374_v56  ;;  %v8383_v21 = vpop.f32.mrb[87].mxu0  ;;  %6064 = vmatpush3.bf16.msra.mxu0 %v2813_v16 }
 0xabc   :  { %v2814_v13 = vpack.c.bf16 %v8383_v21, %v8376_v18  ;;  %6096 = vmatpush3.bf16.msra.mxu1 %v2813_v16 }
 0xabe   :  { %3275 = vrot.lane.b32.xlu0 %v2814_v13, %s6661_s17  ;;  %6065 = vmatprep.subr.bf16.mxu0 %v2814_v13 }
 0xabf   :  { %6097 = vmatprep.subr.bf16.mxu1 %v2814_v13  ;;  %6066 = vmatpush3.bf16.msra.mxu0 %v2814_v13 }
 0xac0   :  { %6098 = vmatpush3.bf16.msra.mxu1 %v2814_v13  ;;  %v8388_v14 = vpop.f32.mrb[88].mxu0  ;;  %6067 = vmatprep.subr.bf16.mxu0 %v2815_v42 }
 0xac1   :  { %v8390_v52 = vpop.f32.mrb[89].mxu0  ;;  %6099 = vmatprep.subr.bf16.mxu1 %v2815_v42 }
 0xac2   :  { %3277 = vrot.lane.b32.xlu0 %v2815_v42, %s6661_s17  ;;  %v8393_v57 = vpop.f32.mrb[90].mxu0 }
 0xac3   :  { %v2817_v39 = vpack.c.bf16 %v8393_v57, %v8388_v14  ;;  %v8397_v16 = vpop.f32.mrb[91].mxu0  ;;  %6068 = vmatpush3.bf16.msra.mxu0 %v2815_v42 }
 0xac4   :  { %v2816_v38 = vpack.c.bf16 %v8397_v16, %v8390_v52  ;;  %6100 = vmatpush3.bf16.msra.mxu1 %v2815_v42 }
 0xac6   :  { %3279 = vrot.lane.b32.xlu0 %v2816_v38, %s6661_s17  ;;  %6069 = vmatprep.subr.bf16.mxu0 %v2816_v38 }
 0xac7   :  { %6101 = vmatprep.subr.bf16.mxu1 %v2816_v38  ;;  %6070 = vmatpush3.bf16.msra.mxu0 %v2816_v38 }
 0xac8   :  { %6102 = vmatpush3.bf16.msra.mxu1 %v2816_v38  ;;  %v8402_v13 = vpop.f32.mrb[92].mxu0  ;;  %6071 = vmatprep.subr.bf16.mxu0 %v2817_v39  ;;  %v8420_v38 = vld [vmem:[%s9440_s2 + $0x48] sm:$0xff]  }
 0xac9   :  { %v8404_v61 = vpop.f32.mrb[93].mxu0  ;;  %6103 = vmatprep.subr.bf16.mxu1 %v2817_v39 }
 0xaca   :  { %3281 = vrot.lane.b32.xlu0 %v2817_v39, %s6661_s17  ;;  %v8407_v55 = vpop.f32.mrb[94].mxu0 }
 0xacb   :  { %9728 = vst [vmem:[#allocation27_spill] sm:$0xff] %v8407_v55  ;;  %v2819_v29 = vpack.c.bf16 %v8407_v55, %v8402_v13  ;;  %v8411_v42 = vpop.f32.mrb[95].mxu0  ;;  %6072 = vmatpush3.bf16.msra.mxu0 %v2817_v39 }
 0xacc   :  { %9729 = vst [vmem:[#allocation29_spill] sm:$0xff] %v8411_v42  ;;  %v2818_v45 = vpack.c.bf16 %v8411_v42, %v8404_v61  ;;  %6104 = vmatpush3.bf16.msra.mxu1 %v2817_v39  ;;  %v8425_v39 = vld [vmem:[%s9440_s2 + $0x50] sm:$0xff]  }
 0xace   :  { %3283 = vrot.lane.b32.xlu0 %v2818_v45, %s6661_s17  ;;  %6073 = vmatprep.subr.bf16.mxu0 %v2818_v45 }
 0xacf   :  { %6105 = vmatprep.subr.bf16.mxu1 %v2818_v45  ;;  %6074 = vmatpush3.bf16.msra.mxu0 %v2818_v45 }
 0xad0   :  { %6106 = vmatpush3.bf16.msra.mxu1 %v2818_v45  ;;  %6075 = vmatprep.subr.bf16.mxu0 %v2819_v29  ;;  %v8434_v45 = vld [vmem:[%s9440_s2 + $0x58] sm:$0xff]  }
 0xad1   :  { %6107 = vmatprep.subr.bf16.mxu1 %v2819_v29 }
 0xad2   :  { %3285 = vrot.lane.b32.xlu0 %v2819_v29, %s6661_s17 }
 0xad3   :  { %6076 = vmatpush3.bf16.msra.mxu0 %v2819_v29 }
 0xad4   :  { %6108 = vmatpush3.bf16.msra.mxu1 %v2819_v29  ;;  %v8439_v29 = vld [vmem:[%s9440_s2 + $0x60] sm:$0xff]  }
 0xad6   :  { %6078 = vmatmul.mubr.bf16.vlgmr.msra.gmra.mrb[96].mxu0 %v8314_v53  ;;  %v8448_v53 = vld [vmem:[%s9440_s2 + $0x68] sm:$0xff]  }
 0xad7   :  { %6110 = vmatmul.mubr.bf16.vlgmr.msra.gmra.mrb[128].mxu1 %v8420_v38  ;;  %6081 = vmatprep.mubr.bf16.mxu0 %v8320_v25  ;;  %v8453_v25 = vld [vmem:[%s9440_s2 + $0x70] sm:$0xff]  }
 0xad8   :  { %6113 = vmatprep.mubr.bf16.mxu1 %v8425_v39 }
 0xade   :  { %6082 = vmatmul.mubr.bf16.gmra.mrb[100].mxu0 %v8327_v36  ;;  %v8462_v36 = vld [vmem:[%s9440_s2 + $0x78] sm:$0xff]  }
 0xadf   :  { %6114 = vmatmul.mubr.bf16.gmra.mrb[132].mxu1 %v8434_v45  ;;  %6085 = vmatprep.mubr.bf16.mxu0 %v8332_v51  ;;  %v6375_v51 = vld [vmem:[%s9442_s3 + $0xe0] sm:$0xff]  }
 0xae0   :  { %6117 = vmatprep.mubr.bf16.mxu1 %v8439_v29  ;;  %5609 = vmatprep.subr.bf16.mxu1 %v6375_v51  ;;  %v6381_v51 = vld [vmem:[%s9442_s3 + $0xf8] sm:$0xff]  }
 0xae6   :  { %6086 = vmatmul.mubr.bf16.gmra.mrb[104].mxu0 %v8339_v9  ;;  %v6376_v9 = vld [vmem:[%s9442_s3 + $0xa0] sm:$0xff]  }
 0xae7   :  { %6118 = vmatmul.mubr.bf16.gmra.mrb[136].mxu1 %v8448_v53  ;;  %6089 = vmatprep.mubr.bf16.mxu0 %v8344_v33  ;;  %v6377_v33 = vld [vmem:[%s9442_s3 + $0xe8] sm:$0xff]  }
 0xae8   :  { %6121 = vmatprep.mubr.bf16.mxu1 %v8453_v25  ;;  %5610 = vmatpush3.bf16.msra.mxu1 %v6376_v9  ;;  %v6382_v9 = vld [vmem:[%s9442_s3 + $0xb8] sm:$0xff]  }
 0xae9   :  { %5611 = vmatprep.subr.bf16.mxu1 %v6377_v33  ;;  %v6383_v33 = vld [vmem:[%s9442_s3 + $0x100] sm:$0xff]  }
 0xaee   :  { %6090 = vmatmul.mubr.bf16.gmra.mrb[108].mxu0 %v8351_v12  ;;  %v6378_v12 = vld [vmem:[%s9442_s3 + $0xa8] sm:$0xff]  }
 0xaef   :  { %6122 = vmatmul.mubr.bf16.gmra.mrb[140].mxu1 %v8462_v36  ;;  %6141 = vmatprep.mubr.bf16.mxu0 %v8358_v28  ;;  %v6379_v28 = vld [vmem:[%s9442_s3 + $0xf0] sm:$0xff]  }
 0xaf0   :  { %5612 = vmatpush3.bf16.msra.mxu1 %v6378_v12  ;;  %v6384_v12 = vld [vmem:[%s9442_s3 + $0xc0] sm:$0xff]  }
 0xaf1   :  { %5613 = vmatprep.subr.bf16.mxu1 %v6379_v28  ;;  %v6385_v28 = vld [vmem:[%s9442_s3 + $0x108] sm:$0xff]  }
 0xaf4   :  { %5614 = vmatpush3.bf16.msra.mxu1 %v6380_v22  ;;  %v6386_v22 = vld [vmem:[%s9442_s3 + $0xc8] sm:$0xff]  }
 0xaf5   :  { %5615 = vmatprep.subr.bf16.mxu1 %v6381_v51  ;;  %v6387_v51 = vld [vmem:[%s9442_s3 + $0x110] sm:$0xff]  }
 0xaf8   :  { %5616 = vmatpush3.bf16.msra.mxu1 %v6382_v9  ;;  %v6388_v9 = vld [vmem:[%s9442_s3 + $0xd0] sm:$0xff]  }
 0xaf9   :  { %5617 = vmatprep.subr.bf16.mxu1 %v6383_v33  ;;  %v6389_v33 = vld [vmem:[%s9442_s3 + $0x118] sm:$0xff]  }
 0xafc   :  { %5618 = vmatpush3.bf16.msra.mxu1 %v6384_v12  ;;  %v6390_v12 = vld [vmem:[%s9442_s3 + $0xd8] sm:$0xff]  }
 0xafd   :  { %5619 = vmatprep.subr.bf16.mxu1 %v6385_v28 }
 0xb00   :  { %5620 = vmatpush3.bf16.msra.mxu1 %v6386_v22 }
 0xb01   :  { %5621 = vmatprep.subr.bf16.mxu1 %v6387_v51 }
 0xb04   :  { %5622 = vmatpush3.bf16.msra.mxu1 %v6388_v9 }
 0xb05   :  { %5623 = vmatprep.subr.bf16.mxu1 %v6389_v33 }
 0xb08   :  { %5624 = vmatpush3.bf16.msra.mxu1 %v6390_v12 }
 0xba9   :  { %v6079_v28 = vpop.f32.mrb[96].mxu0 }
 0xbaa   :  { %v2919_v26 = vmul.f32 2.0, %v6079_v28  ;;  %v6111_v37 = vpop.f32.mrb[128].mxu1  ;;  %v2854_v22 = vpop.f32.mrb[97].mxu0 }
 0xbab   :  { %v2917_v34 = vmul.f32 2.0, %v2854_v22  ;;  %v3055_v3 = vpop.f32.mrb[129].mxu1  ;;  %v6080_v27 = vpop.f32.mrb[98].mxu0 }
 0xbac   :  { %v2920_v15 = vmul.f32 2.0, %v6080_v27  ;;  %v6112_v51 = vpop.f32.mrb[130].mxu1  ;;  %v2857_v59 = vpop.f32.mrb[99].mxu0  ;;  %v2935_v9 = vsub.f32 %v2919_v26, %v8160_v63 }
 0xbad   :  { %v3119_v23 = vpack.c.bf16 %v6112_v51, %v6111_v37  ;;  %v2918_v54 = vmul.f32 2.0, %v2857_v59  ;;  %v3058_v24 = vpop.f32.mrb[131].mxu1  ;;  %v2933_v33 = vsub.f32 %v2917_v34, %v8138_v40 }
 0xbae   :  { %v2936_v42 = vsub.f32 %v2920_v15, %v8168_v44  ;;  %v3118_v55 = vpack.c.bf16 %v3058_v24, %v3055_v3 }
 0xbaf   :  { %v2934_v12 = vsub.f32 %v2918_v54, %v8146_v41 }
 0xbb0   :  { %v8519_v28 = vpack.c.bf16 %v2936_v42, %v2935_v9  ;;  %3295 = vrot.lane.b32.xlu1 %v3118_v55, %s6661_s17  ;;  %6125 = vmatprep.subr.bf16.mxu0 %v3118_v55 }
 0xbb1   :  { %v8522_v27 = vpack.c.bf16 %v2934_v12, %v2933_v33  ;;  %6126 = vmatpush3.bf16.msra.mxu0 %v3118_v55  ;;  %v6083_v37 = vpop.f32.mrb[100].mxu0 }
 0xbb2   :  { %v2923_v59 = vmul.f32 2.0, %v6083_v37  ;;  %v6115_v22 = vpop.f32.mrb[132].mxu1  ;;  %v2870_v51 = vpop.f32.mrb[101].mxu0  ;;  %6127 = vmatprep.subr.bf16.mxu0 %v3119_v23 }
 0xbb3   :  { %v2921_v26 = vmul.f32 2.0, %v2870_v51  ;;  %v3071_v15 = vpop.f32.mrb[133].mxu1  ;;  %v6084_v24 = vpop.f32.mrb[102].mxu0 }
 0xbb4   :  { %3297 = vrot.lane.b32.xlu1 %v3119_v23, %s6661_s17  ;;  %v2924_v3 = vmul.f32 2.0, %v6084_v24  ;;  %v6116_v54 = vpop.f32.mrb[134].mxu1  ;;  %v2873_v34 = vpop.f32.mrb[103].mxu0  ;;  %v2939_v44 = vsub.f32 %v2923_v59, %v8204_v47 }
 0xbb5   :  { %v3121_v40 = vpack.c.bf16 %v6116_v54, %v6115_v22  ;;  %v2922_v41 = vmul.f32 2.0, %v2873_v34  ;;  %v3074_v63 = vpop.f32.mrb[135].mxu1  ;;  %6128 = vmatpush3.bf16.msra.mxu0 %v3119_v23  ;;  %v2937_v9 = vsub.f32 %v2921_v26, %v8182_v32 }
 0xbb6   :  { %v2940_v55 = vsub.f32 %v2924_v3, %v8212_v50  ;;  %v3120_v42 = vpack.c.bf16 %v3074_v63, %v3071_v15 }
 0xbb7   :  { %v2938_v33 = vsub.f32 %v2922_v41, %v8190_v31 }
 0xbb8   :  { %v8529_v12 = vpack.c.bf16 %v2940_v55, %v2939_v44  ;;  %3299 = vrot.lane.b32.xlu1 %v3120_v42, %s6661_s17  ;;  %6129 = vmatprep.subr.bf16.mxu0 %v3120_v42 }
 0xbb9   :  { %v8532_v37 = vpack.c.bf16 %v2938_v33, %v2937_v9  ;;  %6130 = vmatpush3.bf16.msra.mxu0 %v3120_v42  ;;  %v6087_v22 = vpop.f32.mrb[104].mxu0 }
 0xbba   :  { %v2927_v51 = vmul.f32 2.0, %v6087_v22  ;;  %v6119_v23 = vpop.f32.mrb[136].mxu1  ;;  %v2886_v24 = vpop.f32.mrb[105].mxu0  ;;  %6131 = vmatprep.subr.bf16.mxu0 %v3121_v40 }
 0xbbb   :  { %v2925_v47 = vmul.f32 2.0, %v2886_v24  ;;  %v3087_v50 = vpop.f32.mrb[137].mxu1  ;;  %v6088_v59 = vpop.f32.mrb[106].mxu0 }
 0xbbc   :  { %3301 = vrot.lane.b32.xlu1 %v3121_v40, %s6661_s17  ;;  %v2928_v32 = vmul.f32 2.0, %v6088_v59  ;;  %v6120_v31 = vpop.f32.mrb[138].mxu1  ;;  %v2889_v26 = vpop.f32.mrb[107].mxu0  ;;  %v2943_v34 = vsub.f32 %v2927_v51, %v8248_v2 }
 0xbbd   :  { %v3123_v15 = vpack.c.bf16 %v6120_v31, %v6119_v23  ;;  %v2926_v3 = vmul.f32 2.0, %v2889_v26  ;;  %v3090_v54 = vpop.f32.mrb[139].mxu1  ;;  %6132 = vmatpush3.bf16.msra.mxu0 %v3121_v40  ;;  %v2941_v44 = vsub.f32 %v2925_v47, %v8226_v30 }
 0xbbe   :  { %v2944_v41 = vsub.f32 %v2928_v32, %v8256_v10  ;;  %v3122_v63 = vpack.c.bf16 %v3090_v54, %v3087_v50 }
 0xbbf   :  { %v2942_v55 = vsub.f32 %v2926_v3, %v8234_v0 }
 0xbc0   :  { %v8539_v42 = vpack.c.bf16 %v2944_v41, %v2943_v34  ;;  %3303 = vrot.lane.b32.xlu1 %v3122_v63, %s6661_s17  ;;  %6133 = vmatprep.subr.bf16.mxu0 %v3122_v63 }
 0xbc1   :  { %v8542_v9 = vpack.c.bf16 %v2942_v55, %v2941_v44  ;;  %6134 = vmatpush3.bf16.msra.mxu0 %v3122_v63  ;;  %v6091_v33 = vpop.f32.mrb[108].mxu0 }
 0xbc2   :  { %v2931_v22 = vmul.f32 2.0, %v6091_v33  ;;  %v6123_v40 = vpop.f32.mrb[140].mxu1  ;;  %v2902_v23 = vpop.f32.mrb[109].mxu0  ;;  %6135 = vmatprep.subr.bf16.mxu0 %v3123_v15 }
 0xbc3   :  { %v2929_v2 = vmul.f32 2.0, %v2902_v23  ;;  %v3103_v10 = vpop.f32.mrb[141].mxu1  ;;  %v6092_v51 = vpop.f32.mrb[110].mxu0 }
 0xbc4   :  { %3305 = vrot.lane.b32.xlu1 %v3123_v15, %s6661_s17  ;;  %v2932_v30 = vmul.f32 2.0, %v6092_v51  ;;  %v6124_v0 = vpop.f32.mrb[142].mxu1  ;;  %v2905_v24 = vpop.f32.mrb[111].mxu0  ;;  %v2947_v32 = vsub.f32 %v2931_v22, %v8300_v35 }
 0xbc5   :  { %v3125_v47 = vpack.c.bf16 %v6124_v0, %v6123_v40  ;;  %v2930_v50 = vmul.f32 2.0, %v2905_v24  ;;  %v3106_v59 = vpop.f32.mrb[143].mxu1  ;;  %6136 = vmatpush3.bf16.msra.mxu0 %v3123_v15  ;;  %v2945_v3 = vsub.f32 %v2929_v2, %v8270_v8  ;;  %v6391_v8 = vld [vmem:[%s9442_s3 + $0x120] sm:$0xff]   ;;  %v3272_v35 = vpop.permute.xlu0 %3271 }
 0xbc6   :  { %v2948_v31 = vsub.f32 %v2932_v30, %v8304_v49  ;;  %v3124_v26 = vpack.c.bf16 %v3106_v59, %v3103_v10 }
 0xbc7   :  { %v2946_v54 = vsub.f32 %v2930_v50, %v8278_v60  ;;  %v6392_v60 = vld [vmem:[%s9442_s3 + $0x128] sm:$0xff]  }
 0xbc8   :  { %v8549_v34 = vpack.c.bf16 %v2948_v31, %v2947_v32  ;;  %3307 = vrot.lane.b32.xlu1 %v3124_v26, %s6661_s17  ;;  %6137 = vmatprep.subr.bf16.mxu0 %v3124_v26 }
 0xbc9   :  { %v2955_v41 = vpack.c.bf16 %v2946_v54, %v2945_v3  ;;  %6138 = vmatpush3.bf16.msra.mxu0 %v3124_v26 }
 0xbca   :  { %6139 = vmatprep.subr.bf16.mxu0 %v3125_v47 }
 0xbcc   :  { %3309 = vrot.lane.b32.xlu1 %v3125_v47, %s6661_s17 }
 0xbcd   :  { %6140 = vmatpush3.bf16.msra.mxu0 %v3125_v47 }
 0xbce   :  { %6157 = vmatprep.subr.bf16.mxu0 %v6391_v8 }
 0xbd0   :  { %6142 = vmatmul.mubr.bf16.vlgmr.msra.gmra.mrb[112].mxu0 %v8420_v38 }
 0xbd1   :  { %6145 = vmatprep.mubr.bf16.mxu0 %v8425_v39  ;;  %6158 = vmatpush3.bf16.msra.mxu0 %v6391_v8  ;;  %v3313_v39 = vsel %vm809_vm1, %v8150_v62, %v3272_v35 }
 0xbd2   :  { %6159 = vmatprep.subr.bf16.mxu0 %v6392_v60 }
 0xbd5   :  { %6160 = vmatpush3.bf16.msra.mxu0 %v6392_v60 }
 0xbd8   :  { %6146 = vmatmul.mubr.bf16.gmra.mrb[116].mxu0 %v8434_v45  ;;  %v6393_v45 = vld [vmem:[%s9442_s3 + $0x130] sm:$0xff]  }
 0xbd9   :  { %6149 = vmatprep.mubr.bf16.mxu0 %v8439_v29  ;;  %6161 = vmatprep.subr.bf16.mxu0 %v6393_v45 }
 0xbda   :  { %6162 = vmatpush3.bf16.msra.mxu0 %v6393_v45 }
 0xbe0   :  { %6150 = vmatmul.mubr.bf16.gmra.mrb[120].mxu0 %v8448_v53 }
 0xbe1   :  { %6153 = vmatprep.mubr.bf16.mxu0 %v8453_v25  ;;  %v6394_v25 = vld [vmem:[%s9442_s3 + $0x138] sm:$0xff]  }
 0xbe2   :  { %6163 = vmatprep.subr.bf16.mxu0 %v6394_v25 }
 0xbe3   :  { %6164 = vmatpush3.bf16.msra.mxu0 %v6394_v25 }
 0xbe8   :  { %6154 = vmatmul.mubr.bf16.gmra.mrb[124].mxu0 %v8462_v36  ;;  %v3274_v36 = vpop.permute.xlu0 %3273 }
 0xbe9   :  { %v3317_v62 = vsel %vm809_vm1, %v8172_v20, %v3274_v36 }
 0xbec   :  { %v3276_v63 = vpop.permute.xlu0 %3275 }
 0xbed   :  { %v3321_v44 = vsel %vm809_vm1, %v8194_v46, %v3276_v63 }
 0xbf0   :  { %v3278_v33 = vpop.permute.xlu0 %3277 }
 0xbf1   :  { %v3325_v20 = vsel %vm809_vm1, %v8216_v5, %v3278_v33 }
 0xbf4   :  { %v3280_v40 = vpop.permute.xlu0 %3279 }
 0xbf5   :  { %v3329_v46 = vsel %vm809_vm1, %v8238_v58, %v3280_v40 }
 0xbf8   :  { %v3282_v2 = vpop.permute.xlu0 %3281 }
 0xbf9   :  { %v3333_v5 = vsel %vm809_vm1, %v8260_v7, %v3282_v2 }
 0xc22   :  { %v3296_v49 = vpop.permute.xlu1 %3295 }
 0xc23   :  { %v3345_v38 = vsel %vm809_vm1, %v8522_v27, %v3296_v49 }
 0xc24   :  { %3592 = vmatprep.mubr.bf16.mxu1 %v3345_v38 }
 0xc25   :  { %3593 = vmatmul.mubr.bf16.vlgmr.msra.gmra.mrb[144].mxu1 %v3313_v39 }
 0xc26   :  { %v3298_v29 = vpop.permute.xlu1 %3297 }
 0xc27   :  { %v3349_v53 = vsel %vm809_vm1, %v8519_v28, %v3298_v29 }
 0xc28   :  { %3600 = vmatprep.mubr.bf16.mxu1 %v3349_v53 }
 0xc2a   :  { %v3300_v27 = vpop.permute.xlu1 %3299 }
 0xc2b   :  { %v3353_v15 = vsel %vm809_vm1, %v8532_v37, %v3300_v27 }
 0xc2d   :  { %3601 = vmatmul.mubr.bf16.gmra.mrb[148].mxu1 %v3317_v62 }
 0xc2e   :  { %3608 = vmatprep.mubr.bf16.mxu1 %v3353_v15  ;;  %v3302_v28 = vpop.permute.xlu1 %3301 }
 0xc2f   :  { %v3357_v55 = vsel %vm809_vm1, %v8529_v12, %v3302_v28 }
 0xc32   :  { %v3304_v22 = vpop.permute.xlu1 %3303 }
 0xc33   :  { %v3361_v37 = vsel %vm809_vm1, %v8542_v9, %v3304_v22  ;;  %v3284_v9 = vpop.permute.xlu0 %3283 }
 0xc34   :  { %v3337_v0 = vsel %vm809_vm1, %v8282_v11, %v3284_v9 }
 0xc35   :  { %3609 = vmatmul.mubr.bf16.gmra.mrb[152].mxu1 %v3321_v44 }
 0xc36   :  { %3616 = vmatprep.mubr.bf16.mxu1 %v3357_v55  ;;  %v3306_v23 = vpop.permute.xlu1 %3305 }
 0xc37   :  { %v3365_v12 = vsel %vm809_vm1, %v8539_v42, %v3306_v23  ;;  %v3286_v42 = vpop.permute.xlu0 %3285 }
 0xc38   :  { %v3341_v24 = vsel %vm809_vm1, %v8308_v1, %v3286_v42 }
 0xc3a   :  { %v3308_v10 = vpop.permute.xlu1 %3307 }
 0xc3b   :  { %v3369_v51 = vsel %vm809_vm1, %v2955_v41, %v3308_v10 }
 0xc3d   :  { %3617 = vmatmul.mubr.bf16.gmra.mrb[156].mxu1 %v3325_v20 }
 0xc3e   :  { %3624 = vmatprep.mubr.bf16.mxu1 %v3361_v37  ;;  %v3310_v30 = vpop.permute.xlu1 %3309 }
 0xc3f   :  { %v3373_v58 = vsel %vm809_vm1, %v8549_v34, %v3310_v30 }
 0xc45   :  { %3625 = vmatmul.mubr.bf16.gmra.mrb[160].mxu1 %v3329_v46 }
 0xc46   :  { %3632 = vmatprep.mubr.bf16.mxu1 %v3365_v12 }
 0xc4d   :  { %3633 = vmatmul.mubr.bf16.gmra.mrb[164].mxu1 %v3333_v5  ;;  %v9730_v5 = vld [vmem:[#allocation27_spill] sm:$0xff] }
 0xc4e   :  { %3640 = vmatprep.mubr.bf16.mxu1 %v3369_v51  ;;  %v9731_v51 = vld [vmem:[#allocation29_spill] sm:$0xff] }
 0xc55   :  { %3641 = vmatmul.mubr.bf16.gmra.mrb[168].mxu1 %v3337_v0 }
 0xc56   :  { %3648 = vmatprep.mubr.bf16.mxu1 %v3373_v58 }
 0xc5d   :  { %3649 = vmatmul.mubr.bf16.gmra.mrb[172].mxu1 %v3341_v24 }
 0xc5e   :  { %6229 = vmatprep.mubr.bf16.mxu1 %v8089_v17 }
 0xca3   :  { %v6143_v7 = vpop.f32.mrb[112].mxu0 }
 0xca4   :  { %v3225_v47 = vmul.f32 2.0, %v6143_v7  ;;  %v3160_v50 = vpop.f32.mrb[113].mxu0 }
 0xca5   :  { %v3223_v59 = vmul.f32 2.0, %v3160_v50  ;;  %v6144_v32 = vpop.f32.mrb[114].mxu0 }
 0xca6   :  { %v3241_v31 = vsub.f32 %v3225_v47, %v8361_v19  ;;  %v3226_v11 = vmul.f32 2.0, %v6144_v32  ;;  %v3163_v26 = vpop.f32.mrb[115].mxu0 }
 0xca7   :  { %v3239_v3 = vsub.f32 %v3223_v59, %v8363_v48  ;;  %v3224_v54 = vmul.f32 2.0, %v3163_v26 }
 0xca8   :  { %v3242_v34 = vsub.f32 %v3226_v11, %v8365_v43 }
 0xca9   :  { %v3240_v41 = vsub.f32 %v3224_v54, %v8369_v4 }
 0xcaa   :  { %v3256_v1 = vpack.c.bf16 %v3242_v34, %v3241_v31 }
 0xcab   :  { %v3255_v8 = vpack.c.bf16 %v3240_v41, %v3239_v3  ;;  %v6147_v60 = vpop.f32.mrb[116].mxu0 }
 0xcac   :  { %v3229_v35 = vmul.f32 2.0, %v6147_v60  ;;  %v3176_v49 = vpop.f32.mrb[117].mxu0 }
 0xcad   :  { %v3227_v38 = vmul.f32 2.0, %v3176_v49  ;;  %v6148_v39 = vpop.f32.mrb[118].mxu0  ;;  %6165 = vmatprep.mubr.msk.bf16.mxu0 %vm809_vm1, %v3255_v8 }
 0xcae   :  { %v3245_v19 = vsub.f32 %v3229_v35, %v8374_v56  ;;  %v3230_v45 = vmul.f32 2.0, %v6148_v39  ;;  %v3179_v29 = vpop.f32.mrb[119].mxu0  ;;  %6166 = vmatmul.mubr.msk.bf16.vlgmr.msra.gmra.mrb[128].mxu0 %vm809_vm1, %v3256_v1 }
 0xcaf   :  { %v3243_v48 = vsub.f32 %v3227_v38, %v8376_v18  ;;  %v3228_v43 = vmul.f32 2.0, %v3179_v29 }
 0xcb0   :  { %v3246_v4 = vsub.f32 %v3230_v45, %v8379_v6 }
 0xcb1   :  { %v3244_v53 = vsub.f32 %v3228_v43, %v8383_v21 }
 0xcb2   :  { %v3258_v25 = vpack.c.bf16 %v3246_v4, %v3245_v19 }
 0xcb3   :  { %v3257_v36 = vpack.c.bf16 %v3244_v53, %v3243_v48  ;;  %v6151_v27 = vpop.f32.mrb[120].mxu0 }
 0xcb4   :  { %v3233_v62 = vmul.f32 2.0, %v6151_v27  ;;  %v3192_v15 = vpop.f32.mrb[121].mxu0 }
 0xcb5   :  { %v3231_v63 = vmul.f32 2.0, %v3192_v15  ;;  %v6152_v28 = vpop.f32.mrb[122].mxu0  ;;  %6169 = vmatprep.mubr.msk.bf16.mxu0 %vm809_vm1, %v3257_v36 }
 0xcb6   :  { %v3249_v56 = vsub.f32 %v3233_v62, %v8388_v14  ;;  %v3234_v44 = vmul.f32 2.0, %v6152_v28  ;;  %v3195_v55 = vpop.f32.mrb[123].mxu0  ;;  %6170 = vmatmul.mubr.msk.bf16.gmra.mrb[132].mxu0 %vm809_vm1, %v3258_v25 }
 0xcb7   :  { %v3247_v18 = vsub.f32 %v3231_v63, %v8390_v52  ;;  %v3232_v6 = vmul.f32 2.0, %v3195_v55 }
 0xcb8   :  { %v3250_v21 = vsub.f32 %v3234_v44, %v8393_v57 }
 0xcb9   :  { %v3248_v33 = vsub.f32 %v3232_v6, %v8397_v16 }
 0xcba   :  { %v3260_v22 = vpack.c.bf16 %v3250_v21, %v3249_v56 }
 0xcbb   :  { %v3259_v20 = vpack.c.bf16 %v3248_v33, %v3247_v18  ;;  %v6155_v37 = vpop.f32.mrb[124].mxu0 }
 0xcbc   :  { %v3237_v40 = vmul.f32 2.0, %v6155_v37  ;;  %v3208_v23 = vpop.f32.mrb[125].mxu0 }
 0xcbd   :  { %v3235_v46 = vmul.f32 2.0, %v3208_v23  ;;  %v6156_v12 = vpop.f32.mrb[126].mxu0  ;;  %6173 = vmatprep.mubr.msk.bf16.mxu0 %vm809_vm1, %v3259_v20 }
 0xcbe   :  { %v3253_v14 = vsub.f32 %v3237_v40, %v8402_v13  ;;  %v3238_v2 = vmul.f32 2.0, %v6156_v12  ;;  %v3211_v10 = vpop.f32.mrb[127].mxu0  ;;  %6174 = vmatmul.mubr.msk.bf16.gmra.mrb[136].mxu0 %vm809_vm1, %v3260_v22  ;;  %v8646_v40 = vld [vmem:[%s9443_s5 + $0x1] ss:$0 sm:$0xff] }
 0xcbf   :  { %v3251_v52 = vsub.f32 %v3235_v46, %v8404_v61  ;;  %v3236_v57 = vmul.f32 2.0, %v3211_v10 }
 0xcc0   :  { %v3254_v16 = vsub.f32 %v3238_v2, %v9730_v5 }
 0xcc1   :  { %v3252_v9 = vsub.f32 %v3236_v57, %v9731_v51 }
 0xcc2   :  { %v3262_v30 = vpack.c.bf16 %v3254_v16, %v3253_v14 }
 0xcc3   :  { %v3261_v0 = vpack.c.bf16 %v3252_v9, %v3251_v52 }
 0xcc5   :  { %6177 = vmatprep.mubr.msk.bf16.mxu0 %vm809_vm1, %v3261_v0 }
 0xcc6   :  { %6178 = vmatmul.mubr.msk.bf16.gmra.mrb[140].mxu0 %vm809_vm1, %v3262_v30 }
 0xcc7   :  { %6197 = vmatprep.mubr.bf16.mxu0 %v8089_v17 }
 0xcf8   :  { %v5625_v13 = vpop.f32.mrb[144].mxu1 }
 0xcf9   :  { %v5626_v58 = vpop.f32.mrb[145].mxu1 }
 0xcfa   :  { %v5627_v42 = vadd.f32 %v5626_v58, %v5625_v13  ;;  %v5628_v24 = vpop.f32.mrb[146].mxu1 }
 0xcfb   :  { %v5629_v7 = vpop.f32.mrb[147].mxu1 }
 0xcfc   :  { %v5630_v47 = vadd.f32 %v5629_v7, %v5628_v24 }
 0xd00   :  { %v5631_v61 = vpop.f32.mrb[148].mxu1 }
 0xd01   :  { %v5632_v50 = vpop.f32.mrb[149].mxu1 }
 0xd02   :  { %v5633_v59 = vadd.f32 %v5632_v50, %v5631_v61  ;;  %v5634_v32 = vpop.f32.mrb[150].mxu1 }
 0xd03   :  { %v5635_v31 = vpop.f32.mrb[151].mxu1 }
 0xd04   :  { %v5636_v11 = vadd.f32 %v5635_v31, %v5634_v32 }
 0xd08   :  { %v5637_v26 = vpop.f32.mrb[152].mxu1 }
 0xd09   :  { %v5638_v3 = vpop.f32.mrb[153].mxu1 }
 0xd0a   :  { %v5639_v54 = vadd.f32 %v5638_v3, %v5637_v26  ;;  %v5640_v34 = vpop.f32.mrb[154].mxu1 }
 0xd0b   :  { %v5641_v41 = vpop.f32.mrb[155].mxu1 }
 0xd0c   :  { %v5642_v1 = vadd.f32 %v5641_v41, %v5640_v34 }
 0xd10   :  { %v5643_v8 = vpop.f32.mrb[156].mxu1 }
 0xd11   :  { %v5644_v17 = vpop.f32.mrb[157].mxu1 }
 0xd12   :  { %v5645_v60 = vadd.f32 %v5644_v17, %v5643_v8  ;;  %v5646_v35 = vpop.f32.mrb[158].mxu1 }
 0xd13   :  { %v5647_v49 = vpop.f32.mrb[159].mxu1 }
 0xd14   :  { %v5648_v38 = vadd.f32 %v5647_v49, %v5646_v35 }
 0xd18   :  { %v5649_v39 = vpop.f32.mrb[160].mxu1 }
 0xd19   :  { %v5650_v19 = vpop.f32.mrb[161].mxu1 }
 0xd1a   :  { %v8629_v45 = vadd.f32 %v5650_v19, %v5649_v39  ;;  %v5652_v29 = vpop.f32.mrb[162].mxu1 }
 0xd1b   :  { %v5653_v48 = vpop.f32.mrb[163].mxu1 }
 0xd1c   :  { %v8631_v43 = vadd.f32 %v5653_v48, %v5652_v29 }
 0xd20   :  { %v5655_v4 = vpop.f32.mrb[164].mxu1 }
 0xd21   :  { %v5656_v53 = vpop.f32.mrb[165].mxu1 }
 0xd22   :  { %v5657_v25 = vadd.f32 %v5656_v53, %v5655_v4  ;;  %v5658_v36 = vpop.f32.mrb[166].mxu1 }
 0xd23   :  { %v5659_v27 = vpop.f32.mrb[167].mxu1 }
 0xd24   :  { %v8633_v62 = vadd.f32 %v5659_v27, %v5658_v36 }
 0xd28   :  { %v5661_v15 = vpop.f32.mrb[168].mxu1 }
 0xd29   :  { %v5662_v63 = vpop.f32.mrb[169].mxu1 }
 0xd2a   :  { %v8635_v28 = vadd.f32 %v5662_v63, %v5661_v15  ;;  %v5664_v56 = vpop.f32.mrb[170].mxu1 }
 0xd2b   :  { %v5665_v44 = vpop.f32.mrb[171].mxu1 }
 0xd2c   :  { %v8637_v55 = vadd.f32 %v5665_v44, %v5664_v56 }
 0xd30   :  { %v5667_v18 = vpop.f32.mrb[172].mxu1 }
 0xd31   :  { %v5668_v6 = vpop.f32.mrb[173].mxu1 }
 0xd32   :  { %v8639_v21 = vadd.f32 %v5668_v6, %v5667_v18  ;;  %v5670_v33 = vpop.f32.mrb[174].mxu1 }
 0xd33   :  { %v5671_v22 = vpop.f32.mrb[175].mxu1 }
 0xd34   :  { %v8641_v20 = vadd.f32 %v5671_v22, %v5670_v33 }
 0xd81   :  { %v6167_v37 = vpop.f32.mrb[128].mxu0 }
 0xd82   :  { %v8648_v23 = vadd.f32 %v6167_v37, %v5633_v59  ;;  %v3691_v46 = vpop.f32.mrb[129].mxu0 }
 0xd83   :  { %v8650_v12 = vadd.f32 %v5627_v42, %v3691_v46  ;;  %v6168_v14 = vpop.f32.mrb[130].mxu0 }
 0xd84   :  { %9732 = vst [vmem:[#allocation26_spill] sm:$0xff] %v8648_v23  ;;  %v3764_v2 = vadd.f32 %v8646_v40, %v8648_v23  ;;  %v8654_v10 = vadd.f32 %v6168_v14, %v5636_v11  ;;  %v3694_v52 = vpop.f32.mrb[131].mxu0 }
 0xd85   :  { %9733 = vst [vmem:[#allocation28_spill] sm:$0xff] %v8650_v12  ;;  %v3762_v57 = vadd.f32 %v8646_v40, %v8650_v12  ;;  %v8658_v5 = vadd.f32 %v5630_v47, %v3694_v52 }
 0xd86   :  { %9734 = vst [vmem:[#allocation31_spill] sm:$0xff] %v8654_v10  ;;  %v5271_v16 = vmul.f32 -1.442695, %v3764_v2  ;;  %v3765_v51 = vadd.f32 %v8646_v40, %v8654_v10 }
 0xd87   :  { %9735 = vst [vmem:[#allocation33_spill] sm:$0xff] %v8658_v5  ;;  %v5269_v9 = vmul.f32 -1.442695, %v3762_v57  ;;  %v3763_v30 = vadd.f32 %v8646_v40, %v8658_v5 }
 0xd88   :  { %6501 = vpow2.f32 %v5271_v16  ;;  %v5272_v0 = vmul.f32 -1.442695, %v3765_v51 }
 0xd89   :  { %6503 = vpow2.f32 %v5269_v9  ;;  %v5270_v13 = vmul.f32 -1.442695, %v3763_v30  ;;  %v6171_v58 = vpop.f32.mrb[132].mxu0 }
 0xd8a   :  { %6505 = vpow2.f32 %v5272_v0  ;;  %v8664_v42 = vadd.f32 %v6171_v58, %v5645_v60  ;;  %v3707_v24 = vpop.f32.mrb[133].mxu0 }
 0xd8b   :  { %6507 = vpow2.f32 %v5270_v13  ;;  %v8666_v7 = vadd.f32 %v5639_v54, %v3707_v24  ;;  %v6172_v47 = vpop.f32.mrb[134].mxu0 }
 0xd8c   :  { %9736 = vst [vmem:[#allocation30_spill] sm:$0xff] %v8664_v42  ;;  %v3768_v61 = vadd.f32 %v8646_v40, %v8664_v42  ;;  %v8670_v50 = vadd.f32 %v6172_v47, %v5648_v38  ;;  %v3710_v59 = vpop.f32.mrb[135].mxu0  ;;  %v9046_v42 = vld [vmem:[%s9440_s2 + $0x50] sm:$0xff]  }
 0xd8d   :  { %9737 = vst [vmem:[#allocation32_spill] sm:$0xff] %v8666_v7  ;;  %v3766_v32 = vadd.f32 %v8646_v40, %v8666_v7  ;;  %v8674_v31 = vadd.f32 %v5642_v1, %v3710_v59 }
 0xd8e   :  { %9738 = vst [vmem:[#allocation35_spill] sm:$0xff] %v8670_v50  ;;  %v5275_v11 = vmul.f32 -1.442695, %v3768_v61  ;;  %v3769_v26 = vadd.f32 %v8646_v40, %v8670_v50  ;;  %v9039_v50 = vld [vmem:[%s9440_s2 + $0x48] sm:$0xff]  }
 0xd8f   :  { %9739 = vst [vmem:[#allocation3_spill] sm:$0xff] %v8674_v31  ;;  %v5273_v3 = vmul.f32 -1.442695, %v3766_v32  ;;  %v3767_v54 = vadd.f32 %v8646_v40, %v8674_v31 }
 0xd90   :  { %6509 = vpow2.f32 %v5275_v11  ;;  %v5276_v34 = vmul.f32 -1.442695, %v3769_v26 }
 0xd91   :  { %6511 = vpow2.f32 %v5273_v3  ;;  %v5274_v41 = vmul.f32 -1.442695, %v3767_v54  ;;  %v6175_v8 = vpop.f32.mrb[136].mxu0 }
 0xd92   :  { %v6502_v17 = vpop.eup %6501  ;;  %6513 = vpow2.f32 %v5276_v34  ;;  %v8680_v60 = vadd.f32 %v6175_v8, %v5657_v25  ;;  %v3723_v35 = vpop.f32.mrb[137].mxu0  ;;  %v6629_v34 = vld [vmem:[%s9439_s1 + $0x80] sm:$0xff] }
 0xd93   :  { %v6504_v1 = vpop.eup %6503  ;;  %v3828_v49 = vadd.f32 1.0, %v6502_v17  ;;  %6515 = vpow2.f32 %v5274_v41  ;;  %v8683_v38 = vadd.f32 %v8629_v45, %v3723_v35  ;;  %v6176_v39 = vpop.f32.mrb[138].mxu0  ;;  %v6631_v17 = vld [vmem:[%s9439_s1 + $0x98] sm:$0xff] }
 0xd94   :  { %9740 = vst [vmem:[#allocation37_spill] sm:$0xff] %v8680_v60  ;;  %v6506_v19 = vpop.eup %6505  ;;  %v3826_v29 = vadd.f32 1.0, %v6504_v1  ;;  %v3772_v48 = vadd.f32 %v8646_v40, %v8680_v60  ;;  %v8688_v4 = vadd.f32 %v6176_v39, %v8633_v62  ;;  %v3726_v53 = vpop.f32.mrb[139].mxu0 }
 0xd95   :  { %9741 = vst [vmem:[#allocation5_spill] sm:$0xff] %v8683_v38  ;;  %v6508_v36 = vpop.eup %6507  ;;  %6517 = vrcp.f32 %v3828_v49  ;;  %v3829_v25 = vadd.f32 1.0, %v6506_v19  ;;  %v3770_v27 = vadd.f32 %v8646_v40, %v8683_v38  ;;  %v8693_v15 = vadd.f32 %v8631_v43, %v3726_v53 }
 0xd96   :  { %9742 = vst [vmem:[#allocation34_spill] sm:$0xff] %v8688_v4  ;;  %6519 = vrcp.f32 %v3826_v29  ;;  %v3827_v45 = vadd.f32 1.0, %v6508_v36  ;;  %v5279_v63 = vmul.f32 -1.442695, %v3772_v48  ;;  %v3773_v56 = vadd.f32 %v8646_v40, %v8688_v4  ;;  %v6632_v48 = vld [vmem:[%s9439_s1 + $0x90] sm:$0xff] }
 0xd97   :  { %9743 = vst [vmem:[#allocation2_spill] sm:$0xff] %v8693_v15  ;;  %6521 = vrcp.f32 %v3829_v25  ;;  %v5277_v44 = vmul.f32 -1.442695, %v3770_v27  ;;  %v3771_v62 = vadd.f32 %v8646_v40, %v8693_v15  ;;  %v9774_v38 = vmov 0  }
 0xd98   :  { %6523 = vrcp.f32 %v3827_v45  ;;  %v5280_v18 = vmul.f32 -1.442695, %v3773_v56 }
 0xd99   :  { %6525 = vpow2.f32 %v5279_v63  ;;  %v5278_v6 = vmul.f32 -1.442695, %v3771_v62  ;;  %v6179_v33 = vpop.f32.mrb[140].mxu0 }
 0xd9a   :  { %v6510_v22 = vpop.eup %6509  ;;  %6527 = vpow2.f32 %v5277_v44  ;;  %v8700_v43 = vadd.f32 %v6179_v33, %v8639_v21  ;;  %v3739_v37 = vpop.f32.mrb[141].mxu0 }
 0xd9b   :  { %v6512_v46 = vpop.eup %6511  ;;  %v3832_v14 = vadd.f32 1.0, %v6510_v22  ;;  %6529 = vpow2.f32 %v5280_v18  ;;  %v8703_v2 = vadd.f32 %v8635_v28, %v3739_v37  ;;  %v6180_v52 = vpop.f32.mrb[142].mxu0  ;;  %v6634_v22 = vld [vmem:[%s9439_s1 + $0xa8] sm:$0xff] }
 0xd9c   :  { %9744 = vst [vmem:[#allocation36_spill] sm:$0xff] %v8700_v43  ;;  %v6514_v57 = vpop.eup %6513  ;;  %v3830_v16 = vadd.f32 1.0, %v6512_v46  ;;  %6531 = vpow2.f32 %v5278_v6  ;;  %v3776_v51 = vadd.f32 %v8646_v40, %v8700_v43  ;;  %v8708_v9 = vadd.f32 %v6180_v52, %v8641_v20  ;;  %v3742_v30 = vpop.f32.mrb[143].mxu0  ;;  %v6633_v6 = vld [vmem:[%s9439_s1 + $0xa0] sm:$0xff]  ;;  %v6635_v46 = vld [vmem:[%s9439_s1 + $0xb8] sm:$0xff] }
 0xd9d   :  { %9745 = vst [vmem:[#allocation4_spill] sm:$0xff] %v8703_v2  ;;  %v6516_v21 = vpop.eup %6515  ;;  %6533 = vrcp.f32 %v3832_v14  ;;  %v3833_v0 = vadd.f32 1.0, %v6514_v57  ;;  %v3774_v13 = vadd.f32 %v8646_v40, %v8703_v2  ;;  %v8713_v28 = vadd.f32 %v8637_v55, %v3742_v30 }
 0xd9e   :  { %9746 = vst [vmem:[#allocation39_spill] sm:$0xff] %v8708_v9  ;;  %6535 = vrcp.f32 %v3830_v16  ;;  %v3831_v58 = vadd.f32 1.0, %v6516_v21  ;;  %v5283_v24 = vmul.f32 -1.442695, %v3776_v51  ;;  %v3777_v47 = vadd.f32 %v8646_v40, %v8708_v9  ;;  %v6636_v21 = vld [vmem:[%s9439_s1 + $0xb0] sm:$0xff] }
 0xd9f   :  { %9747 = vst [vmem:[#allocation7_spill] sm:$0xff] %v8713_v28  ;;  %v8717_v61 = vpop.eup %6517  ;;  %6537 = vrcp.f32 %v3833_v0  ;;  %v5281_v20 = vmul.f32 -1.442695, %v3774_v13  ;;  %v3775_v59 = vadd.f32 %v8646_v40, %v8713_v28  ;;  %v6630_v40 = vld [vmem:[%s9439_s1 + $0x88] sm:$0xff] }
 0xda0   :  { %9748 = vst [vmem:[#allocation41_spill] sm:$0xff] %v8717_v61  ;;  %v8721_v32 = vpop.eup %6519  ;;  %6539 = vrcp.f32 %v3831_v58  ;;  %v5284_v11 = vmul.f32 -1.442695, %v3777_v47  ;;  %v8753_v53 = vmul.f32 %v6632_v48, %v8717_v61 }
 0xda1   :  { %9749 = vst [vmem:[#allocation6_spill] sm:$0xff] %v8721_v32  ;;  %v8723_v26 = vpop.eup %6521  ;;  %6541 = vpow2.f32 %v5283_v24  ;;  %v5282_v55 = vmul.f32 -1.442695, %v3775_v59  ;;  %v8731_v41 = vmul.f32 %v6629_v34, %v8721_v32 }
 0xda2   :  { %9750 = vst [vmem:[#allocation38_spill] sm:$0xff] %v8723_v26  ;;  %v8725_v3 = vpop.eup %6523  ;;  %6543 = vpow2.f32 %v5281_v20  ;;  %v8743_v35 = vmul.f32 %v6631_v17, %v8723_v26 }
 0xda3   :  { %9751 = vst [vmem:[#allocation9_spill] sm:$0xff] %v8725_v3  ;;  %v6526_v54 = vpop.eup %6525  ;;  %6545 = vpow2.f32 %v5284_v11  ;;  %v8737_v8 = vmul.f32 %v6630_v40, %v8725_v3  ;;  %v6638_v40 = vld [vmem:[%s9439_s1 + $0xc8] sm:$0xff] }
 0xda4   :  { %v6528_v1 = vpop.eup %6527  ;;  %v3836_v49 = vadd.f32 1.0, %v6526_v54  ;;  %6547 = vpow2.f32 %v5282_v55  ;;  %v8760_v63 = vpack.c.bf16 %v8743_v35, %v8753_v53  ;;  %v6637_v54 = vld [vmem:[%s9439_s1 + $0xc0] sm:$0xff] }
 0xda5   :  { %v6530_v39 = vpop.eup %6529  ;;  %v3834_v19 = vadd.f32 1.0, %v6528_v1  ;;  %v8747_v29 = vpack.c.bf16 %v8737_v8, %v8731_v41  ;;  %v6639_v1 = vld [vmem:[%s9439_s1 + $0xd8] sm:$0xff] }
 0xda6   :  { %v6532_v36 = vpop.eup %6531  ;;  %6549 = vrcp.f32 %v3836_v49  ;;  %v3837_v25 = vadd.f32 1.0, %v6530_v39 }
 0xda7   :  { %v8755_v27 = vpop.eup %6533  ;;  %6551 = vrcp.f32 %v3834_v19  ;;  %v3835_v45 = vadd.f32 1.0, %v6532_v36  ;;  %6181 = vmatprep.subr.bf16.mxu0 %v8747_v29  ;;  %v6640_v19 = vld [vmem:[%s9439_s1 + $0xd0] sm:$0xff] }
 0xda8   :  { %9752 = vst [vmem:[#allocation40_spill] sm:$0xff] %v8755_v27  ;;  %v8762_v56 = vpop.eup %6535  ;;  %6553 = vrcp.f32 %v3837_v25  ;;  %6182 = vmatpush3.bf16.msra.mxu0 %v8747_v29  ;;  %v8797_v0 = vmul.f32 %v6636_v21, %v8755_v27 }
 0xda9   :  { %9753 = vst [vmem:[#allocation8_spill] sm:$0xff] %v8762_v56  ;;  %v8765_v44 = vpop.eup %6537  ;;  %6555 = vrcp.f32 %v3835_v45  ;;  %6183 = vmatprep.subr.bf16.mxu0 %v8760_v63  ;;  %v8774_v33 = vmul.f32 %v6633_v6, %v8762_v56 }
 0xdaa   :  { %9754 = vst [vmem:[#allocation44_spill] sm:$0xff] %v8765_v44  ;;  %v8768_v62 = vpop.eup %6539  ;;  %v8786_v14 = vmul.f32 %v6635_v46, %v8765_v44 }
 0xdab   :  { %9755 = vst [vmem:[#allocation11_spill] sm:$0xff] %v8768_v62  ;;  %v6542_v18 = vpop.eup %6541  ;;  %v8780_v37 = vmul.f32 %v6634_v22, %v8768_v62  ;;  %v6641_v22 = vld [vmem:[%s9439_s1 + $0xe0] sm:$0xff] }
 0xdac   :  { %v6544_v52 = vpop.eup %6543  ;;  %v3840_v57 = vadd.f32 1.0, %v6542_v18  ;;  %6184 = vmatpush3.bf16.msra.mxu0 %v8760_v63  ;;  %v8802_v47 = vpack.c.bf16 %v8786_v14, %v8797_v0 }
 0xdad   :  { %v6546_v16 = vpop.eup %6545  ;;  %v3838_v51 = vadd.f32 1.0, %v6544_v52  ;;  %v8791_v30 = vpack.c.bf16 %v8780_v37, %v8774_v33  ;;  %v6642_v52 = vld [vmem:[%s9439_s1 + $0xe8] sm:$0xff] }
 0xdae   :  { %v6548_v13 = vpop.eup %6547  ;;  %6557 = vrcp.f32 %v3840_v57  ;;  %v3841_v58 = vadd.f32 1.0, %v6546_v16  ;;  %9756 = vst [vmem:[#allocation46_spill] sm:$0xff] %v8802_v47  ;;  %v6643_v16 = vld [vmem:[%s9439_s1 + $0xf8] sm:$0xff] }
 0xdaf   :  { %6559 = vrcp.f32 %v3838_v51  ;;  %v3839_v24 = vadd.f32 1.0, %v6548_v13  ;;  %6185 = vmatprep.subr.bf16.mxu0 %v8791_v30  ;;  %v6644_v13 = vld [vmem:[%s9439_s1 + $0xf0] sm:$0xff] }
 0xdb0   :  { %v8804_v20 = vpop.eup %6549  ;;  %6561 = vrcp.f32 %v3841_v58  ;;  %6186 = vmatpush3.bf16.msra.mxu0 %v8791_v30 }
 0xdb1   :  { %9757 = vst [vmem:[#allocation10_spill] sm:$0xff] %v8804_v20  ;;  %v8807_v59 = vpop.eup %6551  ;;  %6563 = vrcp.f32 %v3839_v24  ;;  %6187 = vmatprep.subr.bf16.mxu0 %v8802_v47  ;;  %v8841_v48 = vmul.f32 %v6640_v19, %v8804_v20  ;;  %v8916_v19 = vld [vmem:[%s9440_s2 + $0x20] sm:$0xff]  }
 0xdb2   :  { %9758 = vst [vmem:[#allocation43_spill] sm:$0xff] %v8807_v59  ;;  %v8810_v11 = vpop.eup %6553  ;;  %v8819_v34 = vmul.f32 %v6637_v54, %v8807_v59  ;;  %v8898_v54 = vld [vmem:[%s9440_s2 + $0x8] sm:$0xff]  }
 0xdb3   :  { %9759 = vst [vmem:[#allocation13_spill] sm:$0xff] %v8810_v11  ;;  %v8812_v55 = vpop.eup %6555  ;;  %v8831_v49 = vmul.f32 %v6639_v1, %v8810_v11  ;;  %v8910_v1 = vld [vmem:[%s9440_s2 + $0x18] sm:$0xff]  }
 0xdb4   :  { %9760 = vst [vmem:[#allocation45_spill] sm:$0xff] %v8812_v55  ;;  %6188 = vmatpush3.bf16.msra.mxu0 %v8802_v47  ;;  %v8825_v17 = vmul.f32 %v6638_v40, %v8812_v55  ;;  %v8904_v40 = vld [vmem:[%s9440_s2 + $0x10] sm:$0xff]  }
 0xdb5   :  { %v8848_v25 = vpack.c.bf16 %v8831_v49, %v8841_v48 }
 0xdb6   :  { %v8835_v39 = vpack.c.bf16 %v8825_v17, %v8819_v34 }
 0xdb7   :  { %9763 = vst [vmem:[#allocation15_spill] sm:$0xff] %v8848_v25 }
 0xdb8   :  { %9761 = vst [vmem:[#allocation12_spill] sm:$0xff] %v8835_v39  ;;  %v8843_v36 = vpop.eup %6557  ;;  %6189 = vmatprep.subr.bf16.mxu0 %v8835_v39 }
 0xdb9   :  { %9762 = vst [vmem:[#allocation50_spill] sm:$0xff] %v8843_v36  ;;  %v8850_v45 = vpop.eup %6559  ;;  %6190 = vmatpush3.bf16.msra.mxu0 %v8835_v39  ;;  %v8885_v58 = vmul.f32 %v6644_v13, %v8843_v36  ;;  %v8940_v13 = vld [vmem:[%s9440_s2 + $0x40] sm:$0xff]  }
 0xdba   :  { %9764 = vst [vmem:[#allocation52_spill] sm:$0xff] %v8850_v45  ;;  %v8853_v18 = vpop.eup %6561  ;;  %6191 = vmatprep.subr.bf16.mxu0 %v8848_v25  ;;  %v8862_v46 = vmul.f32 %v6641_v22, %v8850_v45  ;;  %v8922_v22 = vld [vmem:[%s9440_s2 + $0x28] sm:$0xff]  }
 0xdbb   :  { %9765 = vst [vmem:[#allocation14_spill] sm:$0xff] %v8853_v18  ;;  %v8856_v6 = vpop.eup %6563  ;;  %v8874_v51 = vmul.f32 %v6643_v16, %v8853_v18  ;;  %v8934_v16 = vld [vmem:[%s9440_s2 + $0x38] sm:$0xff]  }
 0xdbc   :  { %9766 = vst [vmem:[#allocation48_spill] sm:$0xff] %v8856_v6  ;;  %v8868_v57 = vmul.f32 %v6642_v52, %v8856_v6  ;;  %v8928_v52 = vld [vmem:[%s9440_s2 + $0x30] sm:$0xff]  }
 0xdbd   :  { %6192 = vmatpush3.bf16.msra.mxu0 %v8848_v25  ;;  %v8890_v24 = vpack.c.bf16 %v8874_v51, %v8885_v58 }
 0xdbe   :  { %v8879_v21 = vpack.c.bf16 %v8868_v57, %v8862_v46 }
 0xdbf   :  { %9768 = vst [vmem:[#allocation51_spill] sm:$0xff] %v8890_v24 }
 0xdc0   :  { %9767 = vst [vmem:[#allocation17_spill] sm:$0xff] %v8879_v21  ;;  %6193 = vmatprep.subr.bf16.mxu0 %v8879_v21 }
 0xdc1   :  { %6194 = vmatpush3.bf16.msra.mxu0 %v8879_v21 }
 0xdc2   :  { %6195 = vmatprep.subr.bf16.mxu0 %v8890_v24 }
 0xdc5   :  { %6196 = vmatpush3.bf16.msra.mxu0 %v8890_v24 }
 0xdc8   :  { %6198 = vmatmul.mubr.bf16.vlgmr.msra.gmra.mrb[144].mxu0 %v8898_v54 }
 0xdc9   :  { %6201 = vmatprep.mubr.bf16.mxu0 %v8904_v40 }
 0xdd0   :  { %6202 = vmatmul.mubr.bf16.gmra.mrb[148].mxu0 %v8910_v1 }
 0xdd1   :  { %6205 = vmatprep.mubr.bf16.mxu0 %v8916_v19 }
 0xdd8   :  { %6206 = vmatmul.mubr.bf16.gmra.mrb[152].mxu0 %v8922_v22 }
 0xdd9   :  { %6209 = vmatprep.mubr.bf16.mxu0 %v8928_v52 }
 0xde0   :  { %6210 = vmatmul.mubr.bf16.gmra.mrb[156].mxu0 %v8934_v16 }
 0xde1   :  { %6261 = vmatprep.mubr.bf16.mxu0 %v8940_v13 }
 0xe9b   :  { %v8943_v18 = vpop.f32.mrb[144].mxu0 }
 0xe9c   :  { %v8945_v36 = vpop.f32.mrb[145].mxu0 }
 0xe9d   :  { %v8947_v6 = vpop.f32.mrb[146].mxu0 }
 0xe9e   :  { %v8951_v45 = vpack.c.bf16 %v8947_v6, %v8943_v18  ;;  %v8953_v11 = vpop.f32.mrb[147].mxu0 }
 0xe9f   :  { %v3995_v20 = vpack.c.bf16 %v8953_v11, %v8945_v36 }
 0xea1   :  { %4390 = vrot.lane.b32.xlu1 %v3995_v20, %s6660_s28  ;;  %6213 = vmatprep.subr.bf16.mxu1 %v3995_v20 }
 0xea2   :  { %6245 = vmatprep.subr.bf16.mxu0 %v3995_v20  ;;  %6214 = vmatpush3.bf16.msra.mxu1 %v3995_v20 }
 0xea3   :  { %6246 = vmatpush3.bf16.msra.mxu0 %v3995_v20  ;;  %v8958_v55 = vpop.f32.mrb[148].mxu0  ;;  %6215 = vmatprep.subr.bf16.mxu1 %v8951_v45 }
 0xea4   :  { %v8961_v59 = vpop.f32.mrb[149].mxu0  ;;  %6247 = vmatprep.subr.bf16.mxu0 %v8951_v45 }
 0xea5   :  { %v8964_v44 = vpop.f32.mrb[150].mxu0 }
 0xea6   :  { %v8968_v27 = vpack.c.bf16 %v8964_v44, %v8958_v55  ;;  %v8970_v62 = vpop.f32.mrb[151].mxu0  ;;  %6216 = vmatpush3.bf16.msra.mxu1 %v8951_v45 }
 0xea7   :  { %v8975_v20 = vpack.c.bf16 %v8970_v62, %v8961_v59  ;;  %6248 = vmatpush3.bf16.msra.mxu0 %v8951_v45 }
 0xea9   :  { %6217 = vmatprep.subr.bf16.mxu1 %v8975_v20  ;;  %6249 = vmatprep.subr.bf16.mxu0 %v8975_v20 }
 0xeaa   :  { %6218 = vmatpush3.bf16.msra.mxu1 %v8975_v20 }
 0xeab   :  { %6250 = vmatpush3.bf16.msra.mxu0 %v8975_v20  ;;  %v8982_v56 = vpop.f32.mrb[152].mxu0  ;;  %6219 = vmatprep.subr.bf16.mxu1 %v8968_v27 }
 0xeac   :  { %v8985_v26 = vpop.f32.mrb[153].mxu0  ;;  %6251 = vmatprep.subr.bf16.mxu0 %v8968_v27 }
 0xead   :  { %v8988_v61 = vpop.f32.mrb[154].mxu0 }
 0xeae   :  { %v8992_v3 = vpack.c.bf16 %v8988_v61, %v8982_v56  ;;  %v8994_v32 = vpop.f32.mrb[155].mxu0  ;;  %6220 = vmatpush3.bf16.msra.mxu1 %v8968_v27 }
 0xeaf   :  { %9769 = vst [vmem:[#allocation16_spill] sm:$0xff] %v8994_v32  ;;  %v8999_v43 = vpack.c.bf16 %v8994_v32, %v8985_v26  ;;  %6252 = vmatpush3.bf16.msra.mxu0 %v8968_v27 }
 0xeb1   :  { %6221 = vmatprep.subr.bf16.mxu1 %v8999_v43  ;;  %6253 = vmatprep.subr.bf16.mxu0 %v8999_v43 }
 0xeb2   :  { %6222 = vmatpush3.bf16.msra.mxu1 %v8999_v43 }
 0xeb3   :  { %6254 = vmatpush3.bf16.msra.mxu0 %v8999_v43  ;;  %v9006_v9 = vpop.f32.mrb[156].mxu0  ;;  %6223 = vmatprep.subr.bf16.mxu1 %v8992_v3 }
 0xeb4   :  { %9770 = vst [vmem:[#allocation27_spill] sm:$0xff] %v9006_v9  ;;  %v9009_v28 = vpop.f32.mrb[157].mxu0  ;;  %6255 = vmatprep.subr.bf16.mxu0 %v8992_v3 }
 0xeb5   :  { %9771 = vst [vmem:[#allocation29_spill] sm:$0xff] %v9009_v28  ;;  %v9012_v2 = vpop.f32.mrb[158].mxu0 }
 0xeb6   :  { %9772 = vst [vmem:[#allocation58_spill] sm:$0xff] %v9012_v2  ;;  %v9016_v4 = vpack.c.bf16 %v9012_v2, %v9006_v9  ;;  %v9018_v60 = vpop.f32.mrb[159].mxu0  ;;  %6224 = vmatpush3.bf16.msra.mxu1 %v8992_v3 }
 0xeb7   :  { %9773 = vst [vmem:[#allocation59_spill] sm:$0xff] %v9018_v60  ;;  %v9023_v15 = vpack.c.bf16 %v9018_v60, %v9009_v28  ;;  %6256 = vmatpush3.bf16.msra.mxu0 %v8992_v3 }
 0xeb9   :  { %6225 = vmatprep.subr.bf16.mxu1 %v9023_v15  ;;  %6257 = vmatprep.subr.bf16.mxu0 %v9023_v15 }
 0xeba   :  { %6226 = vmatpush3.bf16.msra.mxu1 %v9023_v15 }
 0xebb   :  { %6258 = vmatpush3.bf16.msra.mxu0 %v9023_v15  ;;  %6227 = vmatprep.subr.bf16.mxu1 %v9016_v4 }
 0xebc   :  { %6259 = vmatprep.subr.bf16.mxu0 %v9016_v4 }
 0xebe   :  { %6228 = vmatpush3.bf16.msra.mxu1 %v9016_v4 }
 0xebf   :  { %6260 = vmatpush3.bf16.msra.mxu0 %v9016_v4 }
 0xec0   :  { %4623 = vmatprep.subr.bf16.mxu0 %v9774_v38 }
 0xec1   :  { %6230 = vmatmul.mubr.bf16.vlgmr.msra.gmra.mrb[176].mxu1 %v8898_v54  ;;  %v9053_v54 = vld [vmem:[%s9440_s2 + $0x58] sm:$0xff]  }
 0xec2   :  { %6262 = vmatmul.mubr.bf16.vlgmr.msra.gmra.mrb[160].mxu0 %v9039_v50  ;;  %6233 = vmatprep.mubr.bf16.mxu1 %v8904_v40  ;;  %v9060_v40 = vld [vmem:[%s9440_s2 + $0x60] sm:$0xff]  }
 0xec3   :  { %6265 = vmatprep.mubr.bf16.mxu0 %v9046_v42 }
 0xec9   :  { %6234 = vmatmul.mubr.bf16.gmra.mrb[180].mxu1 %v8910_v1  ;;  %v9067_v1 = vld [vmem:[%s9440_s2 + $0x68] sm:$0xff]  }
 0xeca   :  { %6266 = vmatmul.mubr.bf16.gmra.mrb[164].mxu0 %v9053_v54  ;;  %6237 = vmatprep.mubr.bf16.mxu1 %v8916_v19  ;;  %v9074_v19 = vld [vmem:[%s9440_s2 + $0x70] sm:$0xff]  }
 0xecb   :  { %6269 = vmatprep.mubr.bf16.mxu0 %v9060_v40 }
 0xed1   :  { %6238 = vmatmul.mubr.bf16.gmra.mrb[184].mxu1 %v8922_v22  ;;  %v9081_v22 = vld [vmem:[%s9440_s2 + $0x78] sm:$0xff]  }
 0xed2   :  { %6270 = vmatmul.mubr.bf16.gmra.mrb[168].mxu0 %v9067_v1  ;;  %6241 = vmatprep.mubr.bf16.mxu1 %v8928_v52 }
 0xed3   :  { %6273 = vmatprep.mubr.bf16.mxu0 %v9074_v19 }
 0xed9   :  { %6242 = vmatmul.mubr.bf16.gmra.mrb[188].mxu1 %v8934_v16 }
 0xeda   :  { %6274 = vmatmul.mubr.bf16.gmra.mrb[172].mxu0 %v9081_v22  ;;  %6293 = vmatprep.mubr.bf16.mxu1 %v8940_v13 }
 0xf94   :  { %v6231_v31 = vpop.f32.mrb[176].mxu1 }
 0xf95   :  { %v4102_v52 = vmul.f32 2.0, %v6231_v31  ;;  %v6263_v7 = vpop.f32.mrb[160].mxu0  ;;  %v4037_v10 = vpop.f32.mrb[177].mxu1 }
 0xf96   :  { %v4100_v23 = vmul.f32 2.0, %v4037_v10  ;;  %v4174_v5 = vpop.f32.mrb[161].mxu0  ;;  %v6232_v12 = vpop.f32.mrb[178].mxu1 }
 0xf97   :  { %v4103_v24 = vmul.f32 2.0, %v6232_v12  ;;  %v6264_v21 = vpop.f32.mrb[162].mxu0  ;;  %v4040_v25 = vpop.f32.mrb[179].mxu1  ;;  %v4118_v47 = vsub.f32 %v4102_v52, %v8753_v53 }
 0xf98   :  { %v4238_v16 = vpack.c.bf16 %v6264_v21, %v6263_v7  ;;  %v4101_v39 = vmul.f32 2.0, %v4040_v25  ;;  %v4177_v60 = vpop.f32.mrb[163].mxu0  ;;  %v4116_v13 = vsub.f32 %v4100_v23, %v8731_v41 }
 0xf99   :  { %v4119_v2 = vsub.f32 %v4103_v24, %v8743_v35  ;;  %v4237_v28 = vpack.c.bf16 %v4177_v60, %v4174_v5 }
 0xf9a   :  { %v4117_v31 = vsub.f32 %v4101_v39, %v8737_v8 }
 0xf9b   :  { %v4133_v9 = vpack.c.bf16 %v4119_v2, %v4118_v47  ;;  %4438 = vrot.lane.b32.xlu1 %v4237_v28, %s6662_s27  ;;  %6277 = vmatprep.subr.bf16.mxu1 %v4237_v28 }
 0xf9c   :  { %v4132_v10 = vpack.c.bf16 %v4117_v31, %v4116_v13  ;;  %6278 = vmatpush3.bf16.msra.mxu1 %v4237_v28  ;;  %v6235_v12 = vpop.f32.mrb[180].mxu1 }
 0xf9d   :  { %v4106_v32 = vmul.f32 2.0, %v6235_v12  ;;  %v6267_v7 = vpop.f32.mrb[164].mxu0  ;;  %v4053_v25 = vpop.f32.mrb[181].mxu1  ;;  %6279 = vmatprep.subr.bf16.mxu1 %v4238_v16 }
 0xf9e   :  { %v4104_v21 = vmul.f32 2.0, %v4053_v25  ;;  %v4190_v53 = vpop.f32.mrb[165].mxu0  ;;  %4414 = vrot.lane.b32.xlu0 %v4132_v10, %s6661_s17  ;;  %v6236_v5 = vpop.f32.mrb[182].mxu1 }
 0xf9f   :  { %v6268_v60 = vpop.f32.mrb[166].mxu0  ;;  %4416 = vrot.lane.b32.xlu1 %v4133_v9, %s6661_s17  ;;  %v4107_v23 = vmul.f32 2.0, %v6236_v5  ;;  %v4056_v2 = vpop.f32.mrb[183].mxu1  ;;  %v4122_v28 = vsub.f32 %v4106_v32, %v8797_v0 }
 0xfa0   :  { %v9092_v41 = vpack.c.bf16 %v6268_v60, %v6267_v7  ;;  %v4105_v8 = vmul.f32 2.0, %v4056_v2  ;;  %v4193_v35 = vpop.f32.mrb[167].mxu0  ;;  %6280 = vmatpush3.bf16.msra.mxu1 %v4238_v16  ;;  %v4120_v24 = vsub.f32 %v4104_v21, %v8774_v33 }
 0xfa1   :  { %v4123_v47 = vsub.f32 %v4107_v23, %v8786_v14  ;;  %v4239_v39 = vpack.c.bf16 %v4193_v35, %v4190_v53 }
 0xfa2   :  { %v4121_v52 = vsub.f32 %v4105_v8, %v8780_v37  ;;  %4392 = vrot.lane.b32.xlu0 %v8951_v45, %s6660_s28 }
 0xfa3   :  { %v4135_v9 = vpack.c.bf16 %v4123_v47, %v4122_v28  ;;  %6281 = vmatprep.subr.bf16.mxu1 %v4239_v39  ;;  %4394 = vrot.lane.b32.xlu1 %v8975_v20, %s6660_s28 }
 0xfa4   :  { %v4134_v13 = vpack.c.bf16 %v4121_v52, %v4120_v24  ;;  %6282 = vmatpush3.bf16.msra.mxu1 %v4239_v39  ;;  %v6239_v31 = vpop.f32.mrb[184].mxu1 }
 0xfa5   :  { %v4110_v10 = vmul.f32 2.0, %v6239_v31  ;;  %v6271_v32 = vpop.f32.mrb[168].mxu0  ;;  %v4069_v0 = vpop.f32.mrb[185].mxu1  ;;  %6283 = vmatprep.subr.bf16.mxu1 %v9092_v41 }
 0xfa6   :  { %v4108_v14 = vmul.f32 2.0, %v4069_v0  ;;  %v4206_v33 = vpop.f32.mrb[169].mxu0  ;;  %4440 = vrot.lane.b32.xlu0 %v4238_v16, %s6662_s27  ;;  %v6240_v37 = vpop.f32.mrb[186].mxu1 }
 0xfa7   :  { %v6272_v12 = vpop.f32.mrb[170].mxu0  ;;  %4442 = vrot.lane.b32.xlu1 %v4239_v39, %s6662_s27  ;;  %v4111_v45 = vmul.f32 2.0, %v6240_v37  ;;  %v4072_v7 = vpop.f32.mrb[187].mxu1  ;;  %v4126_v53 = vsub.f32 %v4110_v10, %v8841_v48 }
 0xfa8   :  { %v4242_v25 = vpack.c.bf16 %v6272_v12, %v6271_v32  ;;  %v4109_v20 = vmul.f32 2.0, %v4072_v7  ;;  %v4209_v21 = vpop.f32.mrb[171].mxu0  ;;  %6284 = vmatpush3.bf16.msra.mxu1 %v9092_v41  ;;  %v4124_v23 = vsub.f32 %v4108_v14, %v8819_v34 }
 0xfa9   :  { %v4127_v5 = vsub.f32 %v4111_v45, %v8831_v49  ;;  %v4241_v60 = vpack.c.bf16 %v4209_v21, %v4206_v33 }
 0xfaa   :  { %v4125_v16 = vsub.f32 %v4109_v20, %v8825_v17  ;;  %4418 = vrot.lane.b32.xlu0 %v4134_v13, %s6661_s17 }
 0xfab   :  { %v4137_v2 = vpack.c.bf16 %v4127_v5, %v4126_v53  ;;  %6285 = vmatprep.subr.bf16.mxu1 %v4241_v60  ;;  %4420 = vrot.lane.b32.xlu1 %v4135_v9, %s6661_s17 }
 0xfac   :  { %v4136_v8 = vpack.c.bf16 %v4125_v16, %v4124_v23  ;;  %6286 = vmatpush3.bf16.msra.mxu1 %v4241_v60  ;;  %v6243_v35 = vpop.f32.mrb[188].mxu1 }
 0xfad   :  { %v4114_v28 = vmul.f32 2.0, %v6243_v35  ;;  %v6275_v47 = vpop.f32.mrb[172].mxu0  ;;  %v4085_v39 = vpop.f32.mrb[189].mxu1  ;;  %6287 = vmatprep.subr.bf16.mxu1 %v4242_v25 }
 0xfae   :  { %v4112_v48 = vmul.f32 2.0, %v4085_v39  ;;  %v4222_v49 = vpop.f32.mrb[173].mxu0  ;;  %4396 = vrot.lane.b32.xlu0 %v8968_v27, %s6660_s28  ;;  %v6244_v34 = vpop.f32.mrb[190].mxu1 }
 0xfaf   :  { %v6276_v17 = vpop.f32.mrb[174].mxu0  ;;  %4398 = vrot.lane.b32.xlu1 %v8999_v43, %s6660_s28  ;;  %v4115_v24 = vmul.f32 2.0, %v6244_v34  ;;  %v4088_v52 = vpop.f32.mrb[191].mxu1  ;;  %v4130_v10 = vsub.f32 %v4114_v28, %v8885_v58  ;;  %v6403_v58 = vld [vmem:[%s9444_s4 + $0x90] sm:$0xff]  }
 0xfb0   :  { %v4244_v9 = vpack.c.bf16 %v6276_v17, %v6275_v47  ;;  %v4113_v13 = vmul.f32 2.0, %v4088_v52  ;;  %v4225_v31 = vpop.f32.mrb[175].mxu0  ;;  %6288 = vmatpush3.bf16.msra.mxu1 %v4242_v25  ;;  %v4128_v14 = vsub.f32 %v4112_v48, %v8862_v46  ;;  %v6395_v46 = vld [vmem:[%s9444_s4 + $0x50] sm:$0xff]  }
 0xfb1   :  { %v4131_v32 = vsub.f32 %v4115_v24, %v8874_v51  ;;  %v4243_v0 = vpack.c.bf16 %v4225_v31, %v4222_v49  ;;  %4624 = vmatpush1.bf16.msra.mxu0 %v6395_v46  ;;  %v6402_v51 = vld [vmem:[%s9444_s4 + $0x88] sm:$0xff]  }
 0xfb2   :  { %v4129_v27 = vsub.f32 %v4113_v13, %v8868_v57  ;;  %4444 = vrot.lane.b32.xlu0 %v9092_v41, %s6662_s27  ;;  %v6396_v57 = vld [vmem:[%s9444_s4 + $0x58] sm:$0xff]   ;;  %4625 = vmatprep.subr.bf16.mxu0 %v9774_v38 }
 0xfb3   :  { %v4139_v33 = vpack.c.bf16 %v4131_v32, %v4130_v10  ;;  %6289 = vmatprep.subr.bf16.mxu1 %v4243_v0  ;;  %4446 = vrot.lane.b32.xlu1 %v4241_v60, %s6662_s27 }
 0xfb4   :  { %v4138_v43 = vpack.c.bf16 %v4129_v27, %v4128_v14  ;;  %6290 = vmatpush3.bf16.msra.mxu1 %v4243_v0 }
 0xfb5   :  { %6291 = vmatprep.subr.bf16.mxu1 %v4244_v9  ;;  %4626 = vmatpush1.bf16.msra.mxu0 %v6396_v57 }
 0xfb6   :  { %4422 = vrot.lane.b32.xlu0 %v4136_v8, %s6661_s17  ;;  %4627 = vmatprep.subr.bf16.mxu0 %v9774_v38 }
 0xfb7   :  { %4424 = vrot.lane.b32.xlu1 %v4137_v2, %s6661_s17 }
 0xfb8   :  { %6292 = vmatpush3.bf16.msra.mxu1 %v4244_v9 }
 0xfba   :  { %4400 = vrot.lane.b32.xlu0 %v8992_v3, %s6660_s28  ;;  %v6401_v3 = vld [vmem:[%s9444_s4 + $0x80] sm:$0xff]  }
 0xfbb   :  { %6294 = vmatmul.mubr.bf16.vlgmr.msra.gmra.mrb[192].mxu1 %v9039_v50  ;;  %4402 = vrot.lane.b32.xlu1 %v9023_v15, %s6660_s28  ;;  %v6398_v50 = vld [vmem:[%s9444_s4 + $0x68] sm:$0xff]   ;;  %v6399_v15 = vld [vmem:[%s9444_s4 + $0x70] sm:$0xff]  }
 0xfbc   :  { %6297 = vmatprep.mubr.bf16.mxu1 %v9046_v42  ;;  %v6397_v42 = vld [vmem:[%s9444_s4 + $0x60] sm:$0xff]  }
 0xfbd   :  { %4628 = vmatpush1.bf16.msra.mxu0 %v6397_v42 }
 0xfbe   :  { %4448 = vrot.lane.b32.xlu0 %v4242_v25, %s6662_s27  ;;  %4629 = vmatprep.subr.bf16.mxu0 %v9774_v38 }
 0xfbf   :  { %4450 = vrot.lane.b32.xlu1 %v4243_v0, %s6662_s27 }
 0xfc1   :  { %4630 = vmatpush1.bf16.msra.mxu0 %v6398_v50 }
 0xfc2   :  { %4426 = vrot.lane.b32.xlu0 %v4138_v43, %s6661_s17  ;;  %4631 = vmatprep.subr.bf16.mxu0 %v9774_v38 }
 0xfc3   :  { %6298 = vmatmul.mubr.bf16.gmra.mrb[196].mxu1 %v9053_v54  ;;  %4428 = vrot.lane.b32.xlu1 %v4139_v33, %s6661_s17  ;;  %v6404_v54 = vld [vmem:[%s9444_s4 + $0x98] sm:$0xff]  }
 0xfc4   :  { %6301 = vmatprep.mubr.bf16.mxu1 %v9060_v40 }
 0xfc5   :  { %4632 = vmatpush1.bf16.msra.mxu0 %v6399_v15 }
 0xfc6   :  { %4404 = vrot.lane.b32.xlu0 %v9016_v4, %s6660_s28  ;;  %v6400_v4 = vld [vmem:[%s9444_s4 + $0x78] sm:$0xff]   ;;  %4633 = vmatprep.subr.bf16.mxu0 %v9774_v38 }
 0xfc9   :  { %4634 = vmatpush1.bf16.msra.mxu0 %v6400_v4 }
 0xfca   :  { %4452 = vrot.lane.b32.xlu0 %v4244_v9, %s6662_s27  ;;  %4635 = vmatprep.subr.bf16.mxu0 %v9774_v38 }
 0xfcb   :  { %6302 = vmatmul.mubr.bf16.gmra.mrb[200].mxu1 %v9067_v1  ;;  %v4391_v1 = vpop.permute.xlu1 %4390 }
 0xfcc   :  { %6305 = vmatprep.mubr.bf16.mxu1 %v9074_v19  ;;  %v4456_v60 = vsel %vm123_vm0, %v8747_v29, %v4391_v1 }
 0xfcd   :  { %4636 = vmatpush1.bf16.msra.mxu0 %v6401_v3  ;;  %v9775_v3 = vld [vmem:[#allocation16_spill] sm:$0xff] }
 0xfce   :  { %4637 = vmatprep.subr.bf16.mxu0 %v9774_v38 }
 0xfd1   :  { %4638 = vmatpush1.bf16.msra.mxu0 %v6402_v51 }
 0xfd2   :  { %4639 = vmatprep.subr.bf16.mxu0 %v9774_v38 }
 0xfd3   :  { %6306 = vmatmul.mubr.bf16.gmra.mrb[204].mxu1 %v9081_v22 }
 0xfd5   :  { %4640 = vmatpush1.bf16.msra.mxu0 %v6403_v58 }
 0xfd6   :  { %4641 = vmatprep.subr.bf16.mxu0 %v9774_v38 }
 0xfd9   :  { %4642 = vmatpush1.bf16.msra.mxu0 %v6404_v54 }
0x100d   :  { %v4439_v37 = vpop.permute.xlu1 %4438 }
0x1010   :  { %v4415_v40 = vpop.permute.xlu0 %4414 }
0x1011   :  { %v4479_v16 = vsel %vm809_vm1, %v4456_v60, %v4415_v40  ;;  %v4417_v8 = vpop.permute.xlu1 %4416 }
0x1012   :  { %v4495_v48 = vsel %vm1991_vm2, %v4479_v16, %v4439_v37 }
0x1014   :  { %v4393_v7 = vpop.permute.xlu0 %4392 }
0x1015   :  { %v4395_v52 = vpop.permute.xlu1 %4394  ;;  %v4459_v9 = vsel %vm123_vm0, %v8760_v63, %v4393_v7 }
0x1016   :  { %v4481_v27 = vsel %vm809_vm1, %v4459_v9, %v4417_v8  ;;  %v4462_v4 = vsel %vm123_vm0, %v8791_v30, %v4395_v52  ;;  %v9777_v30 = vld [vmem:[#allocation29_spill] sm:$0xff] }
0x1018   :  { %v4441_v47 = vpop.permute.xlu0 %4440 }
0x1019   :  { %v4498_v43 = vsel %vm1991_vm2, %v4481_v27, %v4441_v47  ;;  %v4443_v63 = vpop.permute.xlu1 %4442 }
0x101c   :  { %v4419_v31 = vpop.permute.xlu0 %4418 }
0x101d   :  { %v4483_v58 = vsel %vm809_vm1, %v4462_v4, %v4419_v31 }
0x101e   :  { %v4501_v37 = vsel %vm1991_vm2, %v4483_v58, %v4443_v63 }
0x1020   :  { %v4397_v50 = vpop.permute.xlu0 %4396 }
0x108e   :  { %v6295_v19 = vpop.f32.mrb[192].mxu1 }
0x108f   :  { %v4344_v22 = vmul.f32 2.0, %v6295_v19  ;;  %v4279_v41 = vpop.f32.mrb[193].mxu1 }
0x1090   :  { %v4342_v12 = vmul.f32 2.0, %v4279_v41  ;;  %v6296_v45 = vpop.f32.mrb[194].mxu1 }
0x1091   :  { %v4360_v25 = vsub.f32 %v4344_v22, %v8943_v18  ;;  %v4345_v20 = vmul.f32 2.0, %v6296_v45  ;;  %v4282_v21 = vpop.f32.mrb[195].mxu1  ;;  %v4421_v22 = vpop.permute.xlu1 %4420  ;;  %v9776_v45 = vld [vmem:[#allocation27_spill] sm:$0xff] }
0x1092   :  { %v4358_v38 = vsub.f32 %v4342_v12, %v8945_v36  ;;  %v4343_v53 = vmul.f32 2.0, %v4282_v21  ;;  %v4445_v12 = vpop.permute.xlu0 %4444 }
0x1093   :  { %v4361_v5 = vsub.f32 %v4345_v20, %v8947_v6 }
0x1094   :  { %v4359_v23 = vsub.f32 %v4343_v53, %v8953_v11 }
0x1095   :  { %v4375_v2 = vpack.c.bf16 %v4361_v5, %v4360_v25  ;;  %v9779_v5 = vld [vmem:[#allocation46_spill] sm:$0xff] }
0x1096   :  { %v4374_v35 = vpack.c.bf16 %v4359_v23, %v4358_v38  ;;  %v6299_v28 = vpop.f32.mrb[196].mxu1  ;;  %v9778_v38 = vld [vmem:[#allocation58_spill] sm:$0xff]  ;;  %v4465_v60 = vsel %vm123_vm0, %v9779_v5, %v4397_v50  ;;  %v9780_v23 = vld [vmem:[#allocation59_spill] sm:$0xff] }
0x1097   :  { %v4348_v18 = vmul.f32 2.0, %v6299_v28  ;;  %v4295_v39 = vpop.f32.mrb[197].mxu1  ;;  %v4423_v28 = vpop.permute.xlu0 %4422  ;;  %v4485_v47 = vsel %vm809_vm1, %v4465_v60, %v4421_v22 }
0x1098   :  { %v4346_v36 = vmul.f32 2.0, %v4295_v39  ;;  %v6300_v49 = vpop.f32.mrb[198].mxu1  ;;  %5315 = vmatprep.mubr.msk.bf16.mxu0 %vm123_vm0, %v4374_v35  ;;  %v4399_v35 = vpop.permute.xlu1 %4398  ;;  %v9781_v39 = vld [vmem:[#allocation12_spill] sm:$0xff] }
0x1099   :  { %v4364_v6 = vsub.f32 %v4348_v18, %v8958_v55  ;;  %v4349_v29 = vmul.f32 2.0, %v6300_v49  ;;  %v4298_v34 = vpop.f32.mrb[199].mxu1  ;;  %4656 = vmatmul.mubr.bf16.vlgmr.msra.gmra.mrb[176].mxu0 %v4495_v48  ;;  %v4504_v18 = vsel %vm1991_vm2, %v4485_v47, %v4445_v12  ;;  %v4468_v48 = vsel %vm123_vm0, %v9781_v39, %v4399_v35 }
0x109a   :  { %v4362_v11 = vsub.f32 %v4346_v36, %v8961_v59  ;;  %v4347_v17 = vmul.f32 2.0, %v4298_v34  ;;  %5316 = vmatprep.mubr.msk.bf16.mxu0 %vm123_vm0, %v4375_v2  ;;  %v4487_v49 = vsel %vm809_vm1, %v4468_v48, %v4423_v28 }
0x109b   :  { %v4365_v24 = vsub.f32 %v4349_v29, %v8964_v44 }
0x109c   :  { %v4363_v13 = vsub.f32 %v4347_v17, %v8970_v62  ;;  %v4447_v36 = vpop.permute.xlu1 %4446  ;;  %v9782_v17 = vld [vmem:[#allocation15_spill] sm:$0xff] }
0x109d   :  { %v4377_v10 = vpack.c.bf16 %v4365_v24, %v4364_v6  ;;  %v4401_v6 = vpop.permute.xlu0 %4400  ;;  %v4507_v29 = vsel %vm1991_vm2, %v4487_v49, %v4447_v36 }
0x109e   :  { %v4376_v32 = vpack.c.bf16 %v4363_v13, %v4362_v11  ;;  %v6303_v55 = vpop.f32.mrb[200].mxu1  ;;  %v4471_v24 = vsel %vm123_vm0, %v9782_v17, %v4401_v6 }
0x109f   :  { %v4352_v0 = vmul.f32 2.0, %v6303_v55  ;;  %v4311_v14 = vpop.f32.mrb[201].mxu1 }
0x10a0   :  { %v4350_v59 = vmul.f32 2.0, %v4311_v14  ;;  %v6304_v33 = vpop.f32.mrb[202].mxu1  ;;  %v4425_v34 = vpop.permute.xlu1 %4424 }
0x10a1   :  { %v4368_v44 = vsub.f32 %v4352_v0, %v8982_v56  ;;  %v4353_v46 = vmul.f32 2.0, %v6304_v33  ;;  %v4314_v57 = vpop.f32.mrb[203].mxu1  ;;  %4664 = vmatmul.mubr.bf16.gmra.mrb[180].mxu0 %v4498_v43  ;;  %v4449_v11 = vpop.permute.xlu0 %4448  ;;  %v4489_v52 = vsel %vm809_vm1, %v4471_v24, %v4425_v34 }
0x10a2   :  { %v4366_v62 = vsub.f32 %v4350_v59, %v8985_v26  ;;  %v4351_v42 = vmul.f32 2.0, %v4314_v57  ;;  %5317 = vmatprep.mubr.msk.bf16.mxu0 %vm123_vm0, %v4376_v32  ;;  %v4510_v9 = vsel %vm1991_vm2, %v4489_v52, %v4449_v11  ;;  %v9784_v59 = vld [vmem:[#allocation51_spill] sm:$0xff]  ;;  %v9786_v11 = vld [vmem:[#allocation33_spill] sm:$0xff]  ;;  %v9787_v52 = vld [vmem:[#allocation26_spill] sm:$0xff] }
0x10a3   :  { %v4369_v15 = vsub.f32 %v4353_v46, %v8988_v61 }
0x10a4   :  { %v4367_v51 = vsub.f32 %v4351_v42, %v9775_v3  ;;  %v4403_v13 = vpop.permute.xlu1 %4402 }
0x10a5   :  { %v4379_v56 = vpack.c.bf16 %v4369_v15, %v4368_v44  ;;  %v4427_v31 = vpop.permute.xlu0 %4426 }
0x10a6   :  { %v4378_v54 = vpack.c.bf16 %v4367_v51, %v4366_v62  ;;  %v6307_v40 = vpop.f32.mrb[204].mxu1 }
0x10a7   :  { %v4356_v1 = vmul.f32 2.0, %v6307_v40  ;;  %v4327_v19 = vpop.f32.mrb[205].mxu1 }
0x10a8   :  { %v4354_v26 = vmul.f32 2.0, %v4327_v19  ;;  %v6308_v41 = vpop.f32.mrb[206].mxu1  ;;  %v4451_v0 = vpop.permute.xlu1 %4450 }
0x10a9   :  { %v4372_v61 = vsub.f32 %v4356_v1, %v9776_v45  ;;  %v4357_v7 = vmul.f32 2.0, %v6308_v41  ;;  %v4330_v25 = vpop.f32.mrb[207].mxu1  ;;  %4672 = vmatmul.mubr.bf16.gmra.mrb[184].mxu0 %v4501_v37  ;;  %v4405_v14 = vpop.permute.xlu0 %4404 }
0x10aa   :  { %v4370_v20 = vsub.f32 %v4354_v26, %v9777_v30  ;;  %v4355_v21 = vmul.f32 2.0, %v4330_v25  ;;  %5318 = vmatprep.mubr.msk.bf16.mxu0 %vm123_vm0, %v4377_v10  ;;  %v9783_v10 = vld [vmem:[#allocation17_spill] sm:$0xff]  ;;  %v4477_v33 = vsel %vm123_vm0, %v9784_v59, %v4405_v14 }
0x10ab   :  { %v4373_v53 = vsub.f32 %v4357_v7, %v9778_v38  ;;  %v4474_v32 = vsel %vm123_vm0, %v9783_v10, %v4403_v13 }
0x10ac   :  { %v4371_v16 = vsub.f32 %v4355_v21, %v9780_v23  ;;  %v4491_v55 = vsel %vm809_vm1, %v4474_v32, %v4427_v31  ;;  %v4429_v44 = vpop.permute.xlu1 %4428  ;;  %v9788_v32 = vld [vmem:[#allocation31_spill] sm:$0xff] }
0x10ad   :  { %v4381_v2 = vpack.c.bf16 %v4373_v53, %v4372_v61  ;;  %v4513_v27 = vsel %vm1991_vm2, %v4491_v55, %v4451_v0  ;;  %v4453_v43 = vpop.permute.xlu0 %4452  ;;  %v4493_v46 = vsel %vm809_vm1, %v4477_v33, %v4429_v44 }
0x10ae   :  { %v4380_v8 = vpack.c.bf16 %v4371_v16, %v4370_v20  ;;  %v4516_v57 = vsel %vm1991_vm2, %v4493_v46, %v4453_v43  ;;  %v5324_v16 = vld [vmem:[%s9445_s6 + $0x1] ss:$0 sm:$0xff]  ;;  %v9790_v43 = vld [vmem:[#allocation3_spill] sm:$0xff] }
0x10b1   :  { %4680 = vmatmul.mubr.bf16.gmra.mrb[188].mxu0 %v4504_v18 }
0x10b2   :  { %5319 = vmatprep.mubr.msk.bf16.mxu0 %vm123_vm0, %v4378_v54 }
0x10b9   :  { %4688 = vmatmul.mubr.bf16.gmra.mrb[192].mxu0 %v4507_v29  ;;  %v9785_v29 = vld [vmem:[#allocation28_spill] sm:$0xff] }
0x10ba   :  { %5320 = vmatprep.mubr.msk.bf16.mxu0 %vm123_vm0, %v4379_v56 }
0x10c1   :  { %4696 = vmatmul.mubr.bf16.gmra.mrb[196].mxu0 %v4510_v9 }
0x10c2   :  { %5321 = vmatprep.mubr.msk.bf16.mxu0 %vm123_vm0, %v4380_v8 }
0x10c9   :  { %4704 = vmatmul.mubr.bf16.gmra.mrb[200].mxu0 %v4513_v27  ;;  %v9789_v27 = vld [vmem:[#allocation32_spill] sm:$0xff] }
0x10ca   :  { %5322 = vmatprep.mubr.msk.bf16.mxu0 %vm123_vm0, %v4381_v2 }
0x10d1   :  { %4712 = vmatmul.mubr.bf16.gmra.mrb[204].mxu0 %v4516_v57 }
0x116c   :  { %v4657_v63 = vpop.f32.mrb[176].mxu0 }
0x116d   :  { %4736 = vrot.lane.b32.xlu1 %v4657_v63, %s6661_s17  ;;  %v4659_v62 = vpop.f32.mrb[177].mxu0  ;;  %v9791_v63 = vld [vmem:[#allocation30_spill] sm:$0xff] }
0x116e   :  { %v4660_v42 = vpop.f32.mrb[178].mxu0 }
0x116f   :  { %v4662_v50 = vpop.f32.mrb[179].mxu0  ;;  %4738 = vrot.lane.b32.xlu0 %v4660_v42, %s6661_s17 }
0x1170   :  { %v9792_v50 = vld [vmem:[#allocation35_spill] sm:$0xff] }
0x1174   :  { %v4665_v15 = vpop.f32.mrb[180].mxu0 }
0x1175   :  { %4740 = vrot.lane.b32.xlu1 %v4665_v15, %s6661_s17  ;;  %v4667_v4 = vpop.f32.mrb[181].mxu0 }
0x1176   :  { %v4668_v3 = vpop.f32.mrb[182].mxu0 }
0x1177   :  { %v4670_v51 = vpop.f32.mrb[183].mxu0  ;;  %4742 = vrot.lane.b32.xlu0 %v4668_v3, %s6661_s17 }
0x117c   :  { %v4673_v58 = vpop.f32.mrb[184].mxu0 }
0x117d   :  { %4744 = vrot.lane.b32.xlu1 %v4673_v58, %s6661_s17  ;;  %v4675_v56 = vpop.f32.mrb[185].mxu0  ;;  %v9793_v58 = vld [vmem:[#allocation5_spill] sm:$0xff] }
0x117e   :  { %v4676_v54 = vpop.f32.mrb[186].mxu0 }
0x117f   :  { %v4678_v40 = vpop.f32.mrb[187].mxu0  ;;  %4746 = vrot.lane.b32.xlu0 %v4676_v54, %s6661_s17 }
0x1184   :  { %v4681_v1 = vpop.f32.mrb[188].mxu0 }
0x1185   :  { %4748 = vrot.lane.b32.xlu1 %v4681_v1, %s6661_s17  ;;  %v4683_v19 = vpop.f32.mrb[189].mxu0  ;;  %v9794_v1 = vld [vmem:[#allocation2_spill] sm:$0xff] }
0x1186   :  { %v4684_v22 = vpop.f32.mrb[190].mxu0 }
0x1187   :  { %v4686_v26 = vpop.f32.mrb[191].mxu0  ;;  %4750 = vrot.lane.b32.xlu0 %v4684_v22, %s6661_s17 }
0x118c   :  { %v4689_v41 = vpop.f32.mrb[192].mxu0 }
0x118d   :  { %4752 = vrot.lane.b32.xlu1 %v4689_v41, %s6661_s17  ;;  %v4691_v37 = vpop.f32.mrb[193].mxu0 }
0x118e   :  { %v4692_v12 = vpop.f32.mrb[194].mxu0  ;;  %v9795_v37 = vld [vmem:[#allocation37_spill] sm:$0xff] }
0x118f   :  { %v4694_v45 = vpop.f32.mrb[195].mxu0  ;;  %4754 = vrot.lane.b32.xlu0 %v4692_v12, %s6661_s17 }
0x1194   :  { %v4697_v61 = vpop.f32.mrb[196].mxu0 }
0x1195   :  { %4756 = vrot.lane.b32.xlu1 %v4697_v61, %s6661_s17  ;;  %v4699_v7 = vpop.f32.mrb[197].mxu0 }
0x1196   :  { %v4700_v25 = vpop.f32.mrb[198].mxu0  ;;  %v9796_v7 = vld [vmem:[#allocation34_spill] sm:$0xff] }
0x1197   :  { %v4702_v30 = vpop.f32.mrb[199].mxu0  ;;  %4758 = vrot.lane.b32.xlu0 %v4700_v25, %s6661_s17 }
0x119c   :  { %v4705_v20 = vpop.f32.mrb[200].mxu0 }
0x119d   :  { %4760 = vrot.lane.b32.xlu1 %v4705_v20, %s6661_s17  ;;  %v4707_v21 = vpop.f32.mrb[201].mxu0 }
0x119e   :  { %v4708_v38 = vpop.f32.mrb[202].mxu0 }
0x119f   :  { %4762 = vrot.lane.b32.xlu0 %v4708_v38, %s6661_s17  ;;  %v4710_v53 = vpop.f32.mrb[203].mxu0  ;;  %v9797_v38 = vld [vmem:[#allocation4_spill] sm:$0xff] }
0x11a4   :  { %v4713_v5 = vpop.f32.mrb[204].mxu0 }
0x11a5   :  { %4764 = vrot.lane.b32.xlu1 %v4713_v5, %s6661_s17  ;;  %v4715_v60 = vpop.f32.mrb[205].mxu0 }
0x11a6   :  { %v4716_v23 = vpop.f32.mrb[206].mxu0 }
0x11a7   :  { %4766 = vrot.lane.b32.xlu0 %v4716_v23, %s6661_s17  ;;  %v4718_v2 = vpop.f32.mrb[207].mxu0  ;;  %v9798_v23 = vld [vmem:[#allocation7_spill] sm:$0xff] }
0x11a9   :  { %4807 = vrot.lane.b32.xlu1 %v5324_v16, %s6661_s17 }
0x11df   :  { %v4737_v8 = vpop.permute.xlu1 %4736 }
0x11e0   :  { %v4784_v34 = vadd.f32 %v4737_v8, %v9785_v29  ;;  %v9799_v8 = vld [vmem:[#allocation39_spill] sm:$0xff] }
0x11e1   :  { %v4739_v36 = vpop.permute.xlu0 %4738 }
0x11e2   :  { %v4785_v17 = vadd.f32 %v4739_v36, %v9786_v11 }
0x11e7   :  { %v4741_v35 = vpop.permute.xlu1 %4740 }
0x11e8   :  { %v4786_v9 = vadd.f32 %v4741_v35, %v9787_v52 }
0x11e9   :  { %v4743_v6 = vpop.permute.xlu0 %4742 }
0x11ea   :  { %v4787_v55 = vadd.f32 %v4743_v6, %v9788_v32 }
0x11ef   :  { %v4745_v28 = vpop.permute.xlu1 %4744 }
0x11f0   :  { %v4788_v59 = vadd.f32 %v4745_v28, %v9789_v27 }
0x11f1   :  { %v4747_v13 = vpop.permute.xlu0 %4746 }
0x11f2   :  { %v4789_v44 = vadd.f32 %v4747_v13, %v9790_v43  ;;  %v9801_v13 = vld [vmem:[#allocation6_spill] sm:$0xff] }
0x11f7   :  { %v4749_v47 = vpop.permute.xlu1 %4748 }
0x11f8   :  { %v4790_v62 = vadd.f32 %v4749_v47, %v9791_v63 }
0x11f9   :  { %v4751_v33 = vpop.permute.xlu0 %4750 }
0x11fa   :  { %v4791_v15 = vadd.f32 %v4751_v33, %v9792_v50  ;;  %v9804_v33 = vld [vmem:[#allocation56_spill] sm:$0xff] }
0x11ff   :  { %v4753_v18 = vpop.permute.xlu1 %4752 }
0x1200   :  { %v4792_v56 = vadd.f32 %v4753_v18, %v9793_v58  ;;  %v9800_v18 = vld [vmem:[#allocation36_spill] sm:$0xff] }
0x1201   :  { %v4755_v42 = vpop.permute.xlu0 %4754 }
0x1202   :  { %v4793_v19 = vadd.f32 %v4755_v42, %v9794_v1  ;;  %v9806_v42 = vld [vmem:[#allocation38_spill] sm:$0xff] }
0x1203   :  { %v4861_v50 = vsub.f32 1.0, %v9806_v42 }
0x1207   :  { %v4757_v39 = vpop.permute.xlu1 %4756 }
0x1208   :  { %v4794_v12 = vadd.f32 %v4757_v39, %v9795_v37 }
0x1209   :  { %v4759_v54 = vpop.permute.xlu0 %4758 }
0x120a   :  { %v4795_v25 = vadd.f32 %v4759_v54, %v9796_v7 }
0x120f   :  { %v4761_v48 = vpop.permute.xlu1 %4760 }
0x1210   :  { %v4796_v53 = vadd.f32 %v4761_v48, %v9797_v38 }
0x1211   :  { %v4763_v45 = vpop.permute.xlu0 %4762 }
0x1212   :  { %v4797_v16 = vadd.f32 %v4763_v45, %v9798_v23  ;;  %v9814_v23 = vld [vmem:[#allocation44_spill] sm:$0xff] }
0x1217   :  { %v9258_v49 = vpop.permute.xlu1 %4764 }
0x1218   :  { %v4798_v39 = vadd.f32 %v9258_v49, %v9800_v18  ;;  %v9816_v18 = vld [vmem:[#allocation54_spill] sm:$0xff] }
0x1219   :  { %v4767_v5 = vpop.permute.xlu0 %4766 }
0x121a   :  { %v4799_v35 = vadd.f32 %v4767_v5, %v9799_v8 }
0x121b   :  { %v9262_v24 = vpop.permute.xlu1 %4807 }
0x121c   :  { %v4810_v31 = vadd.f32 %v9262_v24, %v4784_v34  ;;  %v4811_v10 = vadd.f32 %v9262_v24, %v4785_v17  ;;  %v4812_v0 = vadd.f32 %v9262_v24, %v4786_v9  ;;  %v4813_v14 = vadd.f32 %v9262_v24, %v4787_v55 }
0x121d   :  { %v4814_v46 = vadd.f32 %v9262_v24, %v4788_v59  ;;  %v4815_v57 = vadd.f32 %v9262_v24, %v4789_v44  ;;  %v4816_v4 = vadd.f32 %v9262_v24, %v4790_v62  ;;  %v4817_v3 = vadd.f32 %v9262_v24, %v4791_v15 }
0x121e   :  { %6565 = vtanh.f32 %v4810_v31  ;;  %v4818_v22 = vadd.f32 %v9262_v24, %v4792_v56  ;;  %v4819_v26 = vadd.f32 %v9262_v24, %v4793_v19  ;;  %v4820_v30 = vadd.f32 %v9262_v24, %v4794_v12  ;;  %v9808_v56 = vld [vmem:[#allocation57_spill] sm:$0xff]  ;;  %v9809_v19 = vld [vmem:[#allocation8_spill] sm:$0xff] }
0x121f   :  { %6567 = vtanh.f32 %v4811_v10  ;;  %v4821_v20 = vadd.f32 %v9262_v24, %v4795_v25  ;;  %v4822_v2 = vadd.f32 %v9262_v24, %v4796_v53  ;;  %v4823_v28 = vadd.f32 %v9262_v24, %v4797_v16  ;;  %v9802_v10 = vld [vmem:[#allocation9_spill] sm:$0xff]  ;;  %v9813_v53 = vld [vmem:[#allocation40_spill] sm:$0xff] }
0x1220   :  { %6569 = vtanh.f32 %v4812_v0  ;;  %v4824_v36 = vadd.f32 %v9262_v24, %v4798_v39  ;;  %v4825_v6 = vadd.f32 %v9262_v24, %v4799_v35  ;;  %v4858_v31 = vsub.f32 1.0, %v9801_v13  ;;  %v9815_v35 = vld [vmem:[#allocation53_spill] sm:$0xff] }
0x1221   :  { %6571 = vtanh.f32 %v4813_v14  ;;  %v4859_v32 = vsub.f32 1.0, %v9802_v10  ;;  %v9803_v14 = vld [vmem:[#allocation55_spill] sm:$0xff]  ;;  %v4843_v43 = vmul.f32 %v9802_v10, %v9804_v33  ;;  %v4845_v54 = vmul.f32 %v9806_v42, %v9808_v56 }
0x1222   :  { %6573 = vtanh.f32 %v4814_v46  ;;  %v4842_v27 = vmul.f32 %v9801_v13, %v9803_v14  ;;  %v4864_v5 = vsub.f32 1.0, %v9813_v53  ;;  %v4865_v16 = vsub.f32 1.0, %v9814_v23 }
0x1223   :  { %6575 = vtanh.f32 %v4815_v57  ;;  %v9805_v57 = vld [vmem:[#allocation41_spill] sm:$0xff]  ;;  %v4849_v39 = vmul.f32 %v9814_v23, %v9816_v18 }
0x1224   :  { %6577 = vtanh.f32 %v4816_v4  ;;  %v4860_v63 = vsub.f32 1.0, %v9805_v57 }
0x1225   :  { %6579 = vtanh.f32 %v4817_v3  ;;  %v9807_v3 = vld [vmem:[#allocation42_spill] sm:$0xff] }
0x1226   :  { %6581 = vtanh.f32 %v4818_v22  ;;  %v4862_v22 = vsub.f32 1.0, %v9809_v19 }
0x1227   :  { %6583 = vtanh.f32 %v4819_v26 }
0x1228   :  { %v6566_v51 = vpop.eup %6565  ;;  %6585 = vtanh.f32 %v4820_v30  ;;  %v9812_v30 = vld [vmem:[#allocation49_spill] sm:$0xff] }
0x1229   :  { %v6568_v40 = vpop.eup %6567  ;;  %4890 = vrot.lane.b32.xlu0 %v6566_v51, %s6662_s27  ;;  %6587 = vtanh.f32 %v4821_v20  ;;  %v4844_v51 = vmul.f32 %v9805_v57, %v9807_v3 }
0x122a   :  { %4892 = vrot.lane.b32.xlu1 %v6568_v40, %s6662_s27  ;;  %v6570_v41 = vpop.eup %6569  ;;  %6589 = vtanh.f32 %v4822_v2 }
0x122b   :  { %v6572_v61 = vpop.eup %6571  ;;  %6591 = vtanh.f32 %v4823_v28  ;;  %v4848_v28 = vmul.f32 %v9813_v53, %v9815_v35 }
0x122c   :  { %v6574_v21 = vpop.eup %6573  ;;  %6593 = vtanh.f32 %v4824_v36 }
0x122d   :  { %4894 = vrot.lane.b32.xlu0 %v6570_v41, %s6662_s27  ;;  %v6576_v60 = vpop.eup %6575  ;;  %6595 = vtanh.f32 %v4825_v6  ;;  %v9810_v41 = vld [vmem:[#allocation11_spill] sm:$0xff] }
0x122e   :  { %4896 = vrot.lane.b32.xlu1 %v6572_v61, %s6662_s27  ;;  %v6578_v47 = vpop.eup %6577  ;;  %v4863_v37 = vsub.f32 1.0, %v9810_v41  ;;  %v9811_v61 = vld [vmem:[#allocation47_spill] sm:$0xff]  ;;  %v4847_v20 = vmul.f32 %v9810_v41, %v9812_v30 }
0x122f   :  { %v6580_v48 = vpop.eup %6579  ;;  %v4846_v7 = vmul.f32 %v9809_v19, %v9811_v61  ;;  %v9817_v6 = vld [vmem:[#allocation43_spill] sm:$0xff] }
0x1230   :  { %v6582_v29 = vpop.eup %6581 }
0x1231   :  { %4898 = vrot.lane.b32.xlu0 %v6574_v21, %s6662_s27  ;;  %v6584_v34 = vpop.eup %6583 }
0x1232   :  { %4900 = vrot.lane.b32.xlu1 %v6576_v60, %s6662_s27  ;;  %v6586_v49 = vpop.eup %6585 }
0x1233   :  { %v6588_v11 = vpop.eup %6587 }
0x1234   :  { %v6590_v17 = vpop.eup %6589 }
0x1235   :  { %4902 = vrot.lane.b32.xlu0 %v6578_v47, %s6662_s27  ;;  %v6592_v52 = vpop.eup %6591 }
0x1236   :  { %4904 = vrot.lane.b32.xlu1 %v6580_v48, %s6662_s27  ;;  %v6594_v24 = vpop.eup %6593 }
0x1237   :  { %v6596_v9 = vpop.eup %6595 }
0x1239   :  { %4906 = vrot.lane.b32.xlu0 %v6582_v29, %s6662_s27  ;;  %v4866_v29 = vsub.f32 1.0, %v9817_v6 }
0x123a   :  { %4908 = vrot.lane.b32.xlu1 %v6584_v34, %s6662_s27 }
0x123d   :  { %4910 = vrot.lane.b32.xlu0 %v6586_v49, %s6662_s27  ;;  %v9818_v49 = vld [vmem:[#allocation45_spill] sm:$0xff] }
0x123e   :  { %4912 = vrot.lane.b32.xlu1 %v6588_v11, %s6662_s27  ;;  %v4867_v11 = vsub.f32 1.0, %v9818_v49 }
0x1241   :  { %4914 = vrot.lane.b32.xlu0 %v6590_v17, %s6662_s27 }
0x1242   :  { %4916 = vrot.lane.b32.xlu1 %v6592_v52, %s6662_s27 }
0x1245   :  { %4918 = vrot.lane.b32.xlu0 %v6594_v24, %s6662_s27  ;;  %v9819_v24 = vld [vmem:[#allocation19_spill] sm:$0xff] }
0x1246   :  { %4920 = vrot.lane.b32.xlu1 %v6596_v9, %s6662_s27  ;;  %v4850_v9 = vmul.f32 %v9817_v6, %v9819_v24 }
0x129b   :  { %v4891_v55 = vpop.permute.xlu0 %4890 }
0x129c   :  { %v4893_v0 = vpop.permute.xlu1 %4892  ;;  %v4938_v59 = vmul.f32 %v4891_v55, %v4858_v31  ;;  %v9820_v31 = vld [vmem:[#allocation21_spill] sm:$0xff] }
0x129d   :  { %v4939_v44 = vmul.f32 %v4893_v0, %v4859_v32  ;;  %v4851_v10 = vmul.f32 %v9818_v49, %v9820_v31  ;;  %v9821_v0 = vld [vmem:[#allocation10_spill] sm:$0xff] }
0x129e   :  { %v4954_v46 = vadd.f32 %v4938_v59, %v4842_v27  ;;  %v4868_v14 = vsub.f32 1.0, %v9821_v0  ;;  %v9822_v59 = vld [vmem:[#allocation13_spill] sm:$0xff] }
0x129f   :  { %v4955_v62 = vadd.f32 %v4939_v44, %v4843_v43  ;;  %v4895_v15 = vpop.permute.xlu0 %4894  ;;  %v4869_v33 = vsub.f32 1.0, %v9822_v59 }
0x12a0   :  { %v4897_v4 = vpop.permute.xlu1 %4896  ;;  %v4940_v58 = vmul.f32 %v4895_v15, %v4860_v63  ;;  %4986 = vrot.lane.b32.xlu0 %v4954_v46, %s6662_s27  ;;  %v9823_v46 = vld [vmem:[#allocation18_spill] sm:$0xff] }
0x12a1   :  { %v4941_v40 = vmul.f32 %v4897_v4, %v4861_v50  ;;  %4988 = vrot.lane.b32.xlu1 %v4955_v62, %s6662_s27  ;;  %v4852_v57 = vmul.f32 %v9821_v0, %v9823_v46  ;;  %v9824_v62 = vld [vmem:[#allocation20_spill] sm:$0xff] }
0x12a2   :  { %v4956_v1 = vadd.f32 %v4940_v58, %v4844_v51  ;;  %v4853_v42 = vmul.f32 %v9822_v59, %v9824_v62  ;;  %v9825_v4 = vld [vmem:[#allocation52_spill] sm:$0xff] }
0x12a3   :  { %v4957_v26 = vadd.f32 %v4941_v40, %v4845_v54  ;;  %v4899_v12 = vpop.permute.xlu0 %4898  ;;  %v4870_v3 = vsub.f32 1.0, %v9825_v4  ;;  %v9826_v58 = vld [vmem:[#allocation48_spill] sm:$0xff] }
0x12a4   :  { %v4901_v45 = vpop.permute.xlu1 %4900  ;;  %v4942_v25 = vmul.f32 %v4899_v12, %v4862_v22  ;;  %4990 = vrot.lane.b32.xlu0 %v4956_v1, %s6662_s27  ;;  %v4871_v56 = vsub.f32 1.0, %v9826_v58  ;;  %v9827_v1 = vld [vmem:[#allocation23_spill] sm:$0xff] }
0x12a5   :  { %v4943_v21 = vmul.f32 %v4901_v45, %v4863_v37  ;;  %4992 = vrot.lane.b32.xlu1 %v4957_v26, %s6662_s27  ;;  %v4854_v19 = vmul.f32 %v9825_v4, %v9827_v1  ;;  %v9828_v26 = vld [vmem:[#allocation25_spill] sm:$0xff]  ;;  %v9829_v45 = vld [vmem:[#allocation50_spill] sm:$0xff] }
0x12a6   :  { %v4958_v38 = vadd.f32 %v4942_v25, %v4846_v7  ;;  %v4855_v41 = vmul.f32 %v9826_v58, %v9828_v26  ;;  %v4872_v61 = vsub.f32 1.0, %v9829_v45  ;;  %v9830_v25 = vld [vmem:[#allocation14_spill] sm:$0xff] }
0x12a7   :  { %v4959_v60 = vadd.f32 %v4943_v21, %v4847_v20  ;;  %v4903_v2 = vpop.permute.xlu0 %4902  ;;  %v4873_v30 = vsub.f32 1.0, %v9830_v25 }
0x12a8   :  { %v4905_v8 = vpop.permute.xlu1 %4904  ;;  %v4944_v47 = vmul.f32 %v4903_v2, %v4864_v5  ;;  %4994 = vrot.lane.b32.xlu0 %v4958_v38, %s6662_s27  ;;  %v9831_v38 = vld [vmem:[#allocation22_spill] sm:$0xff] }
0x12a9   :  { %v4945_v48 = vmul.f32 %v4905_v8, %v4865_v16  ;;  %4996 = vrot.lane.b32.xlu1 %v4959_v60, %s6662_s27  ;;  %v4856_v53 = vmul.f32 %v9829_v45, %v9831_v38  ;;  %v9832_v60 = vld [vmem:[#allocation24_spill] sm:$0xff] }
0x12aa   :  { %v4960_v36 = vadd.f32 %v4944_v47, %v4848_v28  ;;  %v4857_v23 = vmul.f32 %v9830_v25, %v9832_v60 }
0x12ab   :  { %v4961_v34 = vadd.f32 %v4945_v48, %v4849_v39  ;;  %v4907_v17 = vpop.permute.xlu0 %4906 }
0x12ac   :  { %v4909_v52 = vpop.permute.xlu1 %4908  ;;  %v4946_v13 = vmul.f32 %v4907_v17, %v4866_v29  ;;  %4998 = vrot.lane.b32.xlu0 %v4960_v36, %s6662_s27 }
0x12ad   :  { %v4947_v32 = vmul.f32 %v4909_v52, %v4867_v11  ;;  %5000 = vrot.lane.b32.xlu1 %v4961_v34, %s6662_s27 }
0x12ae   :  { %v4962_v55 = vadd.f32 %v4946_v13, %v4850_v9 }
0x12af   :  { %v4963_v27 = vadd.f32 %v4947_v32, %v4851_v10  ;;  %v4911_v43 = vpop.permute.xlu0 %4910 }
0x12b0   :  { %v4913_v44 = vpop.permute.xlu1 %4912  ;;  %v4948_v63 = vmul.f32 %v4911_v43, %v4868_v14  ;;  %5002 = vrot.lane.b32.xlu0 %v4962_v55, %s6662_s27 }
0x12b1   :  { %v4949_v50 = vmul.f32 %v4913_v44, %v4869_v33  ;;  %5004 = vrot.lane.b32.xlu1 %v4963_v27, %s6662_s27 }
0x12b2   :  { %v4964_v15 = vadd.f32 %v4948_v63, %v4852_v57 }
0x12b3   :  { %v4965_v51 = vadd.f32 %v4949_v50, %v4853_v42  ;;  %v4915_v54 = vpop.permute.xlu0 %4914 }
0x12b4   :  { %v4917_v40 = vpop.permute.xlu1 %4916  ;;  %v4950_v22 = vmul.f32 %v4915_v54, %v4870_v3  ;;  %5006 = vrot.lane.b32.xlu0 %v4964_v15, %s6662_s27 }
0x12b5   :  { %v4951_v37 = vmul.f32 %v4917_v40, %v4871_v56  ;;  %5008 = vrot.lane.b32.xlu1 %v4965_v51, %s6662_s27 }
0x12b6   :  { %v4966_v12 = vadd.f32 %v4950_v22, %v4854_v19 }
0x12b7   :  { %v4967_v7 = vadd.f32 %v4951_v37, %v4855_v41  ;;  %v4919_v20 = vpop.permute.xlu0 %4918 }
0x12b8   :  { %v4921_v21 = vpop.permute.xlu1 %4920  ;;  %v4952_v5 = vmul.f32 %v4919_v20, %v4872_v61  ;;  %5010 = vrot.lane.b32.xlu0 %v4966_v12, %s6662_s27 }
0x12b9   :  { %v4953_v16 = vmul.f32 %v4921_v21, %v4873_v30  ;;  %5012 = vrot.lane.b32.xlu1 %v4967_v7, %s6662_s27 }
0x12ba   :  { %v4968_v2 = vadd.f32 %v4952_v5, %v4856_v53 }
0x12bb   :  { %v4969_v8 = vadd.f32 %v4953_v16, %v4857_v23 }
0x12bc   :  { %5014 = vrot.lane.b32.xlu0 %v4968_v2, %s6662_s27 }
0x12bd   :  { %5016 = vrot.lane.b32.xlu1 %v4969_v8, %s6662_s27 }
0x1312   :  { %v4987_v35 = vpop.permute.xlu0 %4986 }
0x1313   :  { %v4989_v28 = vpop.permute.xlu1 %4988  ;;  %5325 = vst.msk [vmem:[%s9446_s7 + $0x80] sm:$0xff] %vm123_vm0, %v4987_v35 }
0x1314   :  { %5326 = vst.msk [vmem:[%s9446_s7 + $0x88] sm:$0xff] %vm123_vm0, %v4989_v28 }
0x1316   :  { %v4991_v47 = vpop.permute.xlu0 %4990 }
0x1317   :  { %v4993_v18 = vpop.permute.xlu1 %4992  ;;  %5327 = vst.msk [vmem:[%s9446_s7 + $0x90] sm:$0xff] %vm123_vm0, %v4991_v47 }
0x1318   :  { %5328 = vst.msk [vmem:[%s9446_s7 + $0x98] sm:$0xff] %vm123_vm0, %v4993_v18 }
0x131a   :  { %v4995_v39 = vpop.permute.xlu0 %4994 }
0x131b   :  { %v4997_v48 = vpop.permute.xlu1 %4996  ;;  %5329 = vst.msk [vmem:[%s9446_s7 + $0xa0] sm:$0xff] %vm123_vm0, %v4995_v39 }
0x131c   :  { %5330 = vst.msk [vmem:[%s9446_s7 + $0xa8] sm:$0xff] %vm123_vm0, %v4997_v48 }
0x131e   :  { %v4999_v36 = vpop.permute.xlu0 %4998 }
0x131f   :  { %v5001_v6 = vpop.permute.xlu1 %5000  ;;  %5331 = vst.msk [vmem:[%s9446_s7 + $0xb0] sm:$0xff] %vm123_vm0, %v4999_v36 }
0x1320   :  { %5332 = vst.msk [vmem:[%s9446_s7 + $0xb8] sm:$0xff] %vm123_vm0, %v5001_v6 }
0x1322   :  { %v5003_v29 = vpop.permute.xlu0 %5002 }
0x1323   :  { %v5005_v34 = vpop.permute.xlu1 %5004  ;;  %5333 = vst.msk [vmem:[%s9446_s7 + $0xc0] sm:$0xff] %vm123_vm0, %v5003_v29 }
0x1324   :  { %5334 = vst.msk [vmem:[%s9446_s7 + $0xc8] sm:$0xff] %vm123_vm0, %v5005_v34 }
0x1326   :  { %v5007_v49 = vpop.permute.xlu0 %5006 }
0x1327   :  { %v5009_v11 = vpop.permute.xlu1 %5008  ;;  %5335 = vst.msk [vmem:[%s9446_s7 + $0xd0] sm:$0xff] %vm123_vm0, %v5007_v49 }
0x1328   :  { %5336 = vst.msk [vmem:[%s9446_s7 + $0xd8] sm:$0xff] %vm123_vm0, %v5009_v11 }
0x132a   :  { %v5011_v17 = vpop.permute.xlu0 %5010 }
0x132b   :  { %v5013_v52 = vpop.permute.xlu1 %5012  ;;  %5337 = vst.msk [vmem:[%s9446_s7 + $0xe0] sm:$0xff] %vm123_vm0, %v5011_v17 }
0x132c   :  { %5338 = vst.msk [vmem:[%s9446_s7 + $0xe8] sm:$0xff] %vm123_vm0, %v5013_v52 }
0x132e   :  { %v5015_v24 = vpop.permute.xlu0 %5014 }
0x132f   :  { %v5017_v9 = vpop.permute.xlu1 %5016  ;;  %5339 = vst.msk [vmem:[%s9446_s7 + $0xf0] sm:$0xff] %vm123_vm0, %v5015_v24 }
0x1330   :  { %5340 = vst.msk [vmem:[%s9446_s7 + $0xf8] sm:$0xff] %vm123_vm0, %v5017_v9 }

</bundles_post_ra>
